<compile_context>
chip_gen: v7x
topology: tpu7x:2x2x1
jax: 0.10.0
libtpu: 0.0.40
codegen_flags: <defaults>
</compile_context>

<pallas_src>
import jax
import jax.numpy as jnp
from jax import lax
from jax.experimental import pallas as pl
from jax.experimental.pallas import tpu as pltpu

# ---------------- dimensions (small synthetic sizes) ----------------
B = 2        # batch
FF = 32      # feed_forward_dim
E = 32       # conv_embed_dim  (== ConvTranspose1d kernel size -> decoder length)
P = 16       # nPoints
C2 = 512
C3 = 256
CO = 4       # coord_input_dim
FL = 3       # flag_input_dim
QU = 8       # quant_input_dim
HEAD = CO + FL + QU
EPS = 1e-5


# ---------------- Pallas kernel ----------------
def _dot(a, b):
    # Default MXU precision, f32 accumulation.
    return jnp.dot(a, b, preferred_element_type=jnp.float32)


def _conv3(x, w_ref, bias):
    """Conv1d, kernel=3, stride=1, padding=1.

    x:    (L, Cin)  f32 activations (length on sublanes, channels on lanes)
    w_ref: (3, Cin, Cout) bf16 taps,  bias: (1, Cout) f32
    """
    L = x.shape[0]
    row = lax.broadcasted_iota(jnp.int32, x.shape, 0)
    # roll on the sublane axis (XLU), mask the wrapped boundary row (VPU).
    xm = jnp.where(row > 0, pltpu.roll(x, shift=1, axis=0), 0.0)        # x[l-1]
    xp = jnp.where(row < L - 1, pltpu.roll(x, shift=L - 1, axis=0), 0.0)  # x[l+1]
    dt = w_ref.dtype
    return (_dot(xm.astype(dt), w_ref[0]) +
            _dot(x.astype(dt), w_ref[1]) +
            _dot(xp.astype(dt), w_ref[2]) + bias)


def seq_decoder_kernel(g_ref, w1_ref, b1_ref, w2_ref, b2_ref, w3_ref, b3_ref,
                       w4_ref, b4_ref, wh_ref, bh_ref, head_ref):
    gv = g_ref[0]                                            # (1, FF)

    # ConvTranspose1d(FF -> FF, kernel=E, stride=1) on a length-1 input:
    #   y1[l, co] = sum_ci g[ci] * W_t[ci, co, l]    (BN1 folded into w1/b1)
    # TODO(synk): a single (1,FF)@(FF,E*FF) matmul would need an in-kernel
    # (1, E*FF)->(E, FF) relayout; kept as broadcast-multiply-reduce for
    # lowering robustness (this stage is not the dominant cost).
    gb = lax.broadcast_in_dim(gv, (E, FF, FF), (1, 2))       # gb[e, f, c] = g[c]
    y1 = jnp.sum(gb * w1_ref[...], axis=-1) + b1_ref[...]    # (E, FF)
    h = jnp.maximum(y1, 0.0)

    h = jnp.maximum(_conv3(h, w2_ref, b2_ref[...]), 0.0)     # (E, 512)
    h = jnp.maximum(_conv3(h, w3_ref, b3_ref[...]), 0.0)     # (E, 256)
    h = _conv3(h, w4_ref, b4_ref[...])                       # (E, P) — BN4 folded, no ReLU

    x_seq = jnp.transpose(h)                                 # (P, E) == permute(0, 2, 1)

    # Fused heads: [coor | flag | quant] in one 3-tap conv (quant = center tap).
    head_ref[0] = _conv3(x_seq, wh_ref, bh_ref[...])         # (P, CO+FL+QU)


def seq_decoder_forward(g, char, kparams):
    assert g.shape[0] == char.shape[0]          # mirrors the PyTorch assert
    g3 = g.reshape(B, 1, FF)

    def full_spec(arr):
        nd = arr.ndim
        return pl.BlockSpec(arr.shape, lambda b, _nd=nd: (0,) * _nd)

    in_specs = [pl.BlockSpec((1, 1, FF), lambda b: (b, 0, 0))] + \
               [full_spec(a) for a in kparams]
    out_specs = pl.BlockSpec((1, P, HEAD), lambda b: (b, 0, 0))
    out_shape = jax.ShapeDtypeStruct((B, P, HEAD), jnp.float32)

    head = pl.pallas_call(
        seq_decoder_kernel,
        out_shape=out_shape,
        grid_spec=pltpu.PrefetchScalarGridSpec(
            num_scalar_prefetch=0,
            grid=(B,),
            in_specs=in_specs,
            out_specs=out_specs),
        compiler_params=pltpu.CompilerParams(
            dimension_semantics=("parallel",)),
        cost_estimate=pl.CostEstimate(
            flops=60_000_000, transcendentals=0, bytes_accessed=1_300_000),
    )(g3, *kparams)

    coor = head[..., :CO]
    flag = head[..., CO:CO + FL]
    quant = head[..., CO + FL:]
    return coor, flag, quant


# ---------------- deterministic parameter init (PyTorch layouts) ----------------
def init_params(key):
    ks = jax.random.split(key, 17)

    def w(k, shape, fan_in):
        return (jax.random.normal(k, shape, jnp.float32) / jnp.sqrt(fan_in))

    def bias(k, n):
        return 0.05 * jax.random.normal(k, (n,), jnp.float32)

    def bn(k, n):
        k1, k2, k3, k4 = jax.random.split(k, 4)
        gamma = 1.0 + 0.1 * jax.random.normal(k1, (n,), jnp.float32)
        beta = 0.05 * jax.random.normal(k2, (n,), jnp.float32)
        mean = 0.05 * jax.random.normal(k3, (n,), jnp.float32)
        var = 0.9 + 0.2 * jax.random.uniform(k4, (n,), jnp.float32)
        return gamma, beta, mean, var

    return dict(
        ct_w=w(ks[0], (FF, FF, E), FF * E), ct_b=bias(ks[1], FF), bn1=bn(ks[2], FF),
        c2_w=w(ks[3], (C2, FF, 3), FF * 3), c2_b=bias(ks[4], C2), bn2=bn(ks[5], C2),
        c3_w=w(ks[6], (C3, C2, 3), C2 * 3), c3_b=bias(ks[7], C3), bn3=bn(ks[8], C3),
        c4_w=w(ks[9], (P, C3, 3), C3 * 3), c4_b=bias(ks[10], P), bn4=bn(ks[11], P),
        cc_w=w(ks[12], (CO, E, 3), E * 3), cc_b=bias(ks[13], CO),
        cf_w=w(ks[14], (FL, E, 3), E * 3), cf_b=bias(ks[15], FL),
        q_w=w(ks[16], (QU, E), E),
    )


def _bn_scale_shift(bnp):
    gamma, beta, mean, var = bnp
    s = gamma / jnp.sqrt(var + EPS)
    return s, beta - mean * s


def _fold_conv(w, b, bnp):
    # w: (Cout, Cin, 3) torch Conv1d layout -> (3, Cin, Cout), BN folded on Cout.
    # Fold in f32, then quantize the weight to bf16 for the MXU path.
    s, sh = _bn_scale_shift(bnp)
    wk = jnp.transpose(w, (2, 1, 0)) * s[None, None, :]
    bk = (b * s + sh).reshape(1, -1)
    return wk.astype(jnp.bfloat16), bk.astype(jnp.float32)


def make_kernel_params(p):
    s1, sh1 = _bn_scale_shift(p['bn1'])
    # ConvTranspose1d weight (Cin, Cout, K=E) -> (E, Cout, Cin), BN1 folded on Cout.
    # Kept in f32: consumed by VPU multiply-reduce (v5e has no bf16 VALU).
    w1 = (jnp.transpose(p['ct_w'], (2, 1, 0)) * s1[None, :, None]).astype(jnp.float32)
    b1 = (p['ct_b'] * s1 + sh1).reshape(1, FF).astype(jnp.float32)
    w2, b2 = _fold_conv(p['c2_w'], p['c2_b'], p['bn2'])
    w3, b3 = _fold_conv(p['c3_w'], p['c3_b'], p['bn3'])
    w4, b4 = _fold_conv(p['c4_w'], p['c4_b'], p['bn4'])
    # Fused head weight: [coor conv | flag conv | quant linear(center tap only)].
    wc = jnp.transpose(p['cc_w'], (2, 1, 0))                     # (3, E, CO)
    wf = jnp.transpose(p['cf_w'], (2, 1, 0))                     # (3, E, FL)
    wq = jnp.transpose(p['q_w'])                                 # (E, QU)
    wq3 = jnp.stack([jnp.zeros_like(wq), wq, jnp.zeros_like(wq)], axis=0)
    wh = jnp.concatenate([wc, wf, wq3], axis=-1).astype(jnp.bfloat16)   # (3, E, HEAD)
    bh = jnp.concatenate([p['cc_b'], p['cf_b'],
                          jnp.zeros((QU,), jnp.float32)]).reshape(1, HEAD)
    bh = bh.astype(jnp.float32)
    return (w1, b1, w2, b2, w3, b3, w4, b4, wh, bh)


# ---------------- pure-JAX reference (mirrors the PyTorch NCL math) ----------------
def _bn_eval(x, bnp):
    gamma, beta, mean, var = bnp
    s = gamma / jnp.sqrt(var + EPS)
    return (x - mean[None, :, None]) * s[None, :, None] + beta[None, :, None]


def _conv1d_ncl(x, w, b):
    # x: (B, Cin, L), w: (Cout, Cin, 3), stride=1, padding=1 (cross-correlation).
    L = x.shape[-1]
    xp = jnp.pad(x, ((0, 0), (0, 0), (1, 1)))
    y = sum(jnp.einsum('bcl,oc->bol',
                       lax.dynamic_slice_in_dim(xp, k, L, axis=2),
                       w[:, :, k], precision='highest')
            for k in range(3))
    return y + b[None, :, None]


def reference_forward(g, p):
    x = jnp.einsum('bc,cfe->bfe', g, p['ct_w'], precision='highest') \
        + p['ct_b'][None, :, None]                                  # (B, FF, E)
    x = jax.nn.relu(_bn_eval(x, p['bn1']))
    x = jax.nn.relu(_bn_eval(_conv1d_ncl(x, p['c2_w'], p['c2_b']), p['bn2']))
    x = jax.nn.relu(_bn_eval(_conv1d_ncl(x, p['c3_w'], p['c3_b']), p['bn3']))
    x = _bn_eval(_conv1d_ncl(x, p['c4_w'], p['c4_b']), p['bn4'])    # (B, P, E)
    xg = jnp.transpose(x, (0, 2, 1))                                # (B, E, P)
    coor = jnp.transpose(_conv1d_ncl(xg, p['cc_w'], p['cc_b']), (0, 2, 1))
    flag = jnp.transpose(_conv1d_ncl(xg, p['cf_w'], p['cf_b']), (0, 2, 1))
    xq = jnp.transpose(xg, (0, 2, 1))                               # (B, P, E)
    quant = jnp.einsum('bpe,qe->bpq', xq, p['q_w'], precision='highest')
    return coor, flag, quant


if __name__ == "__main__":
    key = jax.random.PRNGKey(0)
    kp, kg, kc = jax.random.split(key, 3)
    params = init_params(kp)
    g = jax.random.normal(kg, (B, FF), jnp.float32)
    char = jax.random.randint(kc, (B,), 0, 10)   # unused in this config (char_embedded=False)

    kparams = make_kernel_params(params)
    coor, flag, quant = jax.block_until_ready(
        jax.jit(seq_decoder_forward)(g, char, kparams))

    rc, rf, rq = reference_forward(g, params)
    # Tolerance accounts for bf16 weights/activations at the MXU (f32 accumulate)
    # versus the f32 'highest' reference.
    for name, got, want in (("coor", coor, rc), ("flag", flag, rf), ("quant", quant, rq)):
        err = float(jnp.max(jnp.abs(got - want)))
        assert got.shape == want.shape, (name, got.shape, want.shape)
        assert err < 2e-2, f"{name} mismatch: max abs err = {err}"

    print("KERNEL_OK")
</pallas_src>

<mosaic_0001>
module attributes {stable_mosaic.version = 11 : i64} {
  func.func @seq_decoder_kernel(%arg0: i32, %arg1: memref<1x1x32xf32, #tpu.memory_space<vmem>>, %arg2: memref<32x32x32xf32, #tpu.memory_space<vmem>>, %arg3: memref<1x32xf32, #tpu.memory_space<vmem>>, %arg4: memref<3x32x512xbf16, #tpu.memory_space<vmem>>, %arg5: memref<1x512xf32, #tpu.memory_space<vmem>>, %arg6: memref<3x512x256xbf16, #tpu.memory_space<vmem>>, %arg7: memref<1x256xf32, #tpu.memory_space<vmem>>, %arg8: memref<3x256x16xbf16, #tpu.memory_space<vmem>>, %arg9: memref<1x16xf32, #tpu.memory_space<vmem>>, %arg10: memref<3x32x15xbf16, #tpu.memory_space<vmem>>, %arg11: memref<1x15xf32, #tpu.memory_space<vmem>>, %arg12: memref<1x16x15xf32, #tpu.memory_space<vmem>>) attributes {dimension_semantics = [#tpu.dimension_semantics<parallel>], iteration_bounds = array<i64: 2>, scalar_prefetch = 0 : i64, scratch_operands = 0 : i64, tpu.core_type = #tpu.core_type<tc>, window_params = [{transform_indices = @transform_0, window_bounds = array<i64: 1, 1, 32>}, {pipeline_mode = #tpu.pipeline_mode<synchronous>, transform_indices = @transform_1, window_bounds = array<i64: 32, 32, 32>}, {pipeline_mode = #tpu.pipeline_mode<synchronous>, transform_indices = @transform_2, window_bounds = array<i64: 1, 32>}, {pipeline_mode = #tpu.pipeline_mode<synchronous>, transform_indices = @transform_3, window_bounds = array<i64: 3, 32, 512>}, {pipeline_mode = #tpu.pipeline_mode<synchronous>, transform_indices = @transform_4, window_bounds = array<i64: 1, 512>}, {pipeline_mode = #tpu.pipeline_mode<synchronous>, transform_indices = @transform_5, window_bounds = array<i64: 3, 512, 256>}, {pipeline_mode = #tpu.pipeline_mode<synchronous>, transform_indices = @transform_6, window_bounds = array<i64: 1, 256>}, {pipeline_mode = #tpu.pipeline_mode<synchronous>, transform_indices = @transform_7, window_bounds = array<i64: 3, 256, 16>}, {pipeline_mode = #tpu.pipeline_mode<synchronous>, transform_indices = @transform_8, window_bounds = array<i64: 1, 16>}, {pipeline_mode = #tpu.pipeline_mode<synchronous>, transform_indices = @transform_9, window_bounds = array<i64: 3, 32, 15>}, {pipeline_mode = #tpu.pipeline_mode<synchronous>, transform_indices = @transform_10, window_bounds = array<i64: 1, 15>}, {transform_indices = @transform_11, window_bounds = array<i64: 1, 16, 15>}]} {
    %c0 = arith.constant 0 : index
    %c0_0 = arith.constant 0 : index
    %c0_1 = arith.constant 0 : index
    %0 = vector.load %arg1[%c0, %c0_0, %c0_1] : memref<1x1x32xf32, #tpu.memory_space<vmem>>, vector<1x1x32xf32>
    %1 = vector.shape_cast %0 : vector<1x1x32xf32> to vector<1x32xf32>
    %2 = vector.shape_cast %1 : vector<1x32xf32> to vector<1x1x32xf32>
    %3 = vector.broadcast %2 : vector<1x1x32xf32> to vector<32x32x32xf32>
    %c0_2 = arith.constant 0 : index
    %c0_3 = arith.constant 0 : index
    %c0_4 = arith.constant 0 : index
    %4 = vector.load %arg2[%c0_2, %c0_3, %c0_4] : memref<32x32x32xf32, #tpu.memory_space<vmem>>, vector<32x32x32xf32>
    %5 = arith.mulf %3, %4 : vector<32x32x32xf32>
    %cst = arith.constant dense<0.000000e+00> : vector<32x32xf32>
    %6 = vector.multi_reduction <add>, %5, %cst [2] : vector<32x32x32xf32> to vector<32x32xf32>
    %c0_5 = arith.constant 0 : index
    %c0_6 = arith.constant 0 : index
    %7 = vector.load %arg3[%c0_5, %c0_6] : memref<1x32xf32, #tpu.memory_space<vmem>>, vector<1x32xf32>
    %8 = vector.broadcast %7 : vector<1x32xf32> to vector<32x32xf32>
    %9 = arith.addf %6, %8 : vector<32x32xf32>
    %cst_7 = arith.constant 0.000000e+00 : f32
    %10 = vector.broadcast %cst_7 : f32 to vector<32x32xf32>
    %11 = arith.maximumf %9, %10 : vector<32x32xf32>
    %c0_8 = arith.constant 0 : index
    %c0_9 = arith.constant 0 : index
    %12 = vector.load %arg5[%c0_8, %c0_9] : memref<1x512xf32, #tpu.memory_space<vmem>>, vector<1x512xf32>
    %13 = tpu.iota {dimensions = array<i32: 0>} : vector<32x32xi32>
    %c0_i32 = arith.constant 0 : i32
    %14 = vector.broadcast %c0_i32 : i32 to vector<32x32xi32>
    %15 = arith.cmpi sgt, %13, %14 : vector<32x32xi32>
    %c1_i32 = arith.constant 1 : i32
    %16 = tpu.dynamic_rotate %11 by %c1_i32 dim 0 : vector<32x32xf32>, i32 -> vector<32x32xf32>
    %cst_10 = arith.constant 0.000000e+00 : f32
    %17 = vector.broadcast %cst_10 : f32 to vector<32x32xf32>
    %18 = arith.select %15, %16, %17 : vector<32x32xi1>, vector<32x32xf32>
    %c31_i32 = arith.constant 31 : i32
    %19 = vector.broadcast %c31_i32 : i32 to vector<32x32xi32>
    %20 = arith.cmpi slt, %13, %19 : vector<32x32xi32>
    %c31_i32_11 = arith.constant 31 : i32
    %21 = tpu.dynamic_rotate %11 by %c31_i32_11 dim 0 : vector<32x32xf32>, i32 -> vector<32x32xf32>
    %cst_12 = arith.constant 0.000000e+00 : f32
    %22 = vector.broadcast %cst_12 : f32 to vector<32x32xf32>
    %23 = arith.select %20, %21, %22 : vector<32x32xi1>, vector<32x32xf32>
    %24 = arith.truncf %18 : vector<32x32xf32> to vector<32x32xbf16>
    %c0_13 = arith.constant 0 : index
    %c0_14 = arith.constant 0 : index
    %c0_15 = arith.constant 0 : index
    %25 = vector.load %arg4[%c0_13, %c0_14, %c0_15] : memref<3x32x512xbf16, #tpu.memory_space<vmem>>, vector<1x32x512xbf16>
    %26 = vector.shape_cast %25 : vector<1x32x512xbf16> to vector<32x512xbf16>
    %cst_16 = arith.constant dense<0.000000e+00> : vector<32x512xf32>
    %27 = tpu.matmul %24, %26, %cst_16 {dimension_numbers = #tpu.dot_dimension_numbers<[1], [0], [0], [1], [0, 0, 1, 1], [], []>} : vector<32x32xbf16>, vector<32x512xbf16>, vector<32x512xf32> -> vector<32x512xf32>
    %28 = arith.truncf %11 : vector<32x32xf32> to vector<32x32xbf16>
    %c1 = arith.constant 1 : index
    %c0_17 = arith.constant 0 : index
    %c0_18 = arith.constant 0 : index
    %29 = vector.load %arg4[%c1, %c0_17, %c0_18] : memref<3x32x512xbf16, #tpu.memory_space<vmem>>, vector<1x32x512xbf16>
    %30 = vector.shape_cast %29 : vector<1x32x512xbf16> to vector<32x512xbf16>
    %cst_19 = arith.constant dense<0.000000e+00> : vector<32x512xf32>
    %31 = tpu.matmul %28, %30, %cst_19 {dimension_numbers = #tpu.dot_dimension_numbers<[1], [0], [0], [1], [0, 0, 1, 1], [], []>} : vector<32x32xbf16>, vector<32x512xbf16>, vector<32x512xf32> -> vector<32x512xf32>
    %32 = arith.addf %27, %31 : vector<32x512xf32>
    %33 = arith.truncf %23 : vector<32x32xf32> to vector<32x32xbf16>
    %c2 = arith.constant 2 : index
    %c0_20 = arith.constant 0 : index
    %c0_21 = arith.constant 0 : index
    %34 = vector.load %arg4[%c2, %c0_20, %c0_21] : memref<3x32x512xbf16, #tpu.memory_space<vmem>>, vector<1x32x512xbf16>
    %35 = vector.shape_cast %34 : vector<1x32x512xbf16> to vector<32x512xbf16>
    %cst_22 = arith.constant dense<0.000000e+00> : vector<32x512xf32>
    %36 = tpu.matmul %33, %35, %cst_22 {dimension_numbers = #tpu.dot_dimension_numbers<[1], [0], [0], [1], [0, 0, 1, 1], [], []>} : vector<32x32xbf16>, vector<32x512xbf16>, vector<32x512xf32> -> vector<32x512xf32>
    %37 = arith.addf %32, %36 : vector<32x512xf32>
    %38 = vector.broadcast %12 : vector<1x512xf32> to vector<32x512xf32>
    %39 = arith.addf %37, %38 : vector<32x512xf32>
    %cst_23 = arith.constant 0.000000e+00 : f32
    %40 = vector.broadcast %cst_23 : f32 to vector<32x512xf32>
    %41 = arith.maximumf %39, %40 : vector<32x512xf32>
    %c0_24 = arith.constant 0 : index
    %c0_25 = arith.constant 0 : index
    %42 = vector.load %arg7[%c0_24, %c0_25] : memref<1x256xf32, #tpu.memory_space<vmem>>, vector<1x256xf32>
    %43 = tpu.iota {dimensions = array<i32: 0>} : vector<32x512xi32>
    %c0_i32_26 = arith.constant 0 : i32
    %44 = vector.broadcast %c0_i32_26 : i32 to vector<32x512xi32>
    %45 = arith.cmpi sgt, %43, %44 : vector<32x512xi32>
    %c1_i32_27 = arith.constant 1 : i32
    %46 = tpu.dynamic_rotate %41 by %c1_i32_27 dim 0 : vector<32x512xf32>, i32 -> vector<32x512xf32>
    %cst_28 = arith.constant 0.000000e+00 : f32
    %47 = vector.broadcast %cst_28 : f32 to vector<32x512xf32>
    %48 = arith.select %45, %46, %47 : vector<32x512xi1>, vector<32x512xf32>
    %c31_i32_29 = arith.constant 31 : i32
    %49 = vector.broadcast %c31_i32_29 : i32 to vector<32x512xi32>
    %50 = arith.cmpi slt, %43, %49 : vector<32x512xi32>
    %c31_i32_30 = arith.constant 31 : i32
    %51 = tpu.dynamic_rotate %41 by %c31_i32_30 dim 0 : vector<32x512xf32>, i32 -> vector<32x512xf32>
    %cst_31 = arith.constant 0.000000e+00 : f32
    %52 = vector.broadcast %cst_31 : f32 to vector<32x512xf32>
    %53 = arith.select %50, %51, %52 : vector<32x512xi1>, vector<32x512xf32>
    %54 = arith.truncf %48 : vector<32x512xf32> to vector<32x512xbf16>
    %c0_32 = arith.constant 0 : index
    %c0_33 = arith.constant 0 : index
    %c0_34 = arith.constant 0 : index
    %55 = vector.load %arg6[%c0_32, %c0_33, %c0_34] : memref<3x512x256xbf16, #tpu.memory_space<vmem>>, vector<1x512x256xbf16>
    %56 = vector.shape_cast %55 : vector<1x512x256xbf16> to vector<512x256xbf16>
    %cst_35 = arith.constant dense<0.000000e+00> : vector<32x256xf32>
    %57 = tpu.matmul %54, %56, %cst_35 {dimension_numbers = #tpu.dot_dimension_numbers<[1], [0], [0], [1], [0, 0, 1, 1], [], []>} : vector<32x512xbf16>, vector<512x256xbf16>, vector<32x256xf32> -> vector<32x256xf32>
    %58 = arith.truncf %41 : vector<32x512xf32> to vector<32x512xbf16>
    %c1_36 = arith.constant 1 : index
    %c0_37 = arith.constant 0 : index
    %c0_38 = arith.constant 0 : index
    %59 = vector.load %arg6[%c1_36, %c0_37, %c0_38] : memref<3x512x256xbf16, #tpu.memory_space<vmem>>, vector<1x512x256xbf16>
    %60 = vector.shape_cast %59 : vector<1x512x256xbf16> to vector<512x256xbf16>
    %cst_39 = arith.constant dense<0.000000e+00> : vector<32x256xf32>
    %61 = tpu.matmul %58, %60, %cst_39 {dimension_numbers = #tpu.dot_dimension_numbers<[1], [0], [0], [1], [0, 0, 1, 1], [], []>} : vector<32x512xbf16>, vector<512x256xbf16>, vector<32x256xf32> -> vector<32x256xf32>
    %62 = arith.addf %57, %61 : vector<32x256xf32>
    %63 = arith.truncf %53 : vector<32x512xf32> to vector<32x512xbf16>
    %c2_40 = arith.constant 2 : index
    %c0_41 = arith.constant 0 : index
    %c0_42 = arith.constant 0 : index
    %64 = vector.load %arg6[%c2_40, %c0_41, %c0_42] : memref<3x512x256xbf16, #tpu.memory_space<vmem>>, vector<1x512x256xbf16>
    %65 = vector.shape_cast %64 : vector<1x512x256xbf16> to vector<512x256xbf16>
    %cst_43 = arith.constant dense<0.000000e+00> : vector<32x256xf32>
    %66 = tpu.matmul %63, %65, %cst_43 {dimension_numbers = #tpu.dot_dimension_numbers<[1], [0], [0], [1], [0, 0, 1, 1], [], []>} : vector<32x512xbf16>, vector<512x256xbf16>, vector<32x256xf32> -> vector<32x256xf32>
    %67 = arith.addf %62, %66 : vector<32x256xf32>
    %68 = vector.broadcast %42 : vector<1x256xf32> to vector<32x256xf32>
    %69 = arith.addf %67, %68 : vector<32x256xf32>
    %cst_44 = arith.constant 0.000000e+00 : f32
    %70 = vector.broadcast %cst_44 : f32 to vector<32x256xf32>
    %71 = arith.maximumf %69, %70 : vector<32x256xf32>
    %c0_45 = arith.constant 0 : index
    %c0_46 = arith.constant 0 : index
    %72 = vector.load %arg9[%c0_45, %c0_46] : memref<1x16xf32, #tpu.memory_space<vmem>>, vector<1x16xf32>
    %73 = tpu.iota {dimensions = array<i32: 0>} : vector<32x256xi32>
    %c0_i32_47 = arith.constant 0 : i32
    %74 = vector.broadcast %c0_i32_47 : i32 to vector<32x256xi32>
    %75 = arith.cmpi sgt, %73, %74 : vector<32x256xi32>
    %c1_i32_48 = arith.constant 1 : i32
    %76 = tpu.dynamic_rotate %71 by %c1_i32_48 dim 0 : vector<32x256xf32>, i32 -> vector<32x256xf32>
    %cst_49 = arith.constant 0.000000e+00 : f32
    %77 = vector.broadcast %cst_49 : f32 to vector<32x256xf32>
    %78 = arith.select %75, %76, %77 : vector<32x256xi1>, vector<32x256xf32>
    %c31_i32_50 = arith.constant 31 : i32
    %79 = vector.broadcast %c31_i32_50 : i32 to vector<32x256xi32>
    %80 = arith.cmpi slt, %73, %79 : vector<32x256xi32>
    %c31_i32_51 = arith.constant 31 : i32
    %81 = tpu.dynamic_rotate %71 by %c31_i32_51 dim 0 : vector<32x256xf32>, i32 -> vector<32x256xf32>
    %cst_52 = arith.constant 0.000000e+00 : f32
    %82 = vector.broadcast %cst_52 : f32 to vector<32x256xf32>
    %83 = arith.select %80, %81, %82 : vector<32x256xi1>, vector<32x256xf32>
    %84 = arith.truncf %78 : vector<32x256xf32> to vector<32x256xbf16>
    %c0_53 = arith.constant 0 : index
    %c0_54 = arith.constant 0 : index
    %c0_55 = arith.constant 0 : index
    %85 = vector.load %arg8[%c0_53, %c0_54, %c0_55] : memref<3x256x16xbf16, #tpu.memory_space<vmem>>, vector<1x256x16xbf16>
    %86 = vector.shape_cast %85 : vector<1x256x16xbf16> to vector<256x16xbf16>
    %cst_56 = arith.constant dense<0.000000e+00> : vector<32x16xf32>
    %87 = tpu.matmul %84, %86, %cst_56 {dimension_numbers = #tpu.dot_dimension_numbers<[1], [0], [0], [1], [0, 0, 1, 1], [], []>} : vector<32x256xbf16>, vector<256x16xbf16>, vector<32x16xf32> -> vector<32x16xf32>
    %88 = arith.truncf %71 : vector<32x256xf32> to vector<32x256xbf16>
    %c1_57 = arith.constant 1 : index
    %c0_58 = arith.constant 0 : index
    %c0_59 = arith.constant 0 : index
    %89 = vector.load %arg8[%c1_57, %c0_58, %c0_59] : memref<3x256x16xbf16, #tpu.memory_space<vmem>>, vector<1x256x16xbf16>
    %90 = vector.shape_cast %89 : vector<1x256x16xbf16> to vector<256x16xbf16>
    %cst_60 = arith.constant dense<0.000000e+00> : vector<32x16xf32>
    %91 = tpu.matmul %88, %90, %cst_60 {dimension_numbers = #tpu.dot_dimension_numbers<[1], [0], [0], [1], [0, 0, 1, 1], [], []>} : vector<32x256xbf16>, vector<256x16xbf16>, vector<32x16xf32> -> vector<32x16xf32>
    %92 = arith.addf %87, %91 : vector<32x16xf32>
    %93 = arith.truncf %83 : vector<32x256xf32> to vector<32x256xbf16>
    %c2_61 = arith.constant 2 : index
    %c0_62 = arith.constant 0 : index
    %c0_63 = arith.constant 0 : index
    %94 = vector.load %arg8[%c2_61, %c0_62, %c0_63] : memref<3x256x16xbf16, #tpu.memory_space<vmem>>, vector<1x256x16xbf16>
    %95 = vector.shape_cast %94 : vector<1x256x16xbf16> to vector<256x16xbf16>
    %cst_64 = arith.constant dense<0.000000e+00> : vector<32x16xf32>
    %96 = tpu.matmul %93, %95, %cst_64 {dimension_numbers = #tpu.dot_dimension_numbers<[1], [0], [0], [1], [0, 0, 1, 1], [], []>} : vector<32x256xbf16>, vector<256x16xbf16>, vector<32x16xf32> -> vector<32x16xf32>
    %97 = arith.addf %92, %96 : vector<32x16xf32>
    %98 = vector.broadcast %72 : vector<1x16xf32> to vector<32x16xf32>
    %99 = arith.addf %97, %98 : vector<32x16xf32>
    %100 = tpu.transpose %99, [1, 0] : vector<32x16xf32> -> vector<16x32xf32>
    %c0_65 = arith.constant 0 : index
    %c0_66 = arith.constant 0 : index
    %101 = vector.load %arg11[%c0_65, %c0_66] : memref<1x15xf32, #tpu.memory_space<vmem>>, vector<1x15xf32>
    %102 = tpu.iota {dimensions = array<i32: 0>} : vector<16x32xi32>
    %c0_i32_67 = arith.constant 0 : i32
    %103 = vector.broadcast %c0_i32_67 : i32 to vector<16x32xi32>
    %104 = arith.cmpi sgt, %102, %103 : vector<16x32xi32>
    %c1_i32_68 = arith.constant 1 : i32
    %105 = tpu.dynamic_rotate %100 by %c1_i32_68 dim 0 : vector<16x32xf32>, i32 -> vector<16x32xf32>
    %cst_69 = arith.constant 0.000000e+00 : f32
    %106 = vector.broadcast %cst_69 : f32 to vector<16x32xf32>
    %107 = arith.select %104, %105, %106 : vector<16x32xi1>, vector<16x32xf32>
    %c15_i32 = arith.constant 15 : i32
    %108 = vector.broadcast %c15_i32 : i32 to vector<16x32xi32>
    %109 = arith.cmpi slt, %102, %108 : vector<16x32xi32>
    %c15_i32_70 = arith.constant 15 : i32
    %110 = tpu.dynamic_rotate %100 by %c15_i32_70 dim 0 : vector<16x32xf32>, i32 -> vector<16x32xf32>
    %cst_71 = arith.constant 0.000000e+00 : f32
    %111 = vector.broadcast %cst_71 : f32 to vector<16x32xf32>
    %112 = arith.select %109, %110, %111 : vector<16x32xi1>, vector<16x32xf32>
    %113 = arith.truncf %107 : vector<16x32xf32> to vector<16x32xbf16>
    %c0_72 = arith.constant 0 : index
    %c0_73 = arith.constant 0 : index
    %c0_74 = arith.constant 0 : index
    %114 = vector.load %arg10[%c0_72, %c0_73, %c0_74] : memref<3x32x15xbf16, #tpu.memory_space<vmem>>, vector<1x32x15xbf16>
    %115 = vector.shape_cast %114 : vector<1x32x15xbf16> to vector<32x15xbf16>
    %cst_75 = arith.constant dense<0.000000e+00> : vector<16x15xf32>
    %116 = tpu.matmul %113, %115, %cst_75 {dimension_numbers = #tpu.dot_dimension_numbers<[1], [0], [0], [1], [0, 0, 1, 1], [], []>} : vector<16x32xbf16>, vector<32x15xbf16>, vector<16x15xf32> -> vector<16x15xf32>
    %117 = arith.truncf %100 : vector<16x32xf32> to vector<16x32xbf16>
    %c1_76 = arith.constant 1 : index
    %c0_77 = arith.constant 0 : index
    %c0_78 = arith.constant 0 : index
    %118 = vector.load %arg10[%c1_76, %c0_77, %c0_78] : memref<3x32x15xbf16, #tpu.memory_space<vmem>>, vector<1x32x15xbf16>
    %119 = vector.shape_cast %118 : vector<1x32x15xbf16> to vector<32x15xbf16>
    %cst_79 = arith.constant dense<0.000000e+00> : vector<16x15xf32>
    %120 = tpu.matmul %117, %119, %cst_79 {dimension_numbers = #tpu.dot_dimension_numbers<[1], [0], [0], [1], [0, 0, 1, 1], [], []>} : vector<16x32xbf16>, vector<32x15xbf16>, vector<16x15xf32> -> vector<16x15xf32>
    %121 = arith.addf %116, %120 : vector<16x15xf32>
    %122 = arith.truncf %112 : vector<16x32xf32> to vector<16x32xbf16>
    %c2_80 = arith.constant 2 : index
    %c0_81 = arith.constant 0 : index
    %c0_82 = arith.constant 0 : index
    %123 = vector.load %arg10[%c2_80, %c0_81, %c0_82] : memref<3x32x15xbf16, #tpu.memory_space<vmem>>, vector<1x32x15xbf16>
    %124 = vector.shape_cast %123 : vector<1x32x15xbf16> to vector<32x15xbf16>
    %cst_83 = arith.constant dense<0.000000e+00> : vector<16x15xf32>
    %125 = tpu.matmul %122, %124, %cst_83 {dimension_numbers = #tpu.dot_dimension_numbers<[1], [0], [0], [1], [0, 0, 1, 1], [], []>} : vector<16x32xbf16>, vector<32x15xbf16>, vector<16x15xf32> -> vector<16x15xf32>
    %126 = arith.addf %121, %125 : vector<16x15xf32>
    %127 = vector.broadcast %101 : vector<1x15xf32> to vector<16x15xf32>
    %128 = arith.addf %126, %127 : vector<16x15xf32>
    %c0_84 = arith.constant 0 : index
    %c0_85 = arith.constant 0 : index
    %c0_86 = arith.constant 0 : index
    %129 = vector.load %arg12[%c0_84, %c0_85, %c0_86] : memref<1x16x15xf32, #tpu.memory_space<vmem>>, vector<1x16x15xf32>
    %130 = vector.shape_cast %129 : vector<1x16x15xf32> to vector<16x15xf32>
    %131 = vector.shape_cast %128 : vector<16x15xf32> to vector<1x16x15xf32>
    tpu.vector_store %arg12[%c0_84, %c0_85, %c0_86], %131 {strides = array<i32>} : memref<1x16x15xf32, #tpu.memory_space<vmem>>, vector<1x16x15xf32>,
    return
  }
  func.func @transform_0(%arg0: i32) -> (i32, i32, i32) {
    %c0_i32 = arith.constant 0 : i32
    %c0_i32_0 = arith.constant 0 : i32
    %c0_i32_1 = arith.constant 0 : i32
    return %arg0, %c0_i32, %c0_i32_0 : i32, i32, i32
  }
  func.func @transform_1(%arg0: i32) -> (i32, i32, i32) {
    %c0_i32 = arith.constant 0 : i32
    %c0_i32_0 = arith.constant 0 : i32
    %c0_i32_1 = arith.constant 0 : i32
    %c0_i32_2 = arith.constant 0 : i32
    return %c0_i32, %c0_i32_0, %c0_i32_1 : i32, i32, i32
  }
  func.func @transform_2(%arg0: i32) -> (i32, i32) {
    %c0_i32 = arith.constant 0 : i32
    %c0_i32_0 = arith.constant 0 : i32
    %c0_i32_1 = arith.constant 0 : i32
    return %c0_i32, %c0_i32_0 : i32, i32
  }
  func.func @transform_3(%arg0: i32) -> (i32, i32, i32) {
    %c0_i32 = arith.constant 0 : i32
    %c0_i32_0 = arith.constant 0 : i32
    %c0_i32_1 = arith.constant 0 : i32
    %c0_i32_2 = arith.constant 0 : i32
    return %c0_i32, %c0_i32_0, %c0_i32_1 : i32, i32, i32
  }
  func.func @transform_4(%arg0: i32) -> (i32, i32) {
    %c0_i32 = arith.constant 0 : i32
    %c0_i32_0 = arith.constant 0 : i32
    %c0_i32_1 = arith.constant 0 : i32
    return %c0_i32, %c0_i32_0 : i32, i32
  }
  func.func @transform_5(%arg0: i32) -> (i32, i32, i32) {
    %c0_i32 = arith.constant 0 : i32
    %c0_i32_0 = arith.constant 0 : i32
    %c0_i32_1 = arith.constant 0 : i32
    %c0_i32_2 = arith.constant 0 : i32
    return %c0_i32, %c0_i32_0, %c0_i32_1 : i32, i32, i32
  }
  func.func @transform_6(%arg0: i32) -> (i32, i32) {
    %c0_i32 = arith.constant 0 : i32
    %c0_i32_0 = arith.constant 0 : i32
    %c0_i32_1 = arith.constant 0 : i32
    return %c0_i32, %c0_i32_0 : i32, i32
  }
  func.func @transform_7(%arg0: i32) -> (i32, i32, i32) {
    %c0_i32 = arith.constant 0 : i32
    %c0_i32_0 = arith.constant 0 : i32
    %c0_i32_1 = arith.constant 0 : i32
    %c0_i32_2 = arith.constant 0 : i32
    return %c0_i32, %c0_i32_0, %c0_i32_1 : i32, i32, i32
  }
  func.func @transform_8(%arg0: i32) -> (i32, i32) {
    %c0_i32 = arith.constant 0 : i32
    %c0_i32_0 = arith.constant 0 : i32
    %c0_i32_1 = arith.constant 0 : i32
    return %c0_i32, %c0_i32_0 : i32, i32
  }
  func.func @transform_9(%arg0: i32) -> (i32, i32, i32) {
    %c0_i32 = arith.constant 0 : i32
    %c0_i32_0 = arith.constant 0 : i32
    %c0_i32_1 = arith.constant 0 : i32
    %c0_i32_2 = arith.constant 0 : i32
    return %c0_i32, %c0_i32_0, %c0_i32_1 : i32, i32, i32
  }
  func.func @transform_10(%arg0: i32) -> (i32, i32) {
    %c0_i32 = arith.constant 0 : i32
    %c0_i32_0 = arith.constant 0 : i32
    %c0_i32_1 = arith.constant 0 : i32
    return %c0_i32, %c0_i32_0 : i32, i32
  }
  func.func @transform_11(%arg0: i32) -> (i32, i32, i32) {
    %c0_i32 = arith.constant 0 : i32
    %c0_i32_0 = arith.constant 0 : i32
    %c0_i32_1 = arith.constant 0 : i32
    return %arg0, %c0_i32, %c0_i32_0 : i32, i32, i32
  }
}

</mosaic_0001>

<bundles_post_ra>
// kernel: seq_decoder_forward.1
= control target key start
LH: loop header
LB: loop body
LE: loop exit
PB: predicated region body
PF: predicated region fallthrough
CT: control target
= control target key end

     0   :  { %16 = vsyncpa [#allocation3], 0  ;;  %s12052_s0 = inlined_call_operand.vmem [shape: f32[2,1,32], index: 0, kind: input, shape index: {}]   ;;  %s12053_s1 = inlined_call_operand.hbm [shape: f32[32,32,32], index: 1, kind: input, shape index: {}]   ;;  %s12054_s2 = inlined_call_operand.vmem [shape: f32[1,32], index: 2, kind: input, shape index: {}]   ;;  %s12055_s3 = inlined_call_operand.vmem [shape: bf16[3,32,512], index: 3, kind: input, shape index: {}]   ;;  %s12056_s4 = inlined_call_operand.vmem [shape: f32[1,512], index: 4, kind: input, shape index: {}]   ;;  %s12057_s5 = inlined_call_operand.hbm [shape: bf16[3,512,256], index: 5, kind: input, shape index: {}]   ;;  %s12058_s6 = inlined_call_operand.vmem [shape: f32[1,256], index: 6, kind: input, shape index: {}]   ;;  %s12059_s7 = inlined_call_operand.vmem [shape: bf16[3,256,16], index: 7, kind: input, shape index: {}]   ;;  %s12060_s8 = inlined_call_operand.vmem [shape: f32[1,16], index: 8, kind: input, shape index: {}]   ;;  %s12061_s9 = inlined_call_operand.vmem [shape: bf16[3,32,15], index: 9, kind: input, shape index: {}]   ;;  %s12062_s10 = inlined_call_operand.vmem [shape: f32[1,15], index: 10, kind: input, shape index: {}]   ;;  %s12063_s11 = inlined_call_operand.vmem [shape: f32[2,16,15], index: 11, kind: output, shape index: {}]  }
   0x1   :  { %17 = vsyncpa [#allocation5], 0  ;;  %s8428_s17 = smov 0  }
   0x2 LB: > { %s8434_s18 = sadd.s32 4294967295, %s8358_s17   ;;  %p6938_p0 = scmp.ge.s32.totalorder %s8358_s17, 1  ;;  %s8358_s17 = sphi %s8428_s17, %s23_s17  }
   0x3   : > { %p290_p1 = scmp.lt.s32.totalorder %s8358_s17, 3  ;;  %s8360_s19 = smov [#allocation2]  }
   0x4   : > { %s302_s20 = sshll.u32 %s8360_s19, 4  ;;  %p12064_p3 = scmp.eq.s32.totalorder %s8434_s18, 0  ;;  %s303_s20 = int_to_ptr.vmem [resolvable:$true] %s302_s20 }
   0x5   : > { %p8438_p2 = pnand %p6938_p0, %p290_p1  ;;  %s8361_s22 = smov [#allocation4]  }
   0x6   : > { %s324_s23 = sshll.u32 %s8361_s22, 4  ;;  %s8288_s27 = scalar_lea.hbm %s12053_s1, 16384  ;;  %s8451_s23 = int_to_ptr.vmem [resolvable:$true] %s324_s23 }
   0x7   : > { %s12216_s21 = scalar_select %p8438_p2, 1, 0 }
   0x8   : > { %p7560_p4 = pneg %p8438_p2  ;;  %p8289_p6 = scmp.ne.s32.totalorder %s12053_s1, %s8288_s27 }
   0x9   : > { %p8295_p10 = scmp.lt.u32.totalorder %s8288_s27, %s12053_s1 }
   0xa   : > { %p8447_p5 = pnand %p12064_p3, %p7560_p4 }
   0xc   : > { %p8290_p7 = pneg %p8447_p5 }
   0xe   : > { %p8291_p8 = pnand %p8290_p7, %p8289_p6 }
  0x10   : > { %p8292_p9 = pneg %p8291_p8 }
  0x12   : > { %p8297_p11 = pnand %p8295_p10, %p8292_p9 }
  0x14   : > { %8300 = shalt.err (!%p8297_p11)
}
  0x15   : > { %s8301_s13 = scalar_lea.vmem %s303_s20, 16384  ;;  %p8309_p1 = scmp.lt.s32.totalorder %s303_s20, %s303_s20 }
  0x16   : > { %p8302_p12 = scmp.ne.s32.totalorder %s303_s20, %s8301_s13  ;;  %p8310_p4 = scmp.lt.s32.totalorder %s8301_s13, %s8301_s13 }
  0x18   : > { %p8304_p13 = pnand %p8302_p12, %p8290_p7  ;;  %p8311_p3 = por %p8310_p4, %p8309_p1 }
  0x1a   : > { %p8305_p0 = pneg %p8304_p13 }
  0x1c   : > { %p8312_p2 = pnand %p8311_p3, %p8305_p0 }
  0x1e   : > { %8315 = shalt.err (!%p8312_p2)
}
  0x1f   : > { %s8362_s14 = smov 128   ;;  %s8363_s15 = smov 8  }
  0x20   : > { %7563 = dma.hbm_to_vmem [thread:$0]  (!%p8447_p5), %s12053_s1, 16384, %s303_s20, [#allocation3], %s8362_s14, %s8362_s14, %s8363_s15  }
  0x21   : > { %s8316_s26 = scalar_lea.hbm %s12057_s5, 24576 }
  0x22   : > { %p8317_p6 = scmp.ne.s32.totalorder %s12057_s5, %s8316_s26  ;;  %p8323_p8 = scmp.lt.u32.totalorder %s8316_s26, %s12057_s5 }
  0x24   : > { %p8319_p2 = pnand %p8317_p6, %p8290_p7 }
  0x26   : > { %p8320_p3 = pneg %p8319_p2 }
  0x28   : > { %p8325_p9 = pnand %p8323_p8, %p8320_p3 }
  0x2a   : > { %8328 = shalt.err (!%p8325_p9)
}
  0x2b   : > { %s8329_s20 = scalar_lea.vmem %s8451_s23, 24576  ;;  %p8337_p13 = scmp.lt.s32.totalorder %s8451_s23, %s8451_s23 }
  0x2c   : > { %p8330_p10 = scmp.ne.s32.totalorder %s8451_s23, %s8329_s20  ;;  %p8338_p0 = scmp.lt.s32.totalorder %s8329_s20, %s8329_s20 }
  0x2e   : > { %p8332_p11 = pnand %p8330_p10, %p8290_p7  ;;  %p8339_p1 = por %p8338_p0, %p8337_p13 }
  0x30   : > { %p8333_p12 = pneg %p8332_p11 }
  0x32   : > { %p8340_p4 = pnand %p8339_p1, %p8333_p12 }
  0x34   : > { %8343 = shalt.err (!%p8340_p4)
}
  0x35   : > { %7566 = dma.hbm_to_vmem [thread:$0]  (!%p8447_p5), %s12057_s5, 24576, %s8451_s23, [#allocation5], %s8362_s14, %s8362_s14, %s8363_s15  }
  0x36   : > { %p12218_p6 = scmp.ne.s32.totalorder %s12216_s21, 0 }
  0x38   : > { %361 = sbr.rel (%p12218_p6) target bundleno = 2354 (0x932), region = 64 }
  0x3f   : > { %p12219_p2 = scmp.eq.s32.totalorder %s8434_s18, 0 }
  0x41   : > { %8349 = dma.done.wait (%p12219_p2), [#allocation3], 16384   ;;  %p12220_p7 = pmov %p12219_p2 }
  0x42   : > { %p12221_p3 = pmov %p12219_p2 }
  0x43   : > { %8351 = vsyncadd (%p12220_p7), [#allocation3], 4294950912 }
  0x44   : > { %8353 = dma.done.wait (%p12221_p3), [#allocation5], 24576   ;;  %p12222_p8 = pmov %p12219_p2 }
  0x45   : > { %p403_p9 = scmp.lt.s32.totalorder %s8434_s18, 1  ;;  %v423_v1 = vld [vmem:[#allocation2 + $0x20] sm:$0xff]  ;;  %vm675_vm0 = vcmask 261120   ;;  %v424_v5 = vld [vmem:[#allocation2 + $0x28] sm:$0xff]  ;;  %v422_v23 = vld [vmem:[#allocation2 + $0x18] sm:$0xff]  ;;  %vm1874_vm1 = vcmask 130112  }
  0x46   : > { %8355 = vsyncadd (%p12222_p8), [#allocation5], 4294942720  ;;  %v419_v2 = vld [vmem:[#allocation2] sm:$0xff]  ;;  %v420_v6 = vld [vmem:[#allocation2 + $0x8] sm:$0xff]  ;;  %vm1881_vm2 = vcmask 195712   ;;  %vm1888_vm3 = vcmask 261312  }
  0x47   : > { %s12775_s18 = smov (!%p403_p9, %s8434_s18), 1  ;;  %v452_v9 = vld [vmem:[#allocation2 + $0x108] sm:$0xff]  ;;  %v451_v10 = vld [vmem:[#allocation2 + $0x100] sm:$0xff]  ;;  %v421_v24 = vld [vmem:[#allocation2 + $0x10] sm:$0xff]  ;;  %vm2479_vm4 = vcmask 1041409   ;;  %vm2481_vm5 = vcmask 1042434  }
  0x48   : > { %s8518_s24 = scalar_lea.vmem %s12052_s0, %s12775_s18  ;;  %v456_v17 = vld [vmem:[#allocation2 + $0x128] sm:$0xff]  ;;  %v455_v18 = vld [vmem:[#allocation2 + $0x120] sm:$0xff]  ;;  %v426_v29 = vld [vmem:[#allocation2 + $0x38] sm:$0xff]  ;;  %vm2483_vm6 = vcmask 1043459   ;;  %vm2485_vm7 = vcmask 1044484   ;;  %vm2487_vm8 = vcmask 1045509  }
  0x49   : > { %v8521_v0 = vld [vmem:[%s8518_s24] ss:$0 sm:$0xff]  ;;  %v425_v30 = vld [vmem:[#allocation2 + $0x30] sm:$0xff]  ;;  %v428_v35 = vld [vmem:[#allocation2 + $0x48] sm:$0xff]  ;;  %vm2489_vm9 = vcmask 1046534   ;;  %vm2491_vm10 = vcmask 1047559  }
  0x4a   : > { %v551_v3 = vmul.f32 %v8521_v0, %v423_v1  ;;  %v547_v4 = vmul.f32 %v8521_v0, %v419_v2  ;;  %v552_v7 = vmul.f32 %v8521_v0, %v424_v5  ;;  %v548_v8 = vmul.f32 %v8521_v0, %v420_v6  ;;  %v427_v36 = vld [vmem:[#allocation2 + $0x40] sm:$0xff]  ;;  %v454_v41 = vld [vmem:[#allocation2 + $0x118] sm:$0xff]  ;;  %v453_v42 = vld [vmem:[#allocation2 + $0x110] sm:$0xff]  ;;  %s7362_s20 = sshll.u32 %s12775_s18, 4 }
  0x4b   : > { %v580_v15 = vmul.f32 %v8521_v0, %v452_v9  ;;  %v579_v16 = vmul.f32 %v8521_v0, %v451_v10  ;;  %v584_v21 = vmul.f32 %v8521_v0, %v456_v17  ;;  %v583_v22 = vmul.f32 %v8521_v0, %v455_v18  ;;  %v458_v47 = vld [vmem:[#allocation2 + $0x138] sm:$0xff]  ;;  %v457_v48 = vld [vmem:[#allocation2 + $0x130] sm:$0xff]  ;;  %v460_v49 = vld [vmem:[#allocation2 + $0x148] sm:$0xff] }
  0x4c   : > { %v688_v11 = vsel %vm675_vm0, %v551_v3, 0.0  ;;  %v676_v12 = vsel %vm675_vm0, %v547_v4, 0.0  ;;  %v691_v13 = vsel %vm675_vm0, %v552_v7, 0.0  ;;  %v679_v14 = vsel %vm675_vm0, %v548_v8, 0.0  ;;  %v459_v50 = vld [vmem:[#allocation2 + $0x140] sm:$0xff]  ;;  %v430_v55 = vld [vmem:[#allocation2 + $0x58] sm:$0xff] }
  0x4d   : > { %689 = vadd.xlane.f32.xlu1 %v688_v11  ;;  %677 = vadd.xlane.f32.xlu0 %v676_v12  ;;  %v775_v19 = vsel %vm675_vm0, %v580_v15, 0.0  ;;  %v772_v20 = vsel %vm675_vm0, %v579_v16, 0.0  ;;  %v787_v25 = vsel %vm675_vm0, %v584_v21, 0.0  ;;  %v784_v26 = vsel %vm675_vm0, %v583_v22, 0.0  ;;  %v429_v56 = vld [vmem:[#allocation2 + $0x50] sm:$0xff]  ;;  %v432_v61 = vld [vmem:[#allocation2 + $0x68] sm:$0xff] }
  0x4e   : > { %v550_v27 = vmul.f32 %v8521_v0, %v422_v23  ;;  %v549_v28 = vmul.f32 %v8521_v0, %v421_v24  ;;  %v554_v33 = vmul.f32 %v8521_v0, %v426_v29  ;;  %v553_v34 = vmul.f32 %v8521_v0, %v425_v30  ;;  %v431_v62 = vld [vmem:[#allocation2 + $0x60] sm:$0xff]  ;;  %v462_v4 = vld [vmem:[#allocation2 + $0x158] sm:$0xff]  ;;  %v461_v5 = vld [vmem:[#allocation2 + $0x150] sm:$0xff] }
  0x4f   : > { %v556_v39 = vmul.f32 %v8521_v0, %v428_v35  ;;  %v555_v40 = vmul.f32 %v8521_v0, %v427_v36  ;;  %v582_v45 = vmul.f32 %v8521_v0, %v454_v41  ;;  %v581_v46 = vmul.f32 %v8521_v0, %v453_v42  ;;  %v464_v10 = vld [vmem:[#allocation2 + $0x168] sm:$0xff]  ;;  %v463_v11 = vld [vmem:[#allocation2 + $0x160] sm:$0xff]  ;;  %v434_v16 = vld [vmem:[#allocation2 + $0x78] sm:$0xff] }
  0x50   : > { %v685_v31 = vsel %vm675_vm0, %v550_v27, 0.0  ;;  %v682_v32 = vsel %vm675_vm0, %v549_v28, 0.0  ;;  %v697_v37 = vsel %vm675_vm0, %v554_v33, 0.0  ;;  %v694_v38 = vsel %vm675_vm0, %v553_v34, 0.0  ;;  %v433_v17 = vld [vmem:[#allocation2 + $0x70] sm:$0xff]  ;;  %v436_v22 = vld [vmem:[#allocation2 + $0x88] sm:$0xff] }
  0x51   : > { %692 = vadd.xlane.f32.xlu1 %v691_v13  ;;  %680 = vadd.xlane.f32.xlu0 %v679_v14  ;;  %v703_v43 = vsel %vm675_vm0, %v556_v39, 0.0  ;;  %v700_v44 = vsel %vm675_vm0, %v555_v40, 0.0  ;;  %v781_v51 = vsel %vm675_vm0, %v582_v45, 0.0  ;;  %v778_v52 = vsel %vm675_vm0, %v581_v46, 0.0  ;;  %v435_v23 = vld [vmem:[#allocation2 + $0x80] sm:$0xff]  ;;  %v466_v28 = vld [vmem:[#allocation2 + $0x178] sm:$0xff] }
  0x52   : > { %v586_v53 = vmul.f32 %v8521_v0, %v458_v47  ;;  %v585_v54 = vmul.f32 %v8521_v0, %v457_v48  ;;  %v588_v59 = vmul.f32 %v8521_v0, %v460_v49  ;;  %v587_v60 = vmul.f32 %v8521_v0, %v459_v50  ;;  %v465_v29 = vld [vmem:[#allocation2 + $0x170] sm:$0xff]  ;;  %v468_v34 = vld [vmem:[#allocation2 + $0x188] sm:$0xff]  ;;  %v467_v35 = vld [vmem:[#allocation2 + $0x180] sm:$0xff] }
  0x53   : > { %v558_v2 = vmul.f32 %v8521_v0, %v430_v55  ;;  %v557_v3 = vmul.f32 %v8521_v0, %v429_v56  ;;  %v560_v8 = vmul.f32 %v8521_v0, %v432_v61  ;;  %v559_v9 = vmul.f32 %v8521_v0, %v431_v62  ;;  %v438_v40 = vld [vmem:[#allocation2 + $0x98] sm:$0xff]  ;;  %v437_v41 = vld [vmem:[#allocation2 + $0x90] sm:$0xff]  ;;  %v440_v46 = vld [vmem:[#allocation2 + $0xa8] sm:$0xff] }
  0x54   : > { %v793_v57 = vsel %vm675_vm0, %v586_v53, 0.0  ;;  %v790_v58 = vsel %vm675_vm0, %v585_v54, 0.0  ;;  %v799_v63 = vsel %vm675_vm0, %v588_v59, 0.0  ;;  %v796_v1 = vsel %vm675_vm0, %v587_v60, 0.0  ;;  %v439_v47 = vld [vmem:[#allocation2 + $0xa0] sm:$0xff]  ;;  %v469_v53 = vld [vmem:[#allocation2 + $0x190] sm:$0xff] }
  0x55   : > { %776 = vadd.xlane.f32.xlu1 %v775_v19  ;;  %773 = vadd.xlane.f32.xlu0 %v772_v20  ;;  %v709_v6 = vsel %vm675_vm0, %v558_v2, 0.0  ;;  %v706_v7 = vsel %vm675_vm0, %v557_v3, 0.0  ;;  %v715_v12 = vsel %vm675_vm0, %v560_v8, 0.0  ;;  %v712_v13 = vsel %vm675_vm0, %v559_v9, 0.0  ;;  %v471_v59 = vld [vmem:[#allocation2 + $0x1a0] sm:$0xff]  ;;  %v441_v2 = vld [vmem:[#allocation2 + $0xb0] sm:$0xff] }
  0x56   : > { %v590_v14 = vmul.f32 %v8521_v0, %v462_v4  ;;  %v589_v15 = vmul.f32 %v8521_v0, %v461_v5  ;;  %v592_v20 = vmul.f32 %v8521_v0, %v464_v10  ;;  %v591_v21 = vmul.f32 %v8521_v0, %v463_v11  ;;  %v443_v8 = vld [vmem:[#allocation2 + $0xc0] sm:$0xff] }
  0x57   : > { %v561_v27 = vmul.f32 %v8521_v0, %v433_v17  ;;  %v563_v33 = vmul.f32 %v8521_v0, %v435_v23  ;;  %v593_v39 = vmul.f32 %v8521_v0, %v465_v29  ;;  %v595_v45 = vmul.f32 %v8521_v0, %v467_v35 }
  0x58   : > { %v805_v18 = vsel %vm675_vm0, %v590_v14, 0.0  ;;  %v802_v19 = vsel %vm675_vm0, %v589_v15, 0.0  ;;  %v811_v24 = vsel %vm675_vm0, %v592_v20, 0.0  ;;  %v566_v50 = vmul.f32 %v8521_v0, %v438_v40  ;;  %v473_v14 = vld [vmem:[#allocation2 + $0x1b0] sm:$0xff]  ;;  %v475_v20 = vld [vmem:[#allocation2 + $0x1c0] sm:$0xff] }
  0x59   : > { %788 = vadd.xlane.f32.xlu1 %v787_v25  ;;  %785 = vadd.xlane.f32.xlu0 %v784_v26  ;;  %v808_v25 = vsel %vm675_vm0, %v591_v21, 0.0  ;;  %v562_v26 = vmul.f32 %v8521_v0, %v434_v16  ;;  %v820_v49 = vsel %vm675_vm0, %v595_v45, 0.0  ;;  %v568_v56 = vmul.f32 %v8521_v0, %v440_v46 }
  0x5a   : > { %v733_v54 = vsel %vm675_vm0, %v566_v50, 0.0  ;;  %v484_v50 = vld [vmem:[#allocation2 + $0x208] sm:$0xff]  ;;  %vm8365_vm15 = vmmov 1  }
  0x5b   : > { %v721_v30 = vsel %vm675_vm0, %v562_v26, 0.0  ;;  %v739_v60 = vsel %vm675_vm0, %v568_v56, 0.0  ;;  %v445_v26 = vld [vmem:[#allocation2 + $0xd0] sm:$0xff] }
  0x5d   : > { %686 = vadd.xlane.f32.xlu1 %v685_v31  ;;  %683 = vadd.xlane.f32.xlu0 %v682_v32  ;;  %v718_v31 = vsel %vm675_vm0, %v561_v27, 0.0  ;;  %v564_v32 = vmul.f32 %v8521_v0, %v436_v22 }
  0x5f   : > { %v727_v36 = vsel %vm675_vm0, %v564_v32, 0.0  ;;  %v447_v32 = vld [vmem:[#allocation2 + $0xe0] sm:$0xff] }
  0x61   : > { %698 = vadd.xlane.f32.xlu1 %v697_v37  ;;  %695 = vadd.xlane.f32.xlu0 %v694_v38  ;;  %v724_v37 = vsel %vm675_vm0, %v563_v33, 0.0  ;;  %v594_v38 = vmul.f32 %v8521_v0, %v466_v28  ;;  %v478_v33 = vld [vmem:[#allocation2 + $0x1d8] sm:$0xff] }
  0x63   : > { %v817_v42 = vsel %vm675_vm0, %v594_v38, 0.0  ;;  %v450_v38 = vld [vmem:[#allocation2 + $0xf8] sm:$0xff] }
  0x65   : > { %704 = vadd.xlane.f32.xlu1 %v703_v43  ;;  %701 = vadd.xlane.f32.xlu0 %v700_v44  ;;  %v814_v43 = vsel %vm675_vm0, %v593_v39, 0.0  ;;  %v596_v44 = vmul.f32 %v8521_v0, %v468_v34  ;;  %v477_v34 = vld [vmem:[#allocation2 + $0x1d0] sm:$0xff] }
  0x67   : > { %v823_v48 = vsel %vm675_vm0, %v596_v44, 0.0  ;;  %v481_v44 = vld [vmem:[#allocation2 + $0x1f0] sm:$0xff] }
  0x69   : > { %782 = vadd.xlane.f32.xlu1 %v781_v51  ;;  %779 = vadd.xlane.f32.xlu0 %v778_v52  ;;  %v565_v51 = vmul.f32 %v8521_v0, %v437_v41  ;;  %v470_v52 = vld [vmem:[#allocation2 + $0x198] sm:$0xff]  ;;  %v573_v41 = vmul.f32 %v8521_v0, %v445_v26 }
  0x6a   : > { %v598_v62 = vmul.f32 %v8521_v0, %v470_v52 }
  0x6b   : > { %v730_v55 = vsel %vm675_vm0, %v565_v51, 0.0  ;;  %v483_v51 = vld [vmem:[#allocation2 + $0x200] sm:$0xff]  ;;  %v754_v52 = vsel %vm675_vm0, %v573_v41, 0.0 }
  0x6c   : > { %v829_v3 = vsel %vm675_vm0, %v598_v62, 0.0  ;;  %v491_v41 = vld [vmem:[#allocation2 + $0x240] sm:$0xff] }
  0x6d   : > { %794 = vadd.xlane.f32.xlu1 %v793_v57  ;;  %791 = vadd.xlane.f32.xlu0 %v790_v58  ;;  %v567_v57 = vmul.f32 %v8521_v0, %v439_v47  ;;  %v472_v58 = vld [vmem:[#allocation2 + $0x1a8] sm:$0xff]  ;;  %v575_v47 = vmul.f32 %v8521_v0, %v447_v32 }
  0x6e   : > { %v600_v5 = vmul.f32 %v8521_v0, %v472_v58  ;;  %v609_v58 = vmul.f32 %v8521_v0, %v481_v44  ;;  %v518_v44 = vld [vmem:[#allocation2 + $0x318] sm:$0xff] }
  0x6f   : > { %v736_v61 = vsel %vm675_vm0, %v567_v57, 0.0 }
  0x70   : > { %v835_v9 = vsel %vm675_vm0, %v600_v5, 0.0  ;;  %v611_v5 = vmul.f32 %v8521_v0, %v483_v51 }
  0x71   : > { %800 = vadd.xlane.f32.xlu1 %v799_v63  ;;  %797 = vadd.xlane.f32.xlu0 %v796_v1  ;;  %v597_v63 = vmul.f32 %v8521_v0, %v469_v53  ;;  %v442_v1 = vld [vmem:[#allocation2 + $0xb8] sm:$0xff] }
  0x72   : > { %v570_v11 = vmul.f32 %v8521_v0, %v442_v1  ;;  %v515_v1 = vld [vmem:[#allocation2 + $0x300] sm:$0xff] }
  0x73   : > { %v826_v4 = vsel %vm675_vm0, %v597_v63, 0.0  ;;  %v612_v63 = vmul.f32 %v8521_v0, %v484_v50 }
  0x74   : > { %v745_v15 = vsel %vm675_vm0, %v570_v11, 0.0 }
  0x75   : > { %710 = vadd.xlane.f32.xlu1 %v709_v6  ;;  %707 = vadd.xlane.f32.xlu0 %v706_v7  ;;  %v599_v6 = vmul.f32 %v8521_v0, %v471_v59  ;;  %v444_v7 = vld [vmem:[#allocation2 + $0xc8] sm:$0xff] }
  0x76   : > { %v572_v17 = vmul.f32 %v8521_v0, %v444_v7  ;;  %v488_v59 = vld [vmem:[#allocation2 + $0x228] sm:$0xff]  ;;  %v519_v7 = vld [vmem:[#allocation2 + $0x320] sm:$0xff] }
  0x77   : > { %v832_v10 = vsel %vm675_vm0, %v599_v6, 0.0  ;;  %v520_v6 = vld [vmem:[#allocation2 + $0x328] sm:$0xff] }
  0x78   : > { %v751_v21 = vsel %vm675_vm0, %v572_v17, 0.0 }
  0x79   : > { %716 = vadd.xlane.f32.xlu1 %v715_v12  ;;  %713 = vadd.xlane.f32.xlu0 %v712_v13  ;;  %v569_v12 = vmul.f32 %v8521_v0, %v441_v2  ;;  %v474_v13 = vld [vmem:[#allocation2 + $0x1b8] sm:$0xff]  ;;  %v760_v2 = vsel %vm675_vm0, %v575_v47, 0.0 }
  0x7a   : > { %v602_v23 = vmul.f32 %v8521_v0, %v474_v13  ;;  %v862_v13 = vsel %vm675_vm0, %v609_v58, 0.0 }
  0x7b   : > { %v742_v16 = vsel %vm675_vm0, %v569_v12, 0.0 }
  0x7c   : > { %v841_v27 = vsel %vm675_vm0, %v602_v23, 0.0  ;;  %v485_v23 = vld [vmem:[#allocation2 + $0x210] sm:$0xff] }
  0x7d   : > { %806 = vadd.xlane.f32.xlu1 %v805_v18  ;;  %803 = vadd.xlane.f32.xlu0 %v802_v19  ;;  %v571_v18 = vmul.f32 %v8521_v0, %v443_v8  ;;  %v476_v19 = vld [vmem:[#allocation2 + $0x1c8] sm:$0xff] }
  0x7e   : > { %v604_v29 = vmul.f32 %v8521_v0, %v476_v19  ;;  %v643_v19 = vmul.f32 %v8521_v0, %v515_v1  ;;  %v524_v1 = vld [vmem:[#allocation2 + $0x348] sm:$0xff] }
  0x7f   : > { %v748_v22 = vsel %vm675_vm0, %v571_v18, 0.0  ;;  %v868_v18 = vsel %vm675_vm0, %v611_v5, 0.0 }
  0x80   : > { %v847_v39 = vsel %vm675_vm0, %v604_v29, 0.0  ;;  %v964_v29 = vsel %vm675_vm0, %v643_v19, 0.0 }
  0x81   : > { %812 = vadd.xlane.f32.xlu1 %v811_v24  ;;  %809 = vadd.xlane.f32.xlu0 %v808_v25  ;;  %v601_v24 = vmul.f32 %v8521_v0, %v473_v14  ;;  %v446_v25 = vld [vmem:[#allocation2 + $0xd8] sm:$0xff]  ;;  %v871_v14 = vsel %vm675_vm0, %v612_v63, 0.0 }
  0x82   : > { %v574_v35 = vmul.f32 %v8521_v0, %v446_v25 }
  0x83   : > { %v838_v28 = vsel %vm675_vm0, %v601_v24, 0.0 }
  0x84   : > { %v757_v46 = vsel %vm675_vm0, %v574_v35, 0.0  ;;  %v8672_v35 = vld [vmem:[%s8518_s24] ss:$0 sm:$0xff]  ;;  %s410_s24 = scalar_lea.vmem %s12063_s11, %s7362_s20 }
  0x85   : > { %722 = vadd.xlane.f32.xlu1 %v721_v30  ;;  %719 = vadd.xlane.f32.xlu0 %v718_v31  ;;  %v603_v30 = vmul.f32 %v8521_v0, %v475_v20  ;;  %v448_v31 = vld [vmem:[#allocation2 + $0xe8] sm:$0xff]  ;;  %v648_v20 = vmul.f32 %v8521_v0, %v520_v6 }
  0x86   : > { %v576_v45 = vmul.f32 %v8521_v0, %v448_v31 }
  0x87   : > { %v844_v40 = vsel %vm675_vm0, %v603_v30, 0.0  ;;  %v979_v30 = vsel %vm675_vm0, %v648_v20, 0.0 }
  0x88   : > { %v763_v62 = vsel %vm675_vm0, %v576_v45, 0.0 }
  0x89   : > { %728 = vadd.xlane.f32.xlu1 %v727_v36  ;;  %725 = vadd.xlane.f32.xlu0 %v724_v37  ;;  %v480_v36 = vld [vmem:[#allocation2 + $0x1e8] sm:$0xff]  ;;  %v479_v37 = vld [vmem:[#allocation2 + $0x1e0] sm:$0xff] }
  0x8a   : > { %v608_v53 = vmul.f32 %v8521_v0, %v480_v36 }
  0x8c   : > { %v859_v8 = vsel %vm675_vm0, %v608_v53, 0.0 }
  0x8d   : > { %818 = vadd.xlane.f32.xlu1 %v817_v42  ;;  %815 = vadd.xlane.f32.xlu0 %v814_v43  ;;  %v449_v42 = vld [vmem:[#allocation2 + $0xf0] sm:$0xff]  ;;  %v482_v43 = vld [vmem:[#allocation2 + $0x1f8] sm:$0xff] }
  0x8e   : > { %v577_v56 = vmul.f32 %v8521_v0, %v449_v42  ;;  %v610_v57 = vmul.f32 %v8521_v0, %v482_v43 }
  0x90   : > { %v766_v11 = vsel %vm675_vm0, %v577_v56, 0.0  ;;  %v865_v12 = vsel %vm675_vm0, %v610_v57, 0.0  ;;  %v522_v56 = vld [vmem:[#allocation2 + $0x338] sm:$0xff]  ;;  %v521_v57 = vld [vmem:[#allocation2 + $0x330] sm:$0xff] }
  0x91   : > { %824 = vadd.xlane.f32.xlu1 %v823_v48  ;;  %821 = vadd.xlane.f32.xlu0 %v820_v49  ;;  %v606_v48 = vmul.f32 %v8521_v0, %v478_v33  ;;  %v605_v49 = vmul.f32 %v8521_v0, %v477_v34  ;;  %v489_v34 = vld [vmem:[#allocation2 + $0x230] sm:$0xff]  ;;  %v649_v63 = vmul.f32 %v8672_v35, %v521_v57 }
  0x93   : > { %v982_v6 = vsel %vm675_vm0, %v649_v63, 0.0 }
  0x95   : > { %734 = vadd.xlane.f32.xlu1 %v733_v54  ;;  %731 = vadd.xlane.f32.xlu0 %v730_v55  ;;  %v607_v54 = vmul.f32 %v8521_v0, %v479_v37  ;;  %v578_v55 = vmul.f32 %v8521_v0, %v450_v38  ;;  %v617_v37 = vmul.f32 %v8672_v35, %v489_v34 }
  0x99   : > { %740 = vadd.xlane.f32.xlu1 %v739_v60  ;;  %737 = vadd.xlane.f32.xlu0 %v736_v61  ;;  %v487_v60 = vld [vmem:[#allocation2 + $0x220] sm:$0xff]  ;;  %v516_v61 = vld [vmem:[#allocation2 + $0x308] sm:$0xff] }
  0x9a   : > { %v644_v17 = vmul.f32 %v8521_v0, %v516_v61 }
  0x9d   : > { %830 = vadd.xlane.f32.xlu1 %v829_v3  ;;  %827 = vadd.xlane.f32.xlu0 %v826_v4  ;;  %v853_v3 = vsel %vm675_vm0, %v606_v48, 0.0  ;;  %v850_v4 = vsel %vm675_vm0, %v605_v49, 0.0  ;;  %v619_v48 = vmul.f32 %v8672_v35, %v491_v41  ;;  %v517_v49 = vld [vmem:[#allocation2 + $0x310] sm:$0xff]  ;;  %v498_v41 = vld [vmem:[#allocation2 + $0x278] sm:$0xff] }
  0x9f   : > { %v892_v53 = vsel %vm675_vm0, %v619_v48, 0.0 }
  0xa1   : > { %836 = vadd.xlane.f32.xlu1 %v835_v9  ;;  %833 = vadd.xlane.f32.xlu0 %v832_v10  ;;  %v856_v9 = vsel %vm675_vm0, %v607_v54, 0.0  ;;  %v769_v10 = vsel %vm675_vm0, %v578_v55, 0.0  ;;  %v646_v54 = vmul.f32 %v8672_v35, %v518_v44  ;;  %v645_v55 = vmul.f32 %v8672_v35, %v517_v49  ;;  %v497_v44 = vld [vmem:[#allocation2 + $0x270] sm:$0xff] }
  0xa3   : > { %v970_v61 = vsel %vm675_vm0, %v645_v55, 0.0  ;;  %v500_v55 = vld [vmem:[#allocation2 + $0x288] sm:$0xff] }
  0xa4   : > { %v628_v63 = vmul.f32 %v8672_v35, %v500_v55 }
  0xa5   : > { %746 = vadd.xlane.f32.xlu1 %v745_v15  ;;  %743 = vadd.xlane.f32.xlu0 %v742_v16  ;;  %v616_v15 = vmul.f32 %v8521_v0, %v488_v59  ;;  %v615_v16 = vmul.f32 %v8521_v0, %v487_v60  ;;  %v973_v60 = vsel %vm675_vm0, %v646_v54, 0.0  ;;  %v625_v54 = vmul.f32 %v8672_v35, %v497_v44 }
  0xa7   : > { %v883_v24 = vsel %vm675_vm0, %v616_v15, 0.0  ;;  %v880_v25 = vsel %vm675_vm0, %v615_v16, 0.0 }
  0xa9   : > { %752 = vadd.xlane.f32.xlu1 %v751_v21  ;;  %749 = vadd.xlane.f32.xlu0 %v748_v22  ;;  %v647_v21 = vmul.f32 %v8521_v0, %v519_v7  ;;  %v486_v22 = vld [vmem:[#allocation2 + $0x218] sm:$0xff]  ;;  %v652_v7 = vmul.f32 %v8672_v35, %v524_v1 }
  0xaa   : > { %v614_v26 = vmul.f32 %v8521_v0, %v486_v22 }
  0xab   : > { %v976_v31 = vsel %vm675_vm0, %v647_v21, 0.0 }
  0xac   : > { %v877_v32 = vsel %vm675_vm0, %v614_v26, 0.0  ;;  %v525_v26 = vld [vmem:[#allocation2 + $0x350] sm:$0xff] }
  0xad   : > { %842 = vadd.xlane.f32.xlu1 %v841_v27  ;;  %839 = vadd.xlane.f32.xlu0 %v838_v28  ;;  %v613_v27 = vmul.f32 %v8521_v0, %v485_v23  ;;  %v967_v28 = vsel %vm675_vm0, %v644_v17, 0.0  ;;  %v490_v0 = vld [vmem:[#allocation2 + $0x238] sm:$0xff]  ;;  %v496_v17 = vld [vmem:[#allocation2 + $0x268] sm:$0xff] }
  0xae   : > { %v618_v36 = vmul.f32 %v8672_v35, %v490_v0  ;;  %v624_v23 = vmul.f32 %v8672_v35, %v496_v17  ;;  %v527_v0 = vld [vmem:[#allocation2 + $0x360] sm:$0xff] }
  0xaf   : > { %v874_v33 = vsel %vm675_vm0, %v613_v27, 0.0 }
  0xb0   : > { %v889_v38 = vsel %vm675_vm0, %v618_v36, 0.0 }
  0xb1   : > { %848 = vadd.xlane.f32.xlu1 %v847_v39  ;;  %845 = vadd.xlane.f32.xlu0 %v844_v40  ;;  %v886_v39 = vsel %vm675_vm0, %v617_v37, 0.0  ;;  %v492_v40 = vld [vmem:[#allocation2 + $0x248] sm:$0xff] }
  0xb2   : > { %v620_v47 = vmul.f32 %v8672_v35, %v492_v40  ;;  %v655_v40 = vmul.f32 %v8672_v35, %v527_v0  ;;  %v504_v0 = vld [vmem:[#allocation2 + $0x2a8] sm:$0xff] }
  0xb3   : > { %v632_v44 = vmul.f32 %v8672_v35, %v504_v0 }
  0xb5   : > { %758 = vadd.xlane.f32.xlu1 %v757_v46  ;;  %755 = vadd.xlane.f32.xlu0 %v754_v52  ;;  %v895_v52 = vsel %vm675_vm0, %v620_v47, 0.0 }
  0xb9   : > { %764 = vadd.xlane.f32.xlu1 %v763_v62  ;;  %761 = vadd.xlane.f32.xlu0 %v760_v2  ;;  %v650_v62 = vmul.f32 %v8672_v35, %v522_v56  ;;  %v523_v2 = vld [vmem:[#allocation2 + $0x340] sm:$0xff] }
  0xba   : > { %v499_v56 = vld [vmem:[#allocation2 + $0x280] sm:$0xff] }
  0xbb   : > { %v985_v5 = vsel %vm675_vm0, %v650_v62, 0.0  ;;  %v910_v62 = vsel %vm675_vm0, %v625_v54, 0.0  ;;  %v627_v1 = vmul.f32 %v8672_v35, %v499_v56  ;;  %v931_v56 = vsel %vm675_vm0, %v632_v44, 0.0 }
  0xbd   : > { %854 = vadd.xlane.f32.xlu1 %v853_v3  ;;  %851 = vadd.xlane.f32.xlu0 %v850_v4 }
  0xc1   : > { %860 = vadd.xlane.f32.xlu1 %v859_v8  ;;  %857 = vadd.xlane.f32.xlu0 %v856_v9  ;;  %v651_v8 = vmul.f32 %v8672_v35, %v523_v2  ;;  %v494_v9 = vld [vmem:[#allocation2 + $0x258] sm:$0xff] }
  0xc2   : > { %v622_v15 = vmul.f32 %v8672_v35, %v494_v9  ;;  %v530_v2 = vld [vmem:[#allocation2 + $0x378] sm:$0xff]  ;;  %v916_v9 = vsel %vm675_vm0, %v627_v1, 0.0  ;;  %v536_v1 = vld [vmem:[#allocation2 + $0x3a8] sm:$0xff] }
  0xc4   : > { %v901_v21 = vsel %vm675_vm0, %v622_v15, 0.0  ;;  %v531_v15 = vld [vmem:[#allocation2 + $0x380] sm:$0xff] }
  0xc5   : > { %770 = vadd.xlane.f32.xlu1 %v769_v10  ;;  %767 = vadd.xlane.f32.xlu0 %v766_v11  ;;  %v493_v10 = vld [vmem:[#allocation2 + $0x250] sm:$0xff] }
  0xc6   : > { %v621_v16 = vmul.f32 %v8672_v35, %v493_v10  ;;  %v658_v10 = vmul.f32 %v8672_v35, %v530_v2  ;;  %v535_v2 = vld [vmem:[#allocation2 + $0x3a0] sm:$0xff] }
  0xc8   : > { %v898_v22 = vsel %vm675_vm0, %v621_v16, 0.0 }
  0xc9   : > { %866 = vadd.xlane.f32.xlu1 %v865_v12  ;;  %863 = vadd.xlane.f32.xlu0 %v862_v13  ;;  %v991_v13 = vsel %vm675_vm0, %v652_v7, 0.0 }
  0xcd   : > { %872 = vadd.xlane.f32.xlu1 %v871_v14  ;;  %869 = vadd.xlane.f32.xlu0 %v868_v18  ;;  %v988_v14 = vsel %vm675_vm0, %v651_v8, 0.0  ;;  %v495_v18 = vld [vmem:[#allocation2 + $0x260] sm:$0xff]  ;;  %v919_v8 = vsel %vm675_vm0, %v628_v63, 0.0 }
  0xd1   : > { %884 = vadd.xlane.f32.xlu1 %v883_v24  ;;  %881 = vadd.xlane.f32.xlu0 %v880_v25  ;;  %v623_v24 = vmul.f32 %v8672_v35, %v495_v18  ;;  %v526_v25 = vld [vmem:[#allocation2 + $0x358] sm:$0xff]  ;;  %v1009_v18 = vsel %vm675_vm0, %v658_v10, 0.0 }
  0xd5   : > { %968 = vadd.xlane.f32.xlu1 %v967_v28  ;;  %965 = vadd.xlane.f32.xlu0 %v964_v29  ;;  %v907_v29 = vsel %vm675_vm0, %v624_v23, 0.0  ;;  %v659_v23 = vmul.f32 %v8672_v35, %v531_v15  ;;  %v506_v15 = vld [vmem:[#allocation2 + $0x2b8] sm:$0xff] }
  0xd9   : > { %980 = vadd.xlane.f32.xlu1 %v979_v30  ;;  %977 = vadd.xlane.f32.xlu0 %v976_v31  ;;  %v904_v30 = vsel %vm675_vm0, %v623_v24, 0.0  ;;  %v654_v31 = vmul.f32 %v8672_v35, %v526_v25  ;;  %v502_v24 = vld [vmem:[#allocation2 + $0x298] sm:$0xff]  ;;  %v501_v25 = vld [vmem:[#allocation2 + $0x290] sm:$0xff] }
  0xda   : > { %v8678_v42 = vpop.xlane.xlu1 %689  ;;  %v8680_v43 = vpop.xlane.xlu0 %677 }
  0xdb   : > { %v997_v37 = vsel %vm675_vm0, %v654_v31, 0.0  ;;  %v1012_v31 = vsel %vm675_vm0, %v659_v23, 0.0 }
  0xdd   : > { %878 = vadd.xlane.f32.xlu1 %v877_v32  ;;  %875 = vadd.xlane.f32.xlu0 %v874_v33  ;;  %v653_v32 = vmul.f32 %v8672_v35, %v525_v26  ;;  %v528_v33 = vld [vmem:[#allocation2 + $0x368] sm:$0xff] }
  0xde   : > { %v8682_v45 = vpop.xlane.xlu1 %692  ;;  %v8684_v46 = vpop.xlane.xlu0 %680 }
  0xe1   : > { %890 = vadd.xlane.f32.xlu1 %v889_v38  ;;  %887 = vadd.xlane.f32.xlu0 %v886_v39  ;;  %v994_v38 = vsel %vm675_vm0, %v653_v32, 0.0  ;;  %v656_v39 = vmul.f32 %v8672_v35, %v528_v33  ;;  %v630_v32 = vmul.f32 %v8672_v35, %v502_v24  ;;  %v629_v33 = vmul.f32 %v8672_v35, %v501_v25 }
  0xe2   : > { %v8688_v50 = vpop.xlane.xlu1 %776  ;;  %v8690_v51 = vpop.xlane.xlu0 %773  ;;  %v634_v25 = vmul.f32 %v8672_v35, %v506_v15 }
  0xe3   : > { %v1003_v49 = vsel %vm675_vm0, %v656_v39, 0.0 }
  0xe5   : > { %896 = vadd.xlane.f32.xlu1 %v895_v52  ;;  %893 = vadd.xlane.f32.xlu0 %v892_v53  ;;  %v1000_v52 = vsel %vm675_vm0, %v655_v40, 0.0  ;;  %v626_v53 = vmul.f32 %v8672_v35, %v498_v41  ;;  %v925_v40 = vsel %vm675_vm0, %v630_v32, 0.0  ;;  %v922_v41 = vsel %vm675_vm0, %v629_v33, 0.0  ;;  %v507_v32 = vld [vmem:[#allocation2 + $0x2c0] sm:$0xff] }
  0xe6   : > { %v8696_v58 = vpop.xlane.xlu1 %788  ;;  %v8698_v59 = vpop.xlane.xlu0 %785  ;;  %v635_v44 = vmul.f32 %v8672_v35, %v507_v32 }
  0xe9   : > { %974 = vadd.xlane.f32.xlu1 %v973_v60  ;;  %971 = vadd.xlane.f32.xlu0 %v970_v61  ;;  %v913_v61 = vsel %vm675_vm0, %v626_v53, 0.0  ;;  %v533_v53 = vld [vmem:[#allocation2 + $0x390] sm:$0xff] }
  0xea   : > { %v8704_v3 = vpop.xlane.xlu1 %686  ;;  %v8706_v4 = vpop.xlane.xlu0 %683  ;;  %v661_v63 = vmul.f32 %v8672_v35, %v533_v53 }
  0xec   : > { %v1018_v10 = vsel %vm675_vm0, %v661_v63, 0.0 }
  0xed   : > { %986 = vadd.xlane.f32.xlu1 %v985_v5  ;;  %983 = vadd.xlane.f32.xlu0 %v982_v6  ;;  %v529_v5 = vld [vmem:[#allocation2 + $0x370] sm:$0xff] }
  0xee   : > { %v8712_v11 = vpop.xlane.xlu1 %698  ;;  %v8714_v12 = vpop.xlane.xlu0 %695 }
  0xf1   : > { %992 = vadd.xlane.f32.xlu1 %v991_v13  ;;  %989 = vadd.xlane.f32.xlu0 %v988_v14  ;;  %v657_v13 = vmul.f32 %v8672_v35, %v529_v5  ;;  %v532_v14 = vld [vmem:[#allocation2 + $0x388] sm:$0xff] }
  0xf2   : > { %v8720_v19 = vpop.xlane.xlu1 %704  ;;  %v8722_v20 = vpop.xlane.xlu0 %701 }
  0xf5   : > { %902 = vadd.xlane.f32.xlu1 %v901_v21  ;;  %899 = vadd.xlane.f32.xlu0 %v898_v22  ;;  %v1006_v21 = vsel %vm675_vm0, %v657_v13, 0.0  ;;  %v660_v22 = vmul.f32 %v8672_v35, %v532_v14  ;;  %v664_v13 = vmul.f32 %v8672_v35, %v536_v1  ;;  %v663_v14 = vmul.f32 %v8672_v35, %v535_v2  ;;  %v540_v2 = vld [vmem:[#allocation2 + $0x3c8] sm:$0xff] }
  0xf6   : > { %v8728_v27 = vpop.xlane.xlu1 %782  ;;  %v8730_v28 = vpop.xlane.xlu0 %779 }
  0xf7   : > { %v1027_v23 = vsel %vm675_vm0, %v664_v13, 0.0  ;;  %v1024_v24 = vsel %vm675_vm0, %v663_v14, 0.0 }
  0xf9   : > { %908 = vadd.xlane.f32.xlu1 %v907_v29  ;;  %905 = vadd.xlane.f32.xlu0 %v904_v30  ;;  %v1015_v30 = vsel %vm675_vm0, %v660_v22, 0.0 }
  0xfa   : > { %v8736_v34 = vpop.xlane.xlu1 %794  ;;  %v8738_v36 = vpop.xlane.xlu0 %791 }
  0xfd   : > { %998 = vadd.xlane.f32.xlu1 %v997_v37  ;;  %995 = vadd.xlane.f32.xlu0 %v994_v38  ;;  %v503_v37 = vld [vmem:[#allocation2 + $0x2a0] sm:$0xff] }
  0xfe   : > { %v8744_v47 = vpop.xlane.xlu1 %800  ;;  %v8746_v48 = vpop.xlane.xlu0 %797 }
 0x101   : > { %1004 = vadd.xlane.f32.xlu1 %v1003_v49  ;;  %1001 = vadd.xlane.f32.xlu0 %v1000_v52  ;;  %v631_v49 = vmul.f32 %v8672_v35, %v503_v37  ;;  %v534_v52 = vld [vmem:[#allocation2 + $0x398] sm:$0xff]  ;;  %v937_v37 = vsel %vm675_vm0, %v634_v25, 0.0  ;;  %v509_v25 = vld [vmem:[#allocation2 + $0x2d0] sm:$0xff] }
 0x102   : > { %v8752_v57 = vpop.xlane.xlu1 %710  ;;  %v8754_v60 = vpop.xlane.xlu0 %707 }
 0x105   : > { %914 = vadd.xlane.f32.xlu1 %v913_v61  ;;  %911 = vadd.xlane.f32.xlu0 %v910_v62  ;;  %v928_v61 = vsel %vm675_vm0, %v631_v49, 0.0  ;;  %v662_v62 = vmul.f32 %v8672_v35, %v534_v52  ;;  %v538_v49 = vld [vmem:[#allocation2 + $0x3b8] sm:$0xff]  ;;  %v537_v52 = vld [vmem:[#allocation2 + $0x3b0] sm:$0xff] }
 0x106   : > { %v8760_v6 = vpop.xlane.xlu1 %716  ;;  %v8762_v7 = vpop.xlane.xlu0 %713  ;;  %v666_v63 = vmul.f32 %v8672_v35, %v538_v49  ;;  %v665_v1 = vmul.f32 %v8672_v35, %v537_v52  ;;  %v511_v49 = vld [vmem:[#allocation2 + $0x2e0] sm:$0xff] }
 0x108   : > { %v1033_v14 = vsel %vm675_vm0, %v666_v63, 0.0  ;;  %v1030_v15 = vsel %vm675_vm0, %v665_v1, 0.0 }
 0x109   : > { %920 = vadd.xlane.f32.xlu1 %v919_v8  ;;  %917 = vadd.xlane.f32.xlu0 %v916_v9  ;;  %v1021_v9 = vsel %vm675_vm0, %v662_v62, 0.0  ;;  %v940_v62 = vsel %vm675_vm0, %v635_v44, 0.0  ;;  %v512_v44 = vld [vmem:[#allocation2 + $0x2e8] sm:$0xff] }
 0x10a   : > { %v8768_v16 = vpop.xlane.xlu1 %806  ;;  %v8770_v17 = vpop.xlane.xlu0 %803  ;;  %v640_v1 = vmul.f32 %v8672_v35, %v512_v44 }
 0x10d   : > { %1010 = vadd.xlane.f32.xlu1 %v1009_v18  ;;  %1007 = vadd.xlane.f32.xlu0 %v1006_v21  ;;  %v505_v18 = vld [vmem:[#allocation2 + $0x2b0] sm:$0xff] }
 0x10e   : > { %v8776_v26 = vpop.xlane.xlu1 %812  ;;  %v8778_v29 = vpop.xlane.xlu0 %809 }
 0x111   : > { %1016 = vadd.xlane.f32.xlu1 %v1015_v30  ;;  %1013 = vadd.xlane.f32.xlu0 %v1012_v31  ;;  %v633_v30 = vmul.f32 %v8672_v35, %v505_v18  ;;  %v508_v31 = vld [vmem:[#allocation2 + $0x2c8] sm:$0xff]  ;;  %v668_v18 = vmul.f32 %v8672_v35, %v540_v2  ;;  %v639_v2 = vmul.f32 %v8672_v35, %v511_v49 }
 0x112   : > { %v8784_v38 = vpop.xlane.xlu1 %722  ;;  %v8786_v39 = vpop.xlane.xlu0 %719 }
 0x113   : > { %v1039_v32 = vsel %vm675_vm0, %v668_v18, 0.0 }
 0x115   : > { %926 = vadd.xlane.f32.xlu1 %v925_v40  ;;  %923 = vadd.xlane.f32.xlu0 %v922_v41  ;;  %v934_v40 = vsel %vm675_vm0, %v633_v30, 0.0  ;;  %v636_v41 = vmul.f32 %v8672_v35, %v508_v31 }
 0x116   : > { %v8792_v54 = vpop.xlane.xlu1 %728  ;;  %v8794_v55 = vpop.xlane.xlu0 %725 }
 0x119   : > { %932 = vadd.xlane.f32.xlu1 %v931_v56  ;;  %929 = vadd.xlane.f32.xlu0 %v928_v61  ;;  %v943_v61 = vsel %vm675_vm0, %v636_v41, 0.0  ;;  %v637_v41 = vmul.f32 %v8672_v35, %v509_v25 }
 0x11a   : > { %v8800_v5 = vpop.xlane.xlu1 %818  ;;  %v8802_v8 = vpop.xlane.xlu0 %815 }
 0x11b   : > { %v946_v63 = vsel %vm675_vm0, %v637_v41, 0.0 }
 0x11d   : > { %1022 = vadd.xlane.f32.xlu1 %v1021_v9  ;;  %1019 = vadd.xlane.f32.xlu0 %v1018_v10  ;;  %v539_v9 = vld [vmem:[#allocation2 + $0x3c0] sm:$0xff] }
 0x11e   : > { %v8808_v21 = vpop.xlane.xlu1 %824  ;;  %v8810_v22 = vpop.xlane.xlu0 %821 }
 0x11f   : > { %12223 = vst [vmem:[#allocation8_spill] sm:$0xff] %v8808_v21 }
 0x121   : > { %1028 = vadd.xlane.f32.xlu1 %v1027_v23  ;;  %1025 = vadd.xlane.f32.xlu0 %v1024_v24  ;;  %v667_v23 = vmul.f32 %v8672_v35, %v539_v9  ;;  %v510_v24 = vld [vmem:[#allocation2 + $0x2d8] sm:$0xff] }
 0x122   : > { %v8816_v33 = vpop.xlane.xlu1 %734  ;;  %v8818_v0 = vpop.xlane.xlu0 %731  ;;  %v542_v9 = vld [vmem:[#allocation2 + $0x3d8] sm:$0xff] }
 0x123   : > { %12224 = vst [vmem:[#allocation9_spill] sm:$0xff] %v8816_v33  ;;  %12225 = vst [vmem:[#allocation10_spill] sm:$0xff] %v8818_v0  ;;  %v670_v25 = vmul.f32 %v8672_v35, %v542_v9 }
 0x125   : > { %938 = vadd.xlane.f32.xlu1 %v937_v37  ;;  %935 = vadd.xlane.f32.xlu0 %v934_v40  ;;  %v1036_v37 = vsel %vm675_vm0, %v667_v23, 0.0  ;;  %v638_v40 = vmul.f32 %v8672_v35, %v510_v24  ;;  %v955_v23 = vsel %vm675_vm0, %v640_v1, 0.0  ;;  %v952_v24 = vsel %vm675_vm0, %v639_v2, 0.0 }
 0x126   : > { %v8824_v53 = vpop.xlane.xlu1 %740  ;;  %v8826_v56 = vpop.xlane.xlu0 %737  ;;  %v1045_v49 = vsel %vm675_vm0, %v670_v25, 0.0 }
 0x127   : > { %12226 = vst [vmem:[#allocation11_spill] sm:$0xff] %v8824_v53  ;;  %12227 = vst [vmem:[#allocation12_spill] sm:$0xff] %v8826_v56 }
 0x129   : > { %944 = vadd.xlane.f32.xlu1 %v943_v61  ;;  %941 = vadd.xlane.f32.xlu0 %v940_v62  ;;  %v949_v62 = vsel %vm675_vm0, %v638_v40, 0.0  ;;  %v543_v40 = vld [vmem:[#allocation2 + $0x3e0] sm:$0xff] }
 0x12a   : > { %v8832_v10 = vpop.xlane.xlu1 %830  ;;  %v8834_v13 = vpop.xlane.xlu0 %827  ;;  %v671_v1 = vmul.f32 %v8672_v35, %v543_v40 }
 0x12b   : > { %12228 = vst [vmem:[#allocation13_spill] sm:$0xff] %v8832_v10  ;;  %12229 = vst [vmem:[#allocation14_spill] sm:$0xff] %v8834_v13 }
 0x12d   : > { %1034 = vadd.xlane.f32.xlu1 %v1033_v14  ;;  %1031 = vadd.xlane.f32.xlu0 %v1030_v15  ;;  %v541_v14 = vld [vmem:[#allocation2 + $0x3d0] sm:$0xff] }
 0x12e   : > { %v8840_v30 = vpop.xlane.xlu1 %836  ;;  %v8842_v31 = vpop.xlane.xlu0 %833 }
 0x12f   : > { %12230 = vst [vmem:[#allocation15_spill] sm:$0xff] %v8840_v30  ;;  %12231 = vst [vmem:[#allocation16_spill] sm:$0xff] %v8842_v31 }
 0x131   : > { %1040 = vadd.xlane.f32.xlu1 %v1039_v32  ;;  %1037 = vadd.xlane.f32.xlu0 %v1036_v37  ;;  %v669_v32 = vmul.f32 %v8672_v35, %v541_v14  ;;  %v544_v37 = vld [vmem:[#allocation2 + $0x3e8] sm:$0xff] }
 0x132   : > { %v8848_v52 = vpop.xlane.xlu1 %746  ;;  %v8850_v61 = vpop.xlane.xlu0 %743 }
 0x133   : > { %12232 = vst [vmem:[#allocation17_spill] sm:$0xff] %v8848_v52  ;;  %12233 = vst [vmem:[#allocation18_spill] sm:$0xff] %v8850_v61  ;;  %v546_v52 = vld [vmem:[#allocation2 + $0x3f8] sm:$0xff]  ;;  %v545_v61 = vld [vmem:[#allocation2 + $0x3f0] sm:$0xff] }
 0x135   : > { %950 = vadd.xlane.f32.xlu1 %v949_v62  ;;  %947 = vadd.xlane.f32.xlu0 %v946_v63  ;;  %v1042_v62 = vsel %vm675_vm0, %v669_v32, 0.0  ;;  %v672_v63 = vmul.f32 %v8672_v35, %v544_v37 }
 0x136   : > { %v8856_v15 = vpop.xlane.xlu1 %752  ;;  %v8858_v18 = vpop.xlane.xlu0 %749 }
 0x137   : > { %12234 = vst [vmem:[#allocation19_spill] sm:$0xff] %v8856_v15  ;;  %12235 = vst [vmem:[#allocation20_spill] sm:$0xff] %v8858_v18  ;;  %v1051_v14 = vsel %vm675_vm0, %v672_v63, 0.0  ;;  %v6948_v63 = vld [vmem:[%s12054_s2] ss:$0 sm:$0xff] }
 0x139   : > { %956 = vadd.xlane.f32.xlu1 %v955_v23  ;;  %953 = vadd.xlane.f32.xlu0 %v952_v24  ;;  %v1048_v23 = vsel %vm675_vm0, %v671_v1, 0.0 }
 0x13a   : > { %v8864_v41 = vpop.xlane.xlu1 %842  ;;  %v8866_v44 = vpop.xlane.xlu0 %839 }
 0x13b   : > { %12236 = vst [vmem:[#allocation21_spill] sm:$0xff] %v8864_v41  ;;  %12237 = vst [vmem:[#allocation22_spill] sm:$0xff] %v8866_v44 }
 0x13d   : > { %1046 = vadd.xlane.f32.xlu1 %v1045_v49  ;;  %1043 = vadd.xlane.f32.xlu0 %v1042_v62 }
 0x13e   : > { %v8872_v2 = vpop.xlane.xlu1 %848  ;;  %v8874_v9 = vpop.xlane.xlu0 %845 }
 0x13f   : > { %12238 = vst [vmem:[#allocation23_spill] sm:$0xff] %v8872_v2  ;;  %12239 = vst [vmem:[#allocation24_spill] sm:$0xff] %v8874_v9 }
 0x141   : > { %1052 = vadd.xlane.f32.xlu1 %v1051_v14  ;;  %1049 = vadd.xlane.f32.xlu0 %v1048_v23  ;;  %v12066_v23 = vmov 0  }
 0x142   : > { %v8878_v24 = vpop.xlane.xlu1 %758  ;;  %v8880_v25 = vpop.xlane.xlu0 %755  ;;  %7588 = vset.pattern.permute.xlu0 %v12066_v23  ;;  %7587 = vset.pattern.permute.xlu1 %v12066_v23 }
 0x143   : > { %12240 = vst [vmem:[#allocation25_spill] sm:$0xff] %v8878_v24  ;;  %12241 = vst [vmem:[#allocation26_spill] sm:$0xff] %v8880_v25  ;;  %3923 = vmatprep.mubr.bf16.mxu0 %v12066_v23  ;;  %3976 = vmatprep.mubr.bf16.mxu1 %v12066_v23 }
 0x146   : > { %v8882_v32 = vpop.xlane.xlu1 %764  ;;  %v8884_v37 = vpop.xlane.xlu0 %761 }
 0x147   : > { %12242 = vst [vmem:[#allocation27_spill] sm:$0xff] %v8882_v32  ;;  %12243 = vst [vmem:[#allocation28_spill] sm:$0xff] %v8884_v37 }
 0x14a   : > { %v8886_v40 = vpop.xlane.xlu1 %854  ;;  %v8888_v49 = vpop.xlane.xlu0 %851 }
 0x14b   : > { %12244 = vst [vmem:[#allocation29_spill] sm:$0xff] %v8886_v40  ;;  %12245 = vst [vmem:[#allocation30_spill] sm:$0xff] %v8888_v49  ;;  %v514_v40 = vld [vmem:[#allocation2 + $0x2f8] sm:$0xff] }
 0x14e   : > { %v8890_v62 = vpop.xlane.xlu1 %860  ;;  %v8892_v2 = vpop.xlane.xlu0 %857 }
 0x14f   : > { %12246 = vst [vmem:[#allocation31_spill] sm:$0xff] %v8890_v62  ;;  %12247 = vst [vmem:[#allocation32_spill] sm:$0xff] %v8892_v2 }
 0x152   : > { %1071 = vbcast.lane.b32.xlu1 %v6948_v63, 264  ;;  %v8897_v1 = vpop.xlane.xlu1 %770  ;;  %v8899_v14 = vpop.xlane.xlu0 %767 }
 0x153   : > { %12248 = vst [vmem:[#allocation33_spill] sm:$0xff] %v8897_v1  ;;  %12249 = vst [vmem:[#allocation34_spill] sm:$0xff] %v8899_v14  ;;  %v513_v14 = vld [vmem:[#allocation2 + $0x2f0] sm:$0xff] }
 0x156   : > { %v8905_v62 = vpop.xlane.xlu1 %866  ;;  %v8907_v2 = vpop.xlane.xlu0 %863 }
 0x157   : > { %12250 = vst [vmem:[#allocation35_spill] sm:$0xff] %v8905_v62  ;;  %12251 = vst [vmem:[#allocation36_spill] sm:$0xff] %v8907_v2  ;;  %1067 = vbcast.lane.b32.xlu0 %v6948_v63, 256 }
 0x15a   : > { %v8909_v49 = vpop.xlane.xlu1 %872  ;;  %v8911_v32 = vpop.xlane.xlu0 %869 }
 0x15e   : > { %v8913_v1 = vpop.xlane.xlu1 %884  ;;  %v8915_v37 = vpop.xlane.xlu0 %881 }
 0x15f   : > { %12252 = vst [vmem:[#allocation37_spill] sm:$0xff] %v8913_v1  ;;  %12253 = vst [vmem:[#allocation38_spill] sm:$0xff] %v8915_v37  ;;  %v641_v1 = vmul.f32 %v8672_v35, %v513_v14  ;;  %v642_v37 = vmul.f32 %v8672_v35, %v514_v40 }
 0x162   : > { %v8917_v25 = vpop.xlane.xlu1 %968  ;;  %v8919_v9 = vpop.xlane.xlu0 %965 }
 0x166   : > { %v8921_v44 = vpop.xlane.xlu1 %980  ;;  %v8923_v23 = vpop.xlane.xlu0 %977 }
 0x167   : > { %12254 = vst [vmem:[#allocation39_spill] sm:$0xff] %v8921_v44  ;;  %12255 = vst [vmem:[#allocation40_spill] sm:$0xff] %v8923_v23  ;;  %v958_v23 = vsel %vm675_vm0, %v641_v1, 0.0 }
 0x16a   : > { %v8925_v62 = vpop.xlane.xlu1 %878  ;;  %v8927_v2 = vpop.xlane.xlu0 %875 }
 0x16b   : > { %12256 = vst [vmem:[#allocation41_spill] sm:$0xff] %v8925_v62  ;;  %12257 = vst [vmem:[#allocation42_spill] sm:$0xff] %v8927_v2  ;;  %v961_v62 = vsel %vm675_vm0, %v642_v37, 0.0  ;;  %v674_v2 = vmul.f32 %v8672_v35, %v546_v52 }
 0x16d   : > { %v1057_v40 = vsel %vm675_vm0, %v674_v2, 0.0 }
 0x16e   : > { %v8929_v24 = vpop.xlane.xlu1 %890  ;;  %v8931_v41 = vpop.xlane.xlu0 %887 }
 0x16f   : > { %12258 = vst [vmem:[#allocation43_spill] sm:$0xff] %v8929_v24  ;;  %12259 = vst [vmem:[#allocation44_spill] sm:$0xff] %v8931_v41  ;;  %v673_v24 = vmul.f32 %v8672_v35, %v545_v61 }
 0x172   : > { %v8935_v15 = vpop.xlane.xlu1 %896  ;;  %v8937_v44 = vpop.xlane.xlu0 %893 }
 0x173   : > { %12260 = vst [vmem:[#allocation45_spill] sm:$0xff] %v8935_v15  ;;  %12261 = vst [vmem:[#allocation46_spill] sm:$0xff] %v8937_v44  ;;  %v1054_v15 = vsel %vm675_vm0, %v673_v24, 0.0 }
 0x176   : > { %959 = vadd.xlane.f32.xlu1 %v958_v23  ;;  %v8943_v41 = vpop.xlane.xlu1 %974  ;;  %962 = vadd.xlane.f32.xlu0 %v961_v62  ;;  %v8945_v14 = vpop.xlane.xlu0 %971 }
 0x177   : > { %12262 = vst [vmem:[#allocation47_spill] sm:$0xff] %v8943_v41 }
 0x17a   : > { %1058 = vadd.xlane.f32.xlu1 %v1057_v40  ;;  %v8949_v44 = vpop.xlane.xlu1 %986  ;;  %1055 = vadd.xlane.f32.xlu0 %v1054_v15  ;;  %v8951_v1 = vpop.xlane.xlu0 %983 }
 0x17b   : > { %12263 = vst [vmem:[#allocation48_spill] sm:$0xff] %v8949_v44 }
 0x17e   : > { %v8953_v37 = vpop.xlane.xlu1 %992  ;;  %v8955_v52 = vpop.xlane.xlu0 %989 }
 0x182   : > { %v8957_v35 = vpop.xlane.xlu1 %902  ;;  %v8959_v61 = vpop.xlane.xlu0 %899 }
 0x183   : > { %12264 = vst [vmem:[#allocation49_spill] sm:$0xff] %v8957_v35  ;;  %12265 = vst [vmem:[#allocation50_spill] sm:$0xff] %v8959_v61 }
 0x186   : > { %v8961_v62 = vpop.xlane.xlu1 %908  ;;  %v8963_v23 = vpop.xlane.xlu0 %905 }
 0x187   : > { %12266 = vst [vmem:[#allocation51_spill] sm:$0xff] %v8961_v62  ;;  %12267 = vst [vmem:[#allocation52_spill] sm:$0xff] %v8963_v23 }
 0x18a   : > { %v8965_v2 = vpop.xlane.xlu1 %998  ;;  %v8967_v24 = vpop.xlane.xlu0 %995 }
 0x18b   : > { %12268 = vst [vmem:[#allocation53_spill] sm:$0xff] %v8965_v2  ;;  %12269 = vst [vmem:[#allocation54_spill] sm:$0xff] %v8967_v24  ;;  %1079 = vbcast.lane.b32.xlu1 %v6948_v63, 280 }
 0x18e   : > { %v8969_v15 = vpop.xlane.xlu1 %1004  ;;  %v8971_v40 = vpop.xlane.xlu0 %1001 }
 0x190   : > { %1075 = vbcast.lane.b32.xlu0 %v6948_v63, 272 }
 0x192   : > { %v8973_v41 = vpop.xlane.xlu1 %914  ;;  %v8975_v18 = vpop.xlane.xlu0 %911 }
 0x193   : > { %12270 = vst [vmem:[#allocation55_spill] sm:$0xff] %v8973_v41  ;;  %12271 = vst [vmem:[#allocation56_spill] sm:$0xff] %v8975_v18 }
 0x196   : > { %v8977_v35 = vpop.xlane.xlu1 %920  ;;  %v8979_v61 = vpop.xlane.xlu0 %917 }
 0x197   : > { %12272 = vst [vmem:[#allocation57_spill] sm:$0xff] %v8977_v35  ;;  %12273 = vst [vmem:[#allocation58_spill] sm:$0xff] %v8979_v61 }
 0x19a   : > { %v8981_v62 = vpop.xlane.xlu1 %1010  ;;  %v8983_v23 = vpop.xlane.xlu0 %1007 }
 0x19b   : > { %12274 = vst [vmem:[#allocation59_spill] sm:$0xff] %v8981_v62  ;;  %12275 = vst [vmem:[#allocation60_spill] sm:$0xff] %v8983_v23 }
 0x19e   : > { %v8985_v2 = vpop.xlane.xlu1 %1016  ;;  %v8987_v10 = vpop.xlane.xlu0 %1013 }
 0x19f   : > { %12276 = vst [vmem:[#allocation61_spill] sm:$0xff] %v8985_v2  ;;  %12277 = vst [vmem:[#allocation62_spill] sm:$0xff] %v8987_v10 }
 0x1a2   : > { %v8989_v13 = vpop.xlane.xlu1 %926  ;;  %v8991_v24 = vpop.xlane.xlu0 %923 }
 0x1a3   : > { %12278 = vst [vmem:[#allocation63_spill] sm:$0xff] %v8989_v13  ;;  %12279 = vst [vmem:[#allocation64_spill] sm:$0xff] %v8991_v24 }
 0x1a6   : > { %v8993_v63 = vpop.xlane.xlu1 %932  ;;  %v8995_v41 = vpop.xlane.xlu0 %929 }
 0x1a7   : > { %12280 = vst [vmem:[#allocation65_spill] sm:$0xff] %v8993_v63  ;;  %12281 = vst [vmem:[#allocation66_spill] sm:$0xff] %v8995_v41 }
 0x1aa   : > { %v8997_v18 = vpop.xlane.xlu1 %1022  ;;  %v8999_v35 = vpop.xlane.xlu0 %1019 }
 0x1ab   : > { %12282 = vst [vmem:[#allocation67_spill] sm:$0xff] %v8997_v18  ;;  %12283 = vst [vmem:[#allocation68_spill] sm:$0xff] %v8999_v35 }
 0x1ae   : > { %v9001_v61 = vpop.xlane.xlu1 %1028  ;;  %v9003_v62 = vpop.xlane.xlu0 %1025 }
 0x1af   : > { %12284 = vst [vmem:[#allocation69_spill] sm:$0xff] %v9001_v61  ;;  %12285 = vst [vmem:[#allocation70_spill] sm:$0xff] %v9003_v62 }
 0x1b2   : > { %v9005_v23 = vpop.xlane.xlu1 %938  ;;  %v9007_v2 = vpop.xlane.xlu0 %935 }
 0x1b3   : > { %12286 = vst [vmem:[#allocation71_spill] sm:$0xff] %v9005_v23  ;;  %12287 = vst [vmem:[#allocation72_spill] sm:$0xff] %v9007_v2 }
 0x1b6   : > { %v9009_v10 = vpop.xlane.xlu1 %944  ;;  %v9011_v13 = vpop.xlane.xlu0 %941 }
 0x1b7   : > { %12288 = vst [vmem:[#allocation73_spill] sm:$0xff] %v9009_v10  ;;  %12289 = vst [vmem:[#allocation74_spill] sm:$0xff] %v9011_v13 }
 0x1ba   : > { %v9013_v24 = vpop.xlane.xlu1 %1034  ;;  %v9015_v63 = vpop.xlane.xlu0 %1031 }
 0x1bb   : > { %12290 = vst [vmem:[#allocation75_spill] sm:$0xff] %v9013_v24  ;;  %12291 = vst [vmem:[#allocation76_spill] sm:$0xff] %v9015_v63 }
 0x1be   : > { %v9017_v41 = vpop.xlane.xlu1 %1040  ;;  %v9019_v18 = vpop.xlane.xlu0 %1037 }
 0x1bf   : > { %12292 = vst [vmem:[#allocation77_spill] sm:$0xff] %v9017_v41  ;;  %12293 = vst [vmem:[#allocation78_spill] sm:$0xff] %v9019_v18 }
 0x1c2   : > { %v9021_v35 = vpop.xlane.xlu1 %950  ;;  %v9023_v61 = vpop.xlane.xlu0 %947 }
 0x1c3   : > { %12294 = vst [vmem:[#allocation79_spill] sm:$0xff] %v9021_v35  ;;  %12295 = vst [vmem:[#allocation80_spill] sm:$0xff] %v9023_v61 }
 0x1c6   : > { %v9025_v62 = vpop.xlane.xlu1 %956  ;;  %v9027_v23 = vpop.xlane.xlu0 %953 }
 0x1c7   : > { %12296 = vst [vmem:[#allocation81_spill] sm:$0xff] %v9025_v62  ;;  %12297 = vst [vmem:[#allocation82_spill] sm:$0xff] %v9027_v23 }
 0x1ca   : > { %v9029_v2 = vpop.xlane.xlu1 %1046  ;;  %v9031_v10 = vpop.xlane.xlu0 %1043 }
 0x1cb   : > { %12298 = vst [vmem:[#allocation83_spill] sm:$0xff] %v9029_v2  ;;  %12299 = vst [vmem:[#allocation84_spill] sm:$0xff] %v9031_v10 }
 0x1ce   : > { %v9033_v13 = vpop.xlane.xlu1 %1052  ;;  %v9035_v24 = vpop.xlane.xlu0 %1049 }
 0x1cf   : > { %12300 = vst [vmem:[#allocation85_spill] sm:$0xff] %v9033_v13  ;;  %12301 = vst [vmem:[#allocation86_spill] sm:$0xff] %v9035_v24 }
 0x1d2   : > { %v9037_v63 = vpop.permute.xlu1 %1071  ;;  %v9039_v41 = vpop.permute.xlu0 %1067 }
 0x1d3   : > { %v1089_v35 = vadd.f32 %v9039_v41, %v8678_v42  ;;  %v1090_v62 = vadd.f32 %v9037_v63, %v8682_v45  ;;  %v1085_v23 = vadd.f32 %v9039_v41, %v8680_v43  ;;  %v1086_v2 = vadd.f32 %v9037_v63, %v8684_v46 }
 0x1d4   : > { %v1117_v61 = vadd.f32 %v9039_v41, %v8690_v51  ;;  %v1118_v13 = vadd.f32 %v9037_v63, %v8688_v50  ;;  %v1121_v10 = vadd.f32 %v9039_v41, %v8698_v59  ;;  %v1122_v42 = vadd.f32 %v9037_v63, %v8696_v58 }
 0x1d5   : > { %v1217_v24 = vmax.f32 %v1089_v35, 0.0  ;;  %v1218_v45 = vmax.f32 %v1090_v62, 0.0  ;;  %v1213_v18 = vmax.f32 %v1085_v23, 0.0  ;;  %v1214_v44 = vmax.f32 %v1086_v2, 0.0 }
 0x1d6   : > { %v1245_v43 = vmax.f32 %v1117_v61, 0.0  ;;  %v1246_v33 = vmax.f32 %v1118_v13, 0.0  ;;  %v1249_v30 = vmax.f32 %v1121_v10, 0.0  ;;  %v1250_v56 = vmax.f32 %v1122_v42, 0.0 }
 0x1d7   : > { %v2560_v0 = vpack.c.bf16 %v1218_v45, %v1217_v24  ;;  %v2558_v46 = vpack.c.bf16 %v1214_v44, %v1213_v18  ;;  %v9059_v10 = vadd.f32 %v9039_v41, %v8919_v9  ;;  %v1093_v62 = vadd.f32 %v9039_v41, %v8722_v20 }
 0x1d8   : > { %v2574_v53 = vpack.c.bf16 %v1246_v33, %v1245_v43  ;;  %v2576_v21 = vpack.c.bf16 %v1250_v56, %v1249_v30  ;;  %v9077_v9 = vadd.f32 %v9037_v63, %v8953_v37  ;;  %v9081_v20 = vadd.f32 %v9039_v41, %v8971_v40 }
 0x1d9   : > { %v2699_v31 = vunpack.c.l.b16 %v2560_v0  ;;  %v2695_v51 = vunpack.c.l.b16 %v2558_v46  ;;  %v2696_v59 = vunpack.c.h.b16 %v2558_v46  ;;  %v2700_v35 = vunpack.c.h.b16 %v2560_v0 }
 0x1da   : > { %v2728_v50 = vunpack.c.h.b16 %v2574_v53  ;;  %v2732_v58 = vunpack.c.h.b16 %v2576_v21  ;;  %v2727_v61 = vunpack.c.l.b16 %v2574_v53  ;;  %v2731_v13 = vunpack.c.l.b16 %v2576_v21 }
 0x1db   : > { %2836 = vperm.xlu0 %7588, %v2699_v31   ;;  %2824 = vperm.xlu1 %7587, %v2695_v51   ;;  %v9063_v31 = vadd.f32 %v9037_v63, %v8917_v25  ;;  %v1094_v0 = vadd.f32 %v9037_v63, %v8720_v19  ;;  %v12073_v23 = vmax.f32 %v9059_v10, 0.0  ;;  %v9073_v21 = vadd.f32 %v9039_v41, %v8955_v52 }
 0x1dc   : > { %v1221_v25 = vmax.f32 %v1093_v62, 0.0  ;;  %v9085_v19 = vadd.f32 %v9037_v63, %v8969_v15  ;;  %v9087_v42 = vpack.i.bf16 %v1218_v45, %v1217_v24  ;;  %v9089_v46 = vpack.i.bf16 %v1214_v44, %v1213_v18 }
 0x1dd   : > { %v12072_v53 = vmax.f32 %v9063_v31, 0.0  ;;  %v1222_v2 = vmax.f32 %v1094_v0, 0.0  ;;  %v9093_v52 = vadd.f32 %v9039_v41, %v8794_v55  ;;  %v9103_v40 = vadd.f32 %v9037_v63, %v8792_v54 }
 0x1de   : > { %v9107_v24 = vadd.f32 %v9039_v41, %v8911_v32  ;;  %v12071_v18 = vmax.f32 %v9073_v21, 0.0  ;;  %v12068_v44 = vmax.f32 %v9077_v9, 0.0  ;;  %v9117_v45 = vadd.f32 %v9037_v63, %v8909_v49 }
 0x1df   : > { %2923 = vperm.xlu0 %7588, %v2728_v50   ;;  %2827 = vperm.xlu1 %7587, %v2696_v59   ;;  %v9099_v37 = vpack.i.bf16 %v12072_v53, %v12073_v23  ;;  %v12070_v51 = vmax.f32 %v9081_v20, 0.0  ;;  %v12069_v54 = vmax.f32 %v9085_v19, 0.0  ;;  %v9121_v50 = vpack.i.bf16 %v1222_v2, %v1221_v25 }
 0x1e0   : > { %v9123_v32 = vpack.i.bf16 %v1246_v33, %v1245_v43  ;;  %v9125_v59 = vpack.i.bf16 %v1250_v56, %v1249_v30  ;;  %v12075_v62 = vmax.f32 %v9107_v24, 0.0  ;;  %v12074_v33 = vmax.f32 %v9117_v45, 0.0 }
 0x1e1   : > { %v9145_v56 = vpack.i.bf16 %v12069_v54, %v12070_v51 }
 0x1e2   : > { %12302 = vst [vmem:[#allocation87_spill] sm:$0xff] %v9123_v32  ;;  %12303 = vst [vmem:[#allocation88_spill] sm:$0xff] %v9125_v59 }
 0x1e3   : > { %2935 = vperm.xlu0 %7588, %v2732_v58   ;;  %2839 = vperm.xlu1 %7587, %v2700_v35   ;;  %v12077_v58 = vmax.f32 %v9093_v52, 0.0  ;;  %v9132_v35 = vpack.i.bf16 %v12068_v44, %v12071_v18  ;;  %12307 = vst [vmem:[#allocation92_spill] sm:$0xff] %v9145_v56  ;;  %v9161_v44 = vpack.i.bf16 %v12074_v33, %v12075_v62  ;;  %v12352_v56 = vld [vmem:[#allocation14_spill] sm:$0xff] }
 0x1e5   : > { %12304 = vst [vmem:[#allocation89_spill] sm:$0xff] %v9132_v35  ;;  %12311 = vst [vmem:[#allocation96_spill] sm:$0xff] %v9161_v44 }
 0x1e7   : > { %2920 = vperm.xlu1 %7587, %v2727_v61  }
 0x1eb   : > { %2932 = vperm.xlu1 %7587, %v2731_v13   ;;  %v12076_v13 = vmax.f32 %v9103_v40, 0.0 }
 0x1ed   : > { %v9155_v0 = vpack.i.bf16 %v12076_v13, %v12077_v58  ;;  %v2562_v13 = vpack.c.bf16 %v1222_v2, %v1221_v25 }
 0x1ef   : > { %12310 = vst [vmem:[#allocation95_spill] sm:$0xff] %v9155_v0  ;;  %v2704_v2 = vunpack.c.h.b16 %v2562_v13 }
 0x203   : > { %v9111_v55 = vpop.xlane.xlu1 %959  ;;  %v9113_v15 = vpop.xlane.xlu0 %962 }
 0x207   : > { %v9134_v49 = vpop.xlane.xlu1 %1058  ;;  %v9136_v61 = vpop.xlane.xlu0 %1055 }
 0x208   : > { %12305 = vst [vmem:[#allocation90_spill] sm:$0xff] %v9134_v49  ;;  %12306 = vst [vmem:[#allocation91_spill] sm:$0xff] %v9136_v61  ;;  %v9215_v49 = vadd.f32 %v9037_v63, %v8744_v47 }
 0x20a   : > { %12315 = vst [vmem:[#allocation100_spill] sm:$0xff] %v9215_v49  ;;  %v12085_v25 = vmax.f32 %v9215_v49, 0.0 }
 0x20b   : > { %v9147_v30 = vpop.permute.xlu1 %1079  ;;  %v9149_v43 = vpop.permute.xlu0 %1075 }
 0x20c   : > { %12308 = vst [vmem:[#allocation93_spill] sm:$0xff] %v9147_v30  ;;  %12309 = vst [vmem:[#allocation94_spill] sm:$0xff] %v9149_v43  ;;  %v9165_v54 = vadd.f32 %v9149_v43, %v8714_v12  ;;  %v9169_v51 = vadd.f32 %v9147_v30, %v8712_v11  ;;  %v9173_v18 = vadd.f32 %v9149_v43, %v8706_v4 }
 0x20d   : > { %v9177_v53 = vadd.f32 %v9147_v30, %v8704_v3  ;;  %v9181_v23 = vadd.f32 %v9149_v43, %v8738_v36  ;;  %v9185_v12 = vadd.f32 %v9147_v30, %v8736_v34  ;;  %v9189_v11 = vadd.f32 %v9149_v43, %v8730_v28 }
 0x20e   : > { %v9193_v4 = vadd.f32 %v9147_v30, %v8728_v27  ;;  %v12079_v33 = vmax.f32 %v9165_v54, 0.0  ;;  %v12078_v3 = vmax.f32 %v9169_v51, 0.0  ;;  %v12081_v62 = vmax.f32 %v9173_v18, 0.0 }
 0x20f   : > { %12312 = vst [vmem:[#allocation97_spill] sm:$0xff] %v9181_v23  ;;  %12313 = vst [vmem:[#allocation98_spill] sm:$0xff] %v9189_v11  ;;  %v12080_v36 = vmax.f32 %v9177_v53, 0.0  ;;  %v9209_v27 = vadd.f32 %v9039_v41, %v8746_v48  ;;  %v12082_v58 = vmax.f32 %v9181_v23, 0.0  ;;  %v12083_v44 = vmax.f32 %v9185_v12, 0.0  ;;  %v12414_v23 = vld [vmem:[#allocation22_spill] sm:$0xff] }
 0x210   : > { %v2561_v34 = vpack.c.bf16 %v12078_v3, %v12079_v33  ;;  %v12084_v33 = vmax.f32 %v9189_v11, 0.0  ;;  %v12087_v0 = vmax.f32 %v9193_v4, 0.0 }
 0x211   : > { %v2559_v28 = vpack.c.bf16 %v12080_v36, %v12081_v62  ;;  %12314 = vst [vmem:[#allocation99_spill] sm:$0xff] %v9209_v27  ;;  %v12086_v48 = vmax.f32 %v9209_v27, 0.0  ;;  %v2703_v36 = vunpack.c.l.b16 %v2562_v13  ;;  %v2577_v47 = vpack.c.bf16 %v12083_v44, %v12082_v58 }
 0x212   : > { %v2701_v61 = vunpack.c.l.b16 %v2561_v34  ;;  %v2575_v62 = vpack.c.bf16 %v12087_v0, %v12084_v33  ;;  %v9235_v13 = vadd.f32 %v9039_v41, %v8762_v7  ;;  %v9243_v33 = vadd.f32 %v9149_v43, %v8754_v60 }
 0x213   : > { %v2697_v3 = vunpack.c.l.b16 %v2559_v28  ;;  %v2733_v58 = vunpack.c.l.b16 %v2577_v47  ;;  %v9259_v60 = vadd.f32 %v9149_v43, %v8770_v17  ;;  %v9275_v17 = vadd.f32 %v9037_v63, %v8776_v26 }
 0x214   : > { %2842 = vperm.xlu0 %7588, %v2701_v61   ;;  %v2578_v61 = vpack.c.bf16 %v12085_v25, %v12086_v48  ;;  %v2729_v44 = vunpack.c.l.b16 %v2575_v62 }
 0x215   : > { %2830 = vperm.xlu1 %7587, %v2697_v3   ;;  %v9239_v3 = vadd.f32 %v9037_v63, %v8760_v6  ;;  %v12090_v6 = vmax.f32 %v9243_v33, 0.0  ;;  %12317 = vst [vmem:[#allocation102_spill] sm:$0xff] %v9259_v60  ;;  %12320 = vst [vmem:[#allocation105_spill] sm:$0xff] %v9275_v17 }
 0x216   : > { %v2736_v25 = vunpack.c.h.b16 %v2578_v61  ;;  %v2735_v48 = vunpack.c.l.b16 %v2578_v61 }
 0x217   : > { %12316 = vst [vmem:[#allocation101_spill] sm:$0xff] %v9239_v3  ;;  %v12088_v7 = vmax.f32 %v9239_v3, 0.0 }
 0x218   : > { %2851 = vperm.xlu0 %7588, %v2704_v2   ;;  %v12089_v2 = vmax.f32 %v9235_v13, 0.0 }
 0x219   : > { %2848 = vperm.xlu1 %7587, %v2703_v36   ;;  %v9247_v36 = vadd.f32 %v9147_v30, %v8752_v57 }
 0x21a   : > { %v2564_v57 = vpack.c.bf16 %v12088_v7, %v12089_v2  ;;  %v12092_v7 = vmax.f32 %v9259_v60, 0.0  ;;  %v12346_v60 = vld [vmem:[#allocation54_spill] sm:$0xff] }
 0x21b   : > { %v12093_v0 = vmax.f32 %v9247_v36, 0.0 }
 0x21c   : > { %2938 = vperm.xlu0 %7588, %v2733_v58   ;;  %v2698_v58 = vunpack.c.h.b16 %v2559_v28 }
 0x21d   : > { %2926 = vperm.xlu1 %7587, %v2729_v44   ;;  %v2702_v44 = vunpack.c.h.b16 %v2561_v34  ;;  %v2563_v61 = vpack.c.bf16 %v12093_v0, %v12090_v6  ;;  %v2707_v34 = vunpack.c.l.b16 %v2564_v57  ;;  %v2730_v6 = vunpack.c.h.b16 %v2575_v62 }
 0x21f   : > { %v2705_v28 = vunpack.c.l.b16 %v2563_v61 }
 0x220   : > { %2947 = vperm.xlu0 %7588, %v2736_v25   ;;  %v9267_v25 = vadd.f32 %v9147_v30, %v8768_v16  ;;  %v2708_v16 = vunpack.c.h.b16 %v2564_v57 }
 0x221   : > { %2944 = vperm.xlu1 %7587, %v2735_v48   ;;  %v9271_v48 = vadd.f32 %v9039_v41, %v8778_v29  ;;  %v9289_v29 = vadd.f32 %v9149_v43, %v8786_v39 }
 0x222   : > { %12318 = vst [vmem:[#allocation103_spill] sm:$0xff] %v9267_v25  ;;  %v12091_v2 = vmax.f32 %v9267_v25, 0.0  ;;  %v12337_v25 = vld [vmem:[#allocation10_spill] sm:$0xff] }
 0x223   : > { %12319 = vst [vmem:[#allocation104_spill] sm:$0xff] %v9271_v48 }
 0x224   : > { %2845 = vperm.xlu0 %7588, %v2702_v44   ;;  %v12096_v44 = vmax.f32 %v9271_v48, 0.0  ;;  %v9285_v26 = vpack.c.bf16 %v12091_v2, %v12092_v7  ;;  %v12097_v2 = vmax.f32 %v9289_v29, 0.0  ;;  %v12345_v48 = vld [vmem:[#allocation48_spill] sm:$0xff] }
 0x225   : > { %2833 = vperm.xlu1 %7587, %v2698_v58   ;;  %v12095_v58 = vmax.f32 %v9275_v17, 0.0 }
 0x226   : > { %v2737_v57 = vunpack.c.l.b16 %v9285_v26 }
 0x227   : > { %v2580_v62 = vpack.c.bf16 %v12095_v58, %v12096_v44  ;;  %v2706_v44 = vunpack.c.h.b16 %v2563_v61  ;;  %v12342_v61 = vmax.f32 %v9165_v54, 0.0 }
 0x228   : > { %2860 = vperm.xlu0 %7588, %v2707_v34   ;;  %v9293_v34 = vadd.f32 %v9147_v30, %v8784_v38 }
 0x229   : > { %2854 = vperm.xlu1 %7587, %v2705_v28   ;;  %v2734_v28 = vunpack.c.h.b16 %v2577_v47  ;;  %v2740_v39 = vunpack.c.h.b16 %v2580_v62  ;;  %v2739_v0 = vunpack.c.l.b16 %v2580_v62  ;;  %v9314_v47 = vadd.f32 %v9147_v30, %v8800_v5 }
 0x22a   : > { %12321 = vst [vmem:[#allocation106_spill] sm:$0xff] %v9293_v34  ;;  %v12094_v7 = vmax.f32 %v9293_v34, 0.0  ;;  %v9322_v62 = vadd.f32 %v9149_v43, %v8945_v14  ;;  %v12327_v5 = vmax.f32 %v9093_v52, 0.0  ;;  %v9361_v52 = vadd.f32 %v9149_v43, %v12337_v25 }
 0x22b   : > { %12323 = vst [vmem:[#allocation108_spill] sm:$0xff] %v9314_v47  ;;  %v9381_v25 = vadd.f32 %v9147_v30, %v12345_v48 }
 0x22c   : > { %2929 = vperm.xlu0 %7588, %v2730_v6   ;;  %v9306_v38 = vpack.c.bf16 %v12094_v7, %v12097_v2  ;;  %v9310_v6 = vadd.f32 %v9149_v43, %v8802_v8  ;;  %v12325_v8 = vld [vmem:[#allocation8_spill] sm:$0xff]  ;;  %v12328_v7 = vmax.f32 %v9103_v40, 0.0  ;;  %v12331_v2 = vld [vmem:[#allocation11_spill] sm:$0xff]  ;;  %12338 = vst [vmem:[#allocation10_spill] sm:$0xff] %v9361_v52  ;;  %v12339_v40 = vld [vmem:[#allocation9_spill] sm:$0xff] }
 0x22d   : > { %2863 = vperm.xlu1 %7587, %v2708_v16   ;;  %v9318_v16 = vadd.f32 %v9149_v43, %v8951_v1 }
 0x22e   : > { %12322 = vst [vmem:[#allocation107_spill] sm:$0xff] %v9310_v6  ;;  %v2566_v1 = vpack.c.bf16 %v12328_v7, %v12327_v5  ;;  %v2709_v58 = vunpack.c.l.b16 %v9306_v38  ;;  %v12333_v5 = vld [vmem:[#allocation16_spill] sm:$0xff]  ;;  %v12343_v34 = vmax.f32 %v9310_v6, 0.0  ;;  %v12358_v6 = vmax.f32 %v9177_v53, 0.0 }
 0x230   : > { %2950 = vperm.xlu0 %7588, %v2737_v57   ;;  %v9326_v57 = vadd.f32 %v9039_v41, %v8810_v22 }
 0x231   : > { %2941 = vperm.xlu1 %7587, %v2734_v28   ;;  %v9330_v28 = vadd.f32 %v9037_v63, %v12325_v8  ;;  %v9345_v8 = vadd.f32 %v9037_v63, %v12331_v2  ;;  %v2712_v2 = vunpack.c.h.b16 %v2566_v1 }
 0x232   : > { %12324 = vst [vmem:[#allocation109_spill] sm:$0xff] %v9326_v57 }
 0x233   : > { %12326 = vst [vmem:[#allocation8_spill] sm:$0xff] %v9330_v28  ;;  %12332 = vst [vmem:[#allocation11_spill] sm:$0xff] %v9345_v8  ;;  %v12351_v48 = vmax.f32 %v9330_v28, 0.0  ;;  %v12357_v54 = vmax.f32 %v9345_v8, 0.0 }
 0x234   : > { %2959 = vperm.xlu0 %7588, %v2740_v39   ;;  %v12329_v39 = vld [vmem:[#allocation12_spill] sm:$0xff] }
 0x235   : > { %2956 = vperm.xlu1 %7587, %v2739_v0   ;;  %v9341_v22 = vadd.f32 %v9039_v41, %v12329_v39  ;;  %v9353_v0 = vadd.f32 %v9039_v41, %v12333_v5  ;;  %v12335_v39 = vld [vmem:[#allocation15_spill] sm:$0xff]  ;;  %v2711_v5 = vunpack.c.l.b16 %v2566_v1  ;;  %v12347_v1 = vmax.f32 %v9322_v62, 0.0 }
 0x236   : > { %v9357_v14 = vadd.f32 %v9037_v63, %v12335_v39  ;;  %v12344_v39 = vmax.f32 %v9314_v47, 0.0 }
 0x237   : > { %12330 = vst [vmem:[#allocation12_spill] sm:$0xff] %v9341_v22  ;;  %12334 = vst [vmem:[#allocation16_spill] sm:$0xff] %v9353_v0 }
 0x238   : > { %2866 = vperm.xlu0 %7588, %v2709_v58   ;;  %12336 = vst [vmem:[#allocation15_spill] sm:$0xff] %v9357_v14  ;;  %v12341_v58 = vmax.f32 %v9173_v18, 0.0  ;;  %v9377_v17 = vpack.c.bf16 %v12344_v39, %v12343_v34  ;;  %v12350_v34 = vmax.f32 %v9326_v57, 0.0  ;;  %v2738_v18 = vunpack.c.h.b16 %v9285_v26 }
 0x239   : > { %2857 = vperm.xlu1 %7587, %v2706_v44   ;;  %v9365_v44 = vadd.f32 %v9147_v30, %v12339_v40  ;;  %v9385_v40 = vadd.f32 %v9149_v43, %v12346_v60  ;;  %v12356_v26 = vmax.f32 %v9341_v22, 0.0  ;;  %v12364_v22 = vmax.f32 %v9357_v14, 0.0 }
 0x23a   : > { %v9371_v7 = vpack.i.bf16 %v12342_v61, %v12341_v58  ;;  %v12348_v61 = vmax.f32 %v9318_v16, 0.0  ;;  %v2582_v39 = vpack.c.bf16 %v12351_v48, %v12350_v34  ;;  %v12363_v48 = vmax.f32 %v9353_v0, 0.0  ;;  %v12373_v0 = vld [vmem:[#allocation77_spill] sm:$0xff] }
 0x23b   : > { %12340 = vst [vmem:[#allocation9_spill] sm:$0xff] %v9365_v44  ;;  %v2568_v47 = vpack.c.bf16 %v12357_v54, %v12356_v26  ;;  %v12365_v54 = vld [vmem:[#allocation19_spill] sm:$0xff] }
 0x23c   : > { %v9393_v58 = vpack.i.bf16 %v12348_v61, %v12347_v1  ;;  %2875 = vperm.xlu0 %7588, %v2712_v2   ;;  %v9406_v1 = vadd.f32 %v9149_v43, %v12352_v56  ;;  %v2741_v2 = vunpack.c.l.b16 %v9377_v17  ;;  %v12359_v56 = vmax.f32 %v9169_v51, 0.0  ;;  %v12367_v51 = vld [vmem:[#allocation78_spill] sm:$0xff] }
 0x23d   : > { %2872 = vperm.xlu1 %7587, %v2711_v5   ;;  %v12354_v5 = vld [vmem:[#allocation13_spill] sm:$0xff]  ;;  %v2744_v28 = vunpack.c.h.b16 %v2582_v39  ;;  %v2743_v34 = vunpack.c.l.b16 %v2582_v39  ;;  %v9433_v8 = vpack.c.bf16 %v12364_v22, %v12363_v48  ;;  %v9437_v53 = vadd.f32 %v9037_v63, %v12365_v54 }
 0x23e   : > { %12349 = vst [vmem:[#allocation48_spill] sm:$0xff] %v9393_v58  ;;  %12353 = vst [vmem:[#allocation54_spill] sm:$0xff] %v9406_v1  ;;  %v9411_v61 = vadd.f32 %v9147_v30, %v12354_v5  ;;  %v9423_v60 = vpack.i.bf16 %v12359_v56, %v12358_v6  ;;  %v12361_v5 = vld [vmem:[#allocation20_spill] sm:$0xff]  ;;  %v9441_v6 = vadd.f32 %v9039_v41, %v12367_v51  ;;  %v12370_v22 = vmax.f32 %v9381_v25, 0.0 }
 0x23f   : > { %v9427_v57 = vadd.f32 %v9039_v41, %v12361_v5  ;;  %12366 = vst [vmem:[#allocation19_spill] sm:$0xff] %v9437_v53  ;;  %v12371_v48 = vmax.f32 %v9385_v40, 0.0  ;;  %v2716_v54 = vunpack.c.h.b16 %v2568_v47  ;;  %v2715_v51 = vunpack.c.l.b16 %v2568_v47  ;;  %v12383_v47 = vld [vmem:[#allocation25_spill] sm:$0xff] }
 0x240   : > { %12355 = vst [vmem:[#allocation14_spill] sm:$0xff] %v9411_v61  ;;  %12360 = vst [vmem:[#allocation13_spill] sm:$0xff] %v9423_v60  ;;  %2962 = vperm.xlu0 %7588, %v2741_v2   ;;  %v12369_v2 = vmax.f32 %v9365_v44, 0.0  ;;  %v12375_v56 = vmax.f32 %v9289_v29, 0.0  ;;  %v12380_v29 = vmax.f32 %v9411_v61, 0.0  ;;  %v12382_v44 = vld [vmem:[#allocation21_spill] sm:$0xff] }
 0x241   : > { %2953 = vperm.xlu1 %7587, %v2738_v18   ;;  %12362 = vst [vmem:[#allocation20_spill] sm:$0xff] %v9427_v57  ;;  %v12368_v18 = vmax.f32 %v9361_v52, 0.0  ;;  %v9455_v5 = vpack.i.bf16 %v12371_v48, %v12370_v22  ;;  %v12377_v22 = vld [vmem:[#allocation18_spill] sm:$0xff]  ;;  %v12384_v52 = vld [vmem:[#allocation76_spill] sm:$0xff]  ;;  %v12397_v60 = vld [vmem:[#allocation85_spill] sm:$0xff] }
 0x242   : > { %v9471_v48 = vadd.f32 %v9149_v43, %v12377_v22  ;;  %v9487_v22 = vadd.f32 %v9147_v30, %v12382_v44  ;;  %v12389_v61 = vld [vmem:[#allocation34_spill] sm:$0xff] }
 0x243   : > { %v9447_v26 = vpack.c.bf16 %v12369_v2, %v12368_v18  ;;  %12372 = vst [vmem:[#allocation78_spill] sm:$0xff] %v9455_v5  ;;  %v9460_v18 = vadd.f32 %v9037_v63, %v12373_v0  ;;  %v12374_v2 = vmax.f32 %v9247_v36, 0.0  ;;  %v2710_v0 = vunpack.c.h.b16 %v9306_v38 }
 0x244   : > { %2971 = vperm.xlu0 %7588, %v2744_v28   ;;  %12378 = vst [vmem:[#allocation18_spill] sm:$0xff] %v9471_v48  ;;  %v12379_v36 = vmax.f32 %v9406_v1, 0.0  ;;  %v9491_v28 = vadd.f32 %v9147_v30, %v12383_v47  ;;  %v9495_v38 = vadd.f32 %v9149_v43, %v12384_v52  ;;  %v12385_v1 = vmax.f32 %v9193_v4, 0.0  ;;  %v12390_v52 = vld [vmem:[#allocation86_spill] sm:$0xff]  ;;  %v12392_v4 = vld [vmem:[#allocation36_spill] sm:$0xff] }
 0x245   : > { %2968 = vperm.xlu1 %7587, %v2743_v34   ;;  %v9466_v39 = vpack.i.bf16 %v12375_v56, %v12374_v2  ;;  %v2713_v34 = vunpack.c.l.b16 %v9447_v26  ;;  %v12381_v2 = vld [vmem:[#allocation17_spill] sm:$0xff]  ;;  %v9509_v47 = vadd.f32 %v9149_v43, %v12389_v61  ;;  %v9514_v5 = vadd.f32 %v9039_v41, %v12390_v52  ;;  %v12395_v61 = vld [vmem:[#allocation84_spill] sm:$0xff]  ;;  %v12399_v52 = vld [vmem:[#allocation43_spill] sm:$0xff] }
 0x246   : > { %v9481_v56 = vpack.c.bf16 %v12380_v29, %v12379_v36  ;;  %v1108_v14 = vadd.f32 %v9147_v30, %v12381_v2  ;;  %v12386_v36 = vmax.f32 %v9185_v12, 0.0  ;;  %v12388_v2 = vld [vmem:[#allocation29_spill] sm:$0xff]  ;;  %v9518_v12 = vadd.f32 %v9149_v43, %v12392_v4 }
 0x247   : > { %12376 = vst [vmem:[#allocation77_spill] sm:$0xff] %v9466_v39  ;;  %v9505_v44 = vadd.f32 %v9147_v30, %v12388_v2  ;;  %12391 = vst [vmem:[#allocation21_spill] sm:$0xff] %v9514_v5  ;;  %v9530_v2 = vadd.f32 %v9149_v43, %v12395_v61  ;;  %v2742_v39 = vunpack.c.h.b16 %v9377_v17  ;;  %v9536_v4 = vadd.f32 %v9037_v63, %v12397_v60  ;;  %v12400_v60 = vld [vmem:[#allocation41_spill] sm:$0xff]  ;;  %v12403_v17 = vld [vmem:[#allocation79_spill] sm:$0xff] }
 0x248   : > { %v9501_v29 = vpack.i.bf16 %v12386_v36, %v12385_v1  ;;  %2878 = vperm.xlu0 %7588, %v2713_v34   ;;  %v12393_v1 = vld [vmem:[#allocation44_spill] sm:$0xff]  ;;  %v1268_v49 = vmax.f32 %v9487_v22, 0.0  ;;  %v9550_v58 = vadd.f32 %v9147_v30, %v12400_v60  ;;  %v9568_v22 = vadd.f32 %v9149_v43, %v9111_v55 }
 0x249   : > { %2869 = vperm.xlu1 %7587, %v2710_v0   ;;  %v9522_v34 = vadd.f32 %v9149_v43, %v12393_v1  ;;  %v12394_v0 = vld [vmem:[#allocation42_spill] sm:$0xff]  ;;  %12396 = vst [vmem:[#allocation25_spill] sm:$0xff] %v9530_v2  ;;  %12398 = vst [vmem:[#allocation76_spill] sm:$0xff] %v9536_v4  ;;  %v2745_v1 = vunpack.c.l.b16 %v9481_v56  ;;  %v12407_v35 = vmax.f32 %v9495_v38, 0.0  ;;  %v2747_v60 = vunpack.c.l.b16 %v9433_v8 }
 0x24a   : > { %12387 = vst [vmem:[#allocation17_spill] sm:$0xff] %v9501_v29  ;;  %v9526_v36 = vadd.f32 %v9149_v43, %v12394_v0  ;;  %v1236_v29 = vmax.f32 %v1108_v14, 0.0  ;;  %v9546_v14 = vadd.f32 %v9147_v30, %v12399_v52  ;;  %v9562_v52 = vadd.f32 %v9147_v30, %v12403_v17  ;;  %12405 = vst [vmem:[#allocation86_spill] sm:$0xff] %v9568_v22 }
 0x24b   : > { %v9572_v0 = vadd.f32 %v9147_v30, %v9113_v15  ;;  %v12410_v17 = vmax.f32 %v9460_v18, 0.0  ;;  %v12412_v15 = vld [vmem:[#allocation82_spill] sm:$0xff]  ;;  %v12421_v55 = vmax.f32 %v9536_v4, 0.0  ;;  %v12422_v59 = vmax.f32 %v9491_v28, 0.0 }
 0x24c   : > { %2887 = vperm.xlu0 %7588, %v2716_v54   ;;  %12404 = vst [vmem:[#allocation34_spill] sm:$0xff] %v9562_v52  ;;  %v9589_v27 = vadd.f32 %v9039_v41, %v12412_v15  ;;  %v12425_v3 = vmax.f32 %v9509_v47, 0.0 }
 0x24d   : > { %2884 = vperm.xlu1 %7587, %v2715_v51   ;;  %v12401_v51 = vld [vmem:[#allocation80_spill] sm:$0xff]  ;;  %12406 = vst [vmem:[#allocation36_spill] sm:$0xff] %v9572_v0  ;;  %v9582_v32 = vpack.i.bf16 %v1236_v29, %v12410_v17  ;;  %v9609_v15 = vpack.i.bf16 %v12422_v59, %v12421_v55  ;;  %v12428_v59 = vmax.f32 %v9518_v12, 0.0 }
 0x24e   : > { %v9558_v61 = vadd.f32 %v9149_v43, %v12401_v51  ;;  %v12408_v51 = vmax.f32 %v9441_v6, 0.0  ;;  %12413 = vst [vmem:[#allocation84_spill] sm:$0xff] %v9589_v27 }
 0x24f   : > { %12411 = vst [vmem:[#allocation42_spill] sm:$0xff] %v9582_v32  ;;  %12423 = vst [vmem:[#allocation80_spill] sm:$0xff] %v9609_v15 }
 0x250   : > { %12402 = vst [vmem:[#allocation29_spill] sm:$0xff] %v9558_v61  ;;  %v9578_v54 = vpack.i.bf16 %v12408_v51, %v12407_v35  ;;  %2974 = vperm.xlu0 %7588, %v2745_v1   ;;  %v9593_v35 = vadd.f32 %v9149_v43, %v12414_v23  ;;  %v12416_v51 = vld [vmem:[#allocation81_spill] sm:$0xff]  ;;  %v12419_v1 = vmax.f32 %v9514_v5, 0.0  ;;  %v12519_v5 = vld [vmem:[#allocation59_spill] sm:$0xff] }
 0x251   : > { %2965 = vperm.xlu1 %7587, %v2742_v39   ;;  %v9597_v17 = vadd.f32 %v9037_v63, %v12416_v51  ;;  %v12418_v39 = vmax.f32 %v9530_v2, 0.0  ;;  %v9617_v2 = vpack.i.bf16 %v1268_v49, %v12425_v3  ;;  %v12433_v51 = vunpack.c.h.b16 %v9433_v8 }
 0x252   : > { %12409 = vst [vmem:[#allocation44_spill] sm:$0xff] %v9578_v54  ;;  %12415 = vst [vmem:[#allocation85_spill] sm:$0xff] %v9593_v35  ;;  %v12424_v54 = vmax.f32 %v9471_v48, 0.0  ;;  %v12434_v3 = vmax.f32 %v9550_v58, 0.0  ;;  %v12450_v48 = vld [vmem:[#allocation26_spill] sm:$0xff] }
 0x253   : > { %12417 = vst [vmem:[#allocation43_spill] sm:$0xff] %v9597_v17  ;;  %v9603_v32 = vpack.i.bf16 %v12419_v1, %v12418_v39  ;;  %12426 = vst [vmem:[#allocation79_spill] sm:$0xff] %v9617_v2  ;;  %v12435_v1 = vmax.f32 %v9546_v14, 0.0  ;;  %v12437_v2 = vld [vmem:[#allocation24_spill] sm:$0xff]  ;;  %v12125_v8 = vmax.f32 %v9597_v17, 0.0 }
 0x254   : > { %v2569_v23 = vpack.c.bf16 %v1236_v29, %v12424_v54  ;;  %v12430_v29 = vmax.f32 %v9526_v36, 0.0  ;;  %v12431_v54 = vmax.f32 %v9522_v34, 0.0  ;;  %2983 = vperm.xlu0 %7588, %v12433_v51  }
 0x255   : > { %12420 = vst [vmem:[#allocation41_spill] sm:$0xff] %v9603_v32  ;;  %v12427_v32 = vmax.f32 %v9505_v44, 0.0  ;;  %2980 = vperm.xlu1 %7587, %v2747_v60   ;;  %v9639_v39 = vpack.i.bf16 %v12435_v1, %v12434_v3  ;;  %v2714_v60 = vunpack.c.h.b16 %v9447_v26  ;;  %v12442_v1 = vmax.f32 %v9437_v53, 0.0 }
 0x256   : > { %v9631_v11 = vpack.i.bf16 %v12431_v54, %v12430_v29  ;;  %v12123_v29 = vmax.f32 %v9589_v27, 0.0  ;;  %v2717_v51 = vunpack.c.l.b16 %v2569_v23  ;;  %v12441_v54 = vmax.f32 %v9427_v57, 0.0 }
 0x257   : > { %v9625_v55 = vpack.i.bf16 %v12428_v59, %v12427_v32  ;;  %12436 = vst [vmem:[#allocation81_spill] sm:$0xff] %v9639_v39  ;;  %v9643_v32 = vadd.f32 %v9039_v41, %v12437_v2  ;;  %v12439_v59 = vld [vmem:[#allocation23_spill] sm:$0xff]  ;;  %v12126_v39 = vmax.f32 %v9593_v35, 0.0  ;;  %v12443_v2 = vmax.f32 %v9558_v61, 0.0  ;;  %v12526_v61 = vld [vmem:[#allocation64_spill] sm:$0xff] }
 0x258   : > { %12432 = vst [vmem:[#allocation22_spill] sm:$0xff] %v9631_v11  ;;  %v2570_v3 = vpack.c.bf16 %v12442_v1, %v12441_v54  ;;  %v12445_v11 = vmax.f32 %v9562_v52, 0.0  ;;  %v12447_v26 = vmax.f32 %v9568_v22, 0.0  ;;  %v12448_v57 = vmax.f32 %v9572_v0, 0.0  ;;  %2890 = vperm.xlu0 %7588, %v2717_v51   ;;  %v12454_v51 = vld [vmem:[#allocation27_spill] sm:$0xff] }
 0x259   : > { %12429 = vst [vmem:[#allocation82_spill] sm:$0xff] %v9625_v55  ;;  %12438 = vst [vmem:[#allocation24_spill] sm:$0xff] %v9643_v32  ;;  %v9647_v55 = vadd.f32 %v9037_v63, %v12439_v59  ;;  %v9661_v59 = vpack.i.bf16 %v12123_v29, %v12443_v2  ;;  %2881 = vperm.xlu1 %7587, %v2714_v60   ;;  %v12128_v54 = vmax.f32 %v9643_v32, 0.0 }
 0x25a   : > { %v9667_v15 = vpack.i.bf16 %v12445_v11, %v12125_v8  ;;  %v9673_v53 = vpack.i.bf16 %v12448_v57, %v12447_v26  ;;  %v2720_v2 = vunpack.c.h.b16 %v2570_v3  ;;  %v2719_v29 = vunpack.c.l.b16 %v2570_v3  ;;  %v12452_v8 = vld [vmem:[#allocation28_spill] sm:$0xff] }
 0x25b   : > { %12440 = vst [vmem:[#allocation23_spill] sm:$0xff] %v9647_v55  ;;  %12444 = vst [vmem:[#allocation110_spill] sm:$0xff] %v9661_v59  ;;  %v12127_v1 = vmax.f32 %v9647_v55, 0.0  ;;  %v2585_v59 = vpack.c.bf16 %v1268_v49, %v12126_v39  ;;  %v9681_v11 = vadd.f32 %v9149_v43, %v12450_v48  ;;  %v9685_v57 = vadd.f32 %v9039_v41, %v12452_v8  ;;  %v12465_v55 = vld [vmem:[#allocation33_spill] sm:$0xff] }
 0x25c   : > { %12446 = vst [vmem:[#allocation111_spill] sm:$0xff] %v9667_v15  ;;  %12449 = vst [vmem:[#allocation112_spill] sm:$0xff] %v9673_v53  ;;  %2899 = vperm.xlu0 %7588, %v2720_v2   ;;  %v9689_v60 = vadd.f32 %v9037_v63, %v12454_v51  ;;  %v2746_v3 = vunpack.c.h.b16 %v9481_v56  ;;  %v12456_v51 = vmax.f32 %v9491_v28, 0.0  ;;  %v12457_v53 = vld [vmem:[#allocation30_spill] sm:$0xff]  ;;  %v2718_v8 = vunpack.c.h.b16 %v2569_v23 }
 0x25d   : > { %12451 = vst [vmem:[#allocation26_spill] sm:$0xff] %v9681_v11  ;;  %2896 = vperm.xlu1 %7587, %v2719_v29   ;;  %12453 = vst [vmem:[#allocation28_spill] sm:$0xff] %v9685_v57  ;;  %v2749_v26 = vunpack.c.l.b16 %v2585_v59  ;;  %v2586_v49 = vpack.c.bf16 %v12127_v1, %v12128_v54  ;;  %v12129_v48 = vmax.f32 %v9681_v11, 0.0  ;;  %v12132_v29 = vmax.f32 %v9685_v57, 0.0  ;;  %v12459_v1 = vld [vmem:[#allocation32_spill] sm:$0xff]  ;;  %v12504_v57 = vld [vmem:[#allocation53_spill] sm:$0xff] }
 0x25e   : > { %12455 = vst [vmem:[#allocation27_spill] sm:$0xff] %v9689_v60  ;;  %v9705_v15 = vadd.f32 %v9149_v43, %v12457_v53  ;;  %v12463_v28 = vmax.f32 %v9689_v60, 0.0  ;;  %v9728_v32 = vadd.f32 %v9147_v30, %v12465_v55  ;;  %v9909_v11 = vadd.f32 %v9147_v30, %v12504_v57 }
 0x25f   : > { %v2752_v2 = vunpack.c.h.b16 %v2586_v49  ;;  %v2751_v39 = vunpack.c.l.b16 %v2586_v49  ;;  %v2571_v56 = vpack.c.bf16 %v12456_v51, %v12129_v48  ;;  %v12506_v57 = vmax.f32 %v9385_v40, 0.0 }
 0x260   : > { %2986 = vperm.xlu0 %7588, %v2749_v26   ;;  %12458 = vst [vmem:[#allocation30_spill] sm:$0xff] %v9705_v15  ;;  %v9709_v26 = vadd.f32 %v9039_v41, %v12459_v1  ;;  %v2572_v51 = vpack.c.bf16 %v12463_v28, %v12132_v29  ;;  %v12140_v53 = vmax.f32 %v9705_v15, 0.0  ;;  %12466 = vst [vmem:[#allocation33_spill] sm:$0xff] %v9728_v32  ;;  %v2750_v28 = vunpack.c.h.b16 %v2585_v59  ;;  %v12467_v29 = vld [vmem:[#allocation35_spill] sm:$0xff] }
 0x261   : > { %2977 = vperm.xlu1 %7587, %v2746_v3   ;;  %v12461_v3 = vld [vmem:[#allocation31_spill] sm:$0xff]  ;;  %v2721_v49 = vunpack.c.l.b16 %v2571_v56  ;;  %v9737_v15 = vadd.f32 %v9147_v30, %v12467_v29  ;;  %v12512_v40 = vmax.f32 %v9085_v19, 0.0 }
 0x262   : > { %12460 = vst [vmem:[#allocation32_spill] sm:$0xff] %v9709_v26  ;;  %v9713_v54 = vadd.f32 %v9037_v63, %v12461_v3  ;;  %v2723_v48 = vunpack.c.l.b16 %v2572_v51  ;;  %v12464_v3 = vmax.f32 %v9505_v44, 0.0 }
 0x263   : > { %12468 = vst [vmem:[#allocation35_spill] sm:$0xff] %v9737_v15 }
 0x264   : > { %2995 = vperm.xlu0 %7588, %v2752_v2   ;;  %12462 = vst [vmem:[#allocation31_spill] sm:$0xff] %v9713_v54  ;;  %v12134_v1 = vmax.f32 %v9713_v54, 0.0  ;;  %v2724_v2 = vunpack.c.h.b16 %v2572_v51  ;;  %v2587_v23 = vpack.c.bf16 %v12464_v3, %v12140_v53  ;;  %v12136_v51 = vmax.f32 %v9728_v32, 0.0  ;;  %v12489_v54 = vld [vmem:[#allocation47_spill] sm:$0xff] }
 0x265   : > { %2992 = vperm.xlu1 %7587, %v2751_v39   ;;  %v12135_v39 = vmax.f32 %v9709_v26, 0.0  ;;  %v12137_v3 = vmax.f32 %v9737_v15, 0.0  ;;  %v12479_v53 = vmax.f32 %v9059_v10, 0.0  ;;  %v12483_v10 = vld [vmem:[#allocation45_spill] sm:$0xff] }
 0x268   : > { %2902 = vperm.xlu0 %7588, %v2721_v49   ;;  %v2753_v49 = vunpack.c.l.b16 %v2587_v23 }
 0x269   : > { %2893 = vperm.xlu1 %7587, %v2718_v8   ;;  %v2588_v8 = vpack.c.bf16 %v12134_v1, %v12135_v39  ;;  %v2722_v1 = vunpack.c.h.b16 %v2571_v56  ;;  %v12470_v39 = vmax.f32 %v9518_v12, 0.0 }
 0x26b   : > { %v2756_v44 = vunpack.c.h.b16 %v2588_v8  ;;  %v2755_v55 = vunpack.c.l.b16 %v2588_v8  ;;  %v2589_v29 = vpack.c.bf16 %v12137_v3, %v12470_v39  ;;  %v12471_v8 = vld [vmem:[#allocation38_spill] sm:$0xff] }
 0x26c   : > { %2911 = vperm.xlu0 %7588, %v2724_v2   ;;  %v12469_v2 = vmax.f32 %v9509_v47, 0.0  ;;  %v9752_v47 = vadd.f32 %v9039_v41, %v12471_v8 }
 0x26d   : > { %2908 = vperm.xlu1 %7587, %v2723_v48   ;;  %v2758_v39 = vunpack.c.h.b16 %v2589_v29 }
 0x26e   : > { %v2573_v48 = vpack.c.bf16 %v12136_v51, %v12469_v2  ;;  %12472 = vst [vmem:[#allocation38_spill] sm:$0xff] %v9752_v47  ;;  %v2754_v2 = vunpack.c.h.b16 %v2587_v23  ;;  %v12473_v51 = vld [vmem:[#allocation37_spill] sm:$0xff]  ;;  %v12139_v56 = vmax.f32 %v9752_v47, 0.0  ;;  %v7909_v23 = vld [vmem:[%s12055_s3 + $0x44] ss:$16 sps:$4 sm:$0xff]  }
 0x26f   : > { %3891 = vmatprep.subr.bf16.mxu0 %v7909_v23  ;;  %v7919_v23 = vld [vmem:[%s12055_s3 + $0x60] ss:$16 sps:$4 sm:$0xff]  }
 0x270   : > { %2998 = vperm.xlu0 %7588, %v2753_v49   ;;  %v2725_v59 = vunpack.c.l.b16 %v2573_v48  ;;  %v9748_v49 = vpop.permute.xlu1 %2824 }
 0x271   : > { %2989 = vperm.xlu1 %7587, %v2750_v28   ;;  %v2757_v28 = vunpack.c.l.b16 %v2589_v29  ;;  %v7913_v29 = vld [vmem:[%s12055_s3 + $0x40] ss:$16 sps:$4 sm:$0xff]  }
 0x272   : > { %3892 = vmatpush1.bf16.msra.mxu0 %v7913_v29  ;;  %v7920_v29 = vld [vmem:[%s12055_s3 + $0x68] ss:$16 sps:$4 sm:$0xff]  }
 0x274   : > { %3007 = vperm.xlu0 %7588, %v2756_v44   ;;  %v9756_v44 = vadd.f32 %v9037_v63, %v12473_v51  ;;  %v9758_v12 = vpop.permute.xlu1 %2827  ;;  %v7911_v51 = vld [vmem:[%s12055_s3 + $0x4c] ss:$16 sps:$4 sm:$0xff]  }
 0x275   : > { %3004 = vperm.xlu1 %7587, %v2755_v55   ;;  %v2726_v55 = vunpack.c.h.b16 %v2573_v48  ;;  %3944 = vmatprep.subr.bf16.mxu1 %v7911_v51 }
 0x276   : > { %12474 = vst [vmem:[#allocation37_spill] sm:$0xff] %v9756_v44  ;;  %v12138_v3 = vmax.f32 %v9756_v44, 0.0  ;;  %v12480_v44 = vmax.f32 %v9063_v31, 0.0  ;;  %v9826_v31 = vadd.f32 %v9037_v63, %v12483_v10  ;;  %v12488_v10 = vmax.f32 %v9550_v58, 0.0 }
 0x278   : > { %2914 = vperm.xlu0 %7588, %v2725_v59   ;;  %v12476_v59 = vmax.f32 %v9117_v45, 0.0  ;;  %v12477_v45 = vld [vmem:[#allocation40_spill] sm:$0xff]  ;;  %v9801_v51 = vpop.permute.xlu1 %2839  ;;  %v2606_v47 = vpack.c.bf16 %v12480_v44, %v12479_v53 }
 0x279   : > { %2905 = vperm.xlu1 %7587, %v2722_v1   ;;  %v12475_v1 = vmax.f32 %v9107_v24, 0.0  ;;  %v7914_v24 = vld [vmem:[%s12055_s3 + $0x48] ss:$16 sps:$4 sm:$0xff]   ;;  %v9780_v48 = vadd.f32 %v9039_v41, %v12477_v45  ;;  %v7917_v45 = vld [vmem:[%s12055_s3 + $0x6c] ss:$16 sps:$4 sm:$0xff]  }
 0x27a   : > { %3945 = vmatpush1.bf16.msra.mxu1 %v7914_v24  ;;  %v2792_v53 = vunpack.c.h.b16 %v2606_v47 }
 0x27b   : > { %v2590_v8 = vpack.c.bf16 %v12476_v59, %v12475_v1  ;;  %v12145_v24 = vmax.f32 %v9780_v48, 0.0  ;;  %3946 = vmatprep.subr.bf16.mxu1 %v7917_v45  ;;  %v12148_v45 = vmax.f32 %v9826_v31, 0.0 }
 0x27c   : > { %3010 = vperm.xlu0 %7588, %v2757_v28   ;;  %v12478_v28 = vld [vmem:[#allocation39_spill] sm:$0xff] }
 0x27d   : > { %3001 = vperm.xlu1 %7587, %v2754_v2   ;;  %v9784_v2 = vadd.f32 %v9037_v63, %v12478_v28  ;;  %v2760_v1 = vunpack.c.h.b16 %v2590_v8  ;;  %v2759_v59 = vunpack.c.l.b16 %v2590_v8  ;;  %v9799_v8 = vpop.permute.xlu0 %2836  ;;  %12484 = vst [vmem:[#allocation39_spill] sm:$0xff] %v9826_v31 }
 0x27e   : > { %3947 = vmatpush1.bf16.msra.mxu1 %v7920_v29  ;;  %v12485_v29 = vmax.f32 %v9522_v34, 0.0 }
 0x27f   : > { %v12144_v28 = vmax.f32 %v9784_v2, 0.0 }
 0x280   : > { %3013 = vperm.xlu0 %7588, %v2758_v39   ;;  %v2592_v39 = vpack.c.bf16 %v12138_v3, %v12139_v56 }
 0x281   : > { %2917 = vperm.xlu1 %7587, %v2726_v55   ;;  %v7915_v55 = vld [vmem:[%s12055_s3 + $0x64] ss:$16 sps:$4 sm:$0xff]   ;;  %v9812_v15 = vpop.permute.xlu0 %2923 }
 0x282   : > { %3893 = vmatprep.subr.bf16.mxu0 %v7915_v55  ;;  %v2764_v3 = vunpack.c.h.b16 %v2592_v39  ;;  %v2763_v56 = vunpack.c.l.b16 %v2592_v39  ;;  %v12481_v55 = vld [vmem:[#allocation46_spill] sm:$0xff] }
 0x283   : > { %3894 = vmatpush1.bf16.msra.mxu0 %v7919_v23  ;;  %v9822_v39 = vadd.f32 %v9039_v41, %v12481_v55 }
 0x284   : > { %3019 = vperm.xlu0 %7588, %v2760_v1   ;;  %v9814_v1 = vpop.permute.xlu1 %2920 }
 0x285   : > { %3016 = vperm.xlu1 %7587, %v2759_v59   ;;  %v2608_v59 = vpack.c.bf16 %v12144_v28, %v12145_v24  ;;  %12482 = vst [vmem:[#allocation40_spill] sm:$0xff] %v9822_v39  ;;  %v12486_v28 = vmax.f32 %v9546_v14, 0.0  ;;  %v12487_v24 = vmax.f32 %v9526_v36, 0.0 }
 0x287   : > { %v2796_v44 = vunpack.c.h.b16 %v2608_v59  ;;  %v2795_v23 = vunpack.c.l.b16 %v2608_v59  ;;  %v2593_v55 = vpack.c.bf16 %v12486_v28, %v12485_v29  ;;  %v2591_v32 = vpack.c.bf16 %v12488_v10, %v12487_v24 }
 0x288   : > { %3031 = vperm.xlu0 %7588, %v2764_v3   ;;  %v2791_v3 = vunpack.c.l.b16 %v2606_v47  ;;  %v9840_v47 = vadd.f32 %v9147_v30, %v12489_v54  ;;  %v12493_v10 = vmax.f32 %v9322_v62, 0.0 }
 0x289   : > { %3028 = vperm.xlu1 %7587, %v2763_v56   ;;  %v12149_v56 = vmax.f32 %v9822_v39, 0.0  ;;  %v2765_v59 = vunpack.c.l.b16 %v2593_v55  ;;  %v2761_v34 = vunpack.c.l.b16 %v2591_v32  ;;  %v2762_v60 = vunpack.c.h.b16 %v2591_v32 }
 0x28a   : > { %12490 = vst [vmem:[#allocation46_spill] sm:$0xff] %v9840_v47  ;;  %v12151_v58 = vmax.f32 %v9840_v47, 0.0 }
 0x28b   : > { %v2594_v36 = vpack.c.bf16 %v12148_v45, %v12149_v56 }
 0x28c   : > { %3115 = vperm.xlu0 %7588, %v2792_v53   ;;  %v9842_v53 = vpop.permute.xlu0 %2935  ;;  %v2607_v45 = vpack.c.bf16 %v12151_v58, %v12493_v10  ;;  %v12500_v58 = vld [vmem:[#allocation50_spill] sm:$0xff] }
 0x28d   : > { %3112 = vperm.xlu1 %7587, %v2791_v3   ;;  %v9844_v3 = vpop.permute.xlu1 %2932  ;;  %v2768_v54 = vunpack.c.h.b16 %v2594_v36  ;;  %v2767_v28 = vunpack.c.l.b16 %v2594_v36  ;;  %v9881_v39 = vadd.f32 %v9149_v43, %v12500_v58  ;;  %12505 = vst [vmem:[#allocation50_spill] sm:$0xff] %v9909_v11 }
 0x28e   : > { %v2793_v10 = vunpack.c.l.b16 %v2607_v45 }
 0x28f   : > { %v12163_v26 = vmax.f32 %v9881_v39, 0.0 }
 0x290   : > { %3127 = vperm.xlu0 %7588, %v2796_v44   ;;  %v12491_v44 = vmax.f32 %v9318_v16, 0.0  ;;  %v12496_v16 = vld [vmem:[#allocation52_spill] sm:$0xff] }
 0x291   : > { %3124 = vperm.xlu1 %7587, %v2795_v23   ;;  %v12492_v23 = vmax.f32 %v9381_v25, 0.0  ;;  %v9873_v25 = vadd.f32 %v9039_v41, %v12496_v16  ;;  %12501 = vst [vmem:[#allocation52_spill] sm:$0xff] %v9881_v39 }
 0x293   : > { %v9853_v24 = vpop.permute.xlu0 %2842  ;;  %v2609_v29 = vpack.c.bf16 %v12492_v23, %v12491_v44  ;;  %12497 = vst [vmem:[#allocation45_spill] sm:$0xff] %v9873_v25  ;;  %v12498_v44 = vld [vmem:[#allocation51_spill] sm:$0xff] }
 0x294   : > { %v9851_v14 = vpop.permute.xlu1 %2830  ;;  %3034 = vperm.xlu0 %7588, %v2765_v59   ;;  %v12494_v59 = vmax.f32 %v9073_v21, 0.0  ;;  %v9877_v62 = vadd.f32 %v9037_v63, %v12498_v44 }
 0x295   : > { %3022 = vperm.xlu1 %7587, %v2761_v34   ;;  %v12495_v34 = vmax.f32 %v9077_v9, 0.0  ;;  %v2797_v23 = vunpack.c.l.b16 %v2609_v29 }
 0x296   : > { %12499 = vst [vmem:[#allocation47_spill] sm:$0xff] %v9877_v62 }
 0x297   : > { %v9865_v31 = vpop.permute.xlu0 %2851  ;;  %v2610_v36 = vpack.c.bf16 %v12495_v34, %v12494_v59  ;;  %v12162_v59 = vmax.f32 %v9873_v25, 0.0  ;;  %v12160_v34 = vmax.f32 %v9877_v62, 0.0 }
 0x298   : > { %v9863_v56 = vpop.permute.xlu1 %2848  ;;  %3043 = vperm.xlu0 %7588, %v2768_v54   ;;  %v12502_v54 = vld [vmem:[#allocation49_spill] sm:$0xff] }
 0x299   : > { %3040 = vperm.xlu1 %7587, %v2767_v28   ;;  %v9885_v21 = vadd.f32 %v9147_v30, %v12502_v54  ;;  %v2800_v16 = vunpack.c.h.b16 %v2610_v36  ;;  %v2799_v44 = vunpack.c.l.b16 %v2610_v36 }
 0x29b   : > { %12503 = vst [vmem:[#allocation51_spill] sm:$0xff] %v9885_v21  ;;  %v9889_v28 = vpop.permute.xlu0 %2938  ;;  %v12161_v58 = vmax.f32 %v9885_v21, 0.0  ;;  %v12507_v21 = vld [vmem:[#allocation56_spill] sm:$0xff] }
 0x29c   : > { %v9887_v9 = vpop.permute.xlu1 %2926  ;;  %3130 = vperm.xlu0 %7588, %v2797_v23   ;;  %v2596_v23 = vpack.c.bf16 %v12160_v34, %v12162_v59  ;;  %v2794_v59 = vunpack.c.h.b16 %v2607_v45  ;;  %v12511_v45 = vmax.f32 %v9081_v20, 0.0 }
 0x29d   : > { %3118 = vperm.xlu1 %7587, %v2793_v10   ;;  %v2766_v10 = vunpack.c.h.b16 %v2593_v55  ;;  %v2595_v36 = vpack.c.bf16 %v12161_v58, %v12163_v26  ;;  %v12168_v55 = vmax.f32 %v9909_v11, 0.0 }
 0x29e   : > { %v2772_v58 = vunpack.c.h.b16 %v2596_v23 }
 0x29f   : > { %v9897_v54 = vpop.permute.xlu0 %2947  ;;  %v2769_v62 = vunpack.c.l.b16 %v2595_v36  ;;  %v2611_v26 = vpack.c.bf16 %v12168_v55, %v12506_v57  ;;  %v2798_v55 = vunpack.c.h.b16 %v2609_v29  ;;  %v2770_v17 = vunpack.c.h.b16 %v2595_v36 }
 0x2a0   : > { %v9895_v35 = vpop.permute.xlu1 %2944  ;;  %3139 = vperm.xlu0 %7588, %v2800_v16  }
 0x2a1   : > { %3136 = vperm.xlu1 %7587, %v2799_v44   ;;  %v2771_v44 = vunpack.c.l.b16 %v2596_v23  ;;  %v12513_v23 = vld [vmem:[#allocation58_spill] sm:$0xff] }
 0x2a3   : > { %v9913_v16 = vpop.permute.xlu0 %2845 }
 0x2a4   : > { %v9911_v0 = vpop.permute.xlu1 %2833  ;;  %3037 = vperm.xlu0 %7588, %v2766_v10   ;;  %v12509_v10 = vld [vmem:[#allocation55_spill] sm:$0xff] }
 0x2a5   : > { %3025 = vperm.xlu1 %7587, %v2762_v60   ;;  %v9926_v60 = vadd.f32 %v9149_v43, %v12507_v21  ;;  %v9930_v25 = vadd.f32 %v9147_v30, %v12509_v10  ;;  %v12515_v21 = vld [vmem:[#allocation57_spill] sm:$0xff]  ;;  %v2801_v10 = vunpack.c.l.b16 %v2611_v26 }
 0x2a6   : > { %v9946_v57 = vadd.f32 %v9037_v63, %v12515_v21  ;;  %v12517_v21 = vld [vmem:[#allocation60_spill] sm:$0xff] }
 0x2a7   : > { %v9918_v34 = vpop.permute.xlu0 %2860  ;;  %12508 = vst [vmem:[#allocation49_spill] sm:$0xff] %v9926_v60  ;;  %12510 = vst [vmem:[#allocation53_spill] sm:$0xff] %v9930_v25  ;;  %v12173_v11 = vmax.f32 %v9926_v60, 0.0  ;;  %v9964_v4 = vadd.f32 %v9149_v43, %v12517_v21  ;;  %v12524_v21 = vld [vmem:[#allocation61_spill] sm:$0xff] }
 0x2a8   : > { %v9916_v32 = vpop.permute.xlu1 %2854  ;;  %3052 = vperm.xlu0 %7588, %v2771_v44   ;;  %v9942_v44 = vadd.f32 %v9039_v41, %v12513_v23  ;;  %12516 = vst [vmem:[#allocation55_spill] sm:$0xff] %v9946_v57  ;;  %v9984_v60 = vadd.f32 %v9037_v63, %v12524_v21 }
 0x2a9   : > { %3046 = vperm.xlu1 %7587, %v2769_v62   ;;  %v2612_v62 = vpack.c.bf16 %v12512_v40, %v12511_v45  ;;  %v12179_v40 = vmax.f32 %v9946_v57, 0.0  ;;  %12518 = vst [vmem:[#allocation58_spill] sm:$0xff] %v9964_v4  ;;  %v12184_v27 = vmax.f32 %v9964_v4, 0.0 }
 0x2aa   : > { %12514 = vst [vmem:[#allocation56_spill] sm:$0xff] %v9942_v44  ;;  %12525 = vst [vmem:[#allocation59_spill] sm:$0xff] %v9984_v60  ;;  %v12189_v36 = vmax.f32 %v9984_v60, 0.0 }
 0x2ab   : > { %v9934_v22 = vpop.permute.xlu0 %2929  ;;  %v2804_v19 = vunpack.c.h.b16 %v2612_v62  ;;  %v2803_v23 = vunpack.c.l.b16 %v2612_v62  ;;  %v12521_v62 = vmax.f32 %v9942_v44, 0.0 }
 0x2ac   : > { %v9932_v39 = vpop.permute.xlu1 %2863  ;;  %3121 = vperm.xlu0 %7588, %v2794_v59   ;;  %v12172_v59 = vmax.f32 %v9930_v25, 0.0 }
 0x2ad   : > { %3055 = vperm.xlu1 %7587, %v2772_v58  }
 0x2ae   : > { %v9960_v29 = vpack.c.bf16 %v12172_v59, %v12173_v11  ;;  %v2598_v59 = vpack.c.bf16 %v12179_v40, %v12521_v62  ;;  %v12522_v11 = vld [vmem:[#allocation62_spill] sm:$0xff] }
 0x2af   : > { %v9952_v20 = vpop.permute.xlu0 %2950  ;;  %v9980_v25 = vadd.f32 %v9039_v41, %v12522_v11 }
 0x2b0   : > { %v9950_v58 = vpop.permute.xlu1 %2941  ;;  %3142 = vperm.xlu0 %7588, %v2801_v10   ;;  %v9968_v10 = vadd.f32 %v9147_v30, %v12519_v5  ;;  %v2773_v5 = vunpack.c.l.b16 %v9960_v29  ;;  %v2776_v62 = vunpack.c.h.b16 %v2598_v59  ;;  %v2775_v40 = vunpack.c.l.b16 %v2598_v59 }
 0x2b1   : > { %3133 = vperm.xlu1 %7587, %v2798_v55   ;;  %12523 = vst [vmem:[#allocation60_spill] sm:$0xff] %v9980_v25  ;;  %v12190_v11 = vmax.f32 %v9980_v25, 0.0 }
 0x2b2   : > { %12520 = vst [vmem:[#allocation57_spill] sm:$0xff] %v9968_v10 }
 0x2b3   : > { %v9972_v45 = vpop.permute.xlu0 %2959  ;;  %v2614_v59 = vpack.c.bf16 %v12189_v36, %v12190_v11  ;;  %v12532_v36 = vld [vmem:[#allocation66_spill] sm:$0xff] }
 0x2b4   : > { %v9970_v55 = vpop.permute.xlu1 %2956  ;;  %3151 = vperm.xlu0 %7588, %v2804_v19   ;;  %v12183_v19 = vmax.f32 %v9968_v10, 0.0 }
 0x2b5   : > { %3148 = vperm.xlu1 %7587, %v2803_v23   ;;  %v2807_v10 = vunpack.c.l.b16 %v2614_v59 }
 0x2b6   : > { %v9998_v21 = vpack.c.bf16 %v12183_v19, %v12184_v27  ;;  %v2808_v27 = vunpack.c.h.b16 %v2614_v59 }
 0x2b7   : > { %v9991_v44 = vpop.permute.xlu0 %2866 }
 0x2b8   : > { %v9989_v23 = vpop.permute.xlu1 %2857  ;;  %3058 = vperm.xlu0 %7588, %v2773_v5   ;;  %v2802_v5 = vunpack.c.h.b16 %v2611_v26 }
 0x2b9   : > { %3049 = vperm.xlu1 %7587, %v2770_v17   ;;  %v2805_v17 = vunpack.c.l.b16 %v9998_v21 }
 0x2bb   : > { %v10003_v52 = vpop.permute.xlu0 %2875 }
 0x2bc   : > { %v10001_v57 = vpop.permute.xlu1 %2872  ;;  %3067 = vperm.xlu0 %7588, %v2776_v62   ;;  %v10016_v62 = vadd.f32 %v9149_v43, %v12526_v61 }
 0x2bd   : > { %3064 = vperm.xlu1 %7587, %v2775_v40   ;;  %v12528_v40 = vld [vmem:[#allocation63_spill] sm:$0xff] }
 0x2be   : > { %12527 = vst [vmem:[#allocation62_spill] sm:$0xff] %v10016_v62  ;;  %v10020_v26 = vadd.f32 %v9147_v30, %v12528_v40  ;;  %v12193_v61 = vmax.f32 %v10016_v62, 0.0 }
 0x2bf   : > { %v10012_v19 = vpop.permute.xlu0 %2962 }
 0x2c0   : > { %v10010_v4 = vpop.permute.xlu1 %2953  ;;  %3154 = vperm.xlu0 %7588, %v2805_v17   ;;  %12529 = vst [vmem:[#allocation61_spill] sm:$0xff] %v10020_v26  ;;  %v10028_v17 = vadd.f32 %v9039_v41, %v12532_v36  ;;  %v12192_v11 = vmax.f32 %v10020_v26, 0.0  ;;  %v12537_v36 = vmax.f32 %v9780_v48, 0.0  ;;  %v2774_v26 = vunpack.c.h.b16 %v9960_v29 }
 0x2c1   : > { %3145 = vperm.xlu1 %7587, %v2802_v5   ;;  %v12534_v5 = vld [vmem:[#allocation65_spill] sm:$0xff] }
 0x2c2   : > { %12533 = vst [vmem:[#allocation66_spill] sm:$0xff] %v10028_v17  ;;  %v10032_v59 = vadd.f32 %v9037_v63, %v12534_v5  ;;  %v12538_v5 = vmax.f32 %v9784_v2, 0.0  ;;  %v12545_v2 = vmax.f32 %v10028_v17, 0.0 }
 0x2c3   : > { %v10024_v60 = vpop.permute.xlu0 %2971 }
 0x2c4   : > { %v10022_v25 = vpop.permute.xlu1 %2968  ;;  %12531 = vst [vmem:[#allocation63_spill] sm:$0xff] %v10024_v60  ;;  %3163 = vperm.xlu0 %7588, %v2808_v27   ;;  %12535 = vst [vmem:[#allocation65_spill] sm:$0xff] %v10032_v59  ;;  %v7604_v60 = vpack.i.bf16 %v12538_v5, %v12537_v36  ;;  %v12546_v36 = vmax.f32 %v10032_v59, 0.0 }
 0x2c5   : > { %12530 = vst [vmem:[#allocation64_spill] sm:$0xff] %v10022_v25  ;;  %3160 = vperm.xlu1 %7587, %v2807_v10   ;;  %v10052_v25 = vpack.c.bf16 %v12192_v11, %v12193_v61  ;;  %v12547_v11 = vld [vmem:[#allocation70_spill] sm:$0xff]  ;;  %v12549_v61 = vld [vmem:[#allocation69_spill] sm:$0xff] }
 0x2c6   : > { %v2600_v5 = vpack.c.bf16 %v12546_v36, %v12545_v2  ;;  %v1342_v2 = vlaneseq }
 0x2c7   : > { %v10038_v47 = vpop.permute.xlu0 %2878  ;;  %v2777_v62 = vunpack.c.l.b16 %v10052_v25 }
 0x2c8   : > { %v10036_v40 = vpop.permute.xlu1 %2869  ;;  %12536 = vst [vmem:[#allocation113_spill] sm:$0xff] %v10038_v47  ;;  %7595 = vperm.xlu0 %7588, %v9087_v42   ;;  %v12539_v47 = vld [vmem:[#allocation68_spill] sm:$0xff]  ;;  %v2779_v36 = vunpack.c.l.b16 %v2600_v5 }
 0x2c9   : > { %7590 = vperm.xlu1 %7587, %v9089_v46   ;;  %v10056_v42 = vadd.f32 %v9149_v43, %v12539_v47  ;;  %v12541_v46 = vld [vmem:[#allocation67_spill] sm:$0xff]  ;;  %v10073_v47 = vadd.f32 %v9039_v41, %v12547_v11 }
 0x2ca   : > { %v10060_v27 = vadd.f32 %v9147_v30, %v12541_v46  ;;  %v10077_v46 = vadd.f32 %v9037_v63, %v12549_v61  ;;  %v2780_v61 = vunpack.c.h.b16 %v2600_v5  ;;  %v1864_v5 = vand.u32 127, %v1342_v2 }
 0x2cb   : > { %12540 = vst [vmem:[#allocation68_spill] sm:$0xff] %v10056_v42  ;;  %v10064_v48 = vpop.permute.xlu0 %2887  ;;  %12548 = vst [vmem:[#allocation70_spill] sm:$0xff] %v10073_v47 }
 0x2cc   : > { %12542 = vst [vmem:[#allocation67_spill] sm:$0xff] %v10060_v27  ;;  %v10062_v10 = vpop.permute.xlu1 %2884  ;;  %12544 = vst [vmem:[#allocation115_spill] sm:$0xff] %v10064_v48  ;;  %7605 = vperm.xlu0 %7588, %v7604_v60   ;;  %v12199_v60 = vmax.f32 %v10060_v27, 0.0  ;;  %v1869_v27 = vadd.s32 4294967288, %v1864_v5  ;;  %v12559_v48 = vmax.f32 %v10073_v47, 0.0 }
 0x2cd   : > { %12543 = vst [vmem:[#allocation114_spill] sm:$0xff] %v10062_v10  ;;  %7600 = vperm.xlu1 %7587, %v9099_v37   ;;  %12550 = vst [vmem:[#allocation69_spill] sm:$0xff] %v10077_v46  ;;  %v12200_v37 = vmax.f32 %v10056_v42, 0.0  ;;  %v12560_v42 = vmax.f32 %v10077_v46, 0.0 }
 0x2cf   : > { %v10085_v59 = vpop.permute.xlu0 %2974  ;;  %v10092_v29 = vpack.c.bf16 %v12199_v60, %v12200_v37  ;;  %v2806_v60 = vunpack.c.h.b16 %v9998_v21  ;;  %v12564_v21 = vld [vmem:[#allocation72_spill] sm:$0xff] }
 0x2d0   : > { %v10083_v17 = vpop.permute.xlu1 %2965  ;;  %12552 = vst [vmem:[#allocation117_spill] sm:$0xff] %v10085_v59  ;;  %3070 = vperm.xlu0 %7588, %v2777_v62   ;;  %v12555_v59 = vld [vmem:[#allocation74_spill] sm:$0xff]  ;;  %v12557_v62 = vld [vmem:[#allocation73_spill] sm:$0xff] }
 0x2d1   : > { %12551 = vst [vmem:[#allocation116_spill] sm:$0xff] %v10083_v17  ;;  %3061 = vperm.xlu1 %7587, %v2774_v26   ;;  %v10101_v26 = vadd.f32 %v9039_v41, %v12555_v59  ;;  %v10105_v11 = vadd.f32 %v9037_v63, %v12557_v62  ;;  %v2809_v37 = vunpack.c.l.b16 %v10092_v29  ;;  %v12565_v62 = vld [vmem:[#allocation71_spill] sm:$0xff] }
 0x2d2   : > { %v10127_v46 = vadd.f32 %v9147_v30, %v12565_v62 }
 0x2d3   : > { %v10097_v17 = vpop.permute.xlu0 %2983  ;;  %12556 = vst [vmem:[#allocation74_spill] sm:$0xff] %v10101_v26  ;;  %12558 = vst [vmem:[#allocation73_spill] sm:$0xff] %v10105_v11  ;;  %v12569_v62 = vmax.f32 %v10105_v11, 0.0 }
 0x2d4   : > { %v10095_v10 = vpop.permute.xlu1 %2980  ;;  %12554 = vst [vmem:[#allocation119_spill] sm:$0xff] %v10097_v17  ;;  %3079 = vperm.xlu0 %7588, %v2780_v61   ;;  %v2616_v17 = vpack.c.bf16 %v12560_v42, %v12559_v48  ;;  %v10123_v61 = vadd.f32 %v9149_v43, %v12564_v21  ;;  %12566 = vst [vmem:[#allocation72_spill] sm:$0xff] %v10127_v46  ;;  %v1876_v42 = vadd.s32 4294967280, %v1864_v5  ;;  %v12567_v48 = vld [vmem:[#allocation75_spill] sm:$0xff]  ;;  %v12568_v21 = vmax.f32 %v10101_v26, 0.0 }
 0x2d5   : > { %12553 = vst [vmem:[#allocation118_spill] sm:$0xff] %v10095_v10  ;;  %3076 = vperm.xlu1 %7587, %v2779_v36   ;;  %v10119_v36 = vshrl.u32 %v1342_v2, 7  ;;  %v10131_v47 = vadd.f32 %v9147_v30, %v12567_v48  ;;  %v1883_v2 = vadd.s32 4294967272, %v1864_v5  ;;  %v12210_v48 = vmax.f32 %v10127_v46, 0.0  ;;  %v12582_v26 = vld [vmem:[#allocation99_spill] sm:$0xff] }
 0x2d6   : > { %v2811_v59 = vunpack.c.l.b16 %v2616_v17  ;;  %v10144_v43 = vpack.c.bf16 %v12569_v62, %v12568_v21  ;;  %v12570_v30 = vmax.f32 %v9441_v6, 0.0  ;;  %v12576_v6 = vld [vmem:[#allocation101_spill] sm:$0xff] }
 0x2d7   : > { %v10115_v41 = vpop.permute.xlu0 %2890  ;;  %12563 = vst [vmem:[#allocation122_spill] sm:$0xff] %v10119_v36  ;;  %v10134_v63 = vsub.s32 %v1869_v27, %v10119_v36  ;;  %v12211_v27 = vmax.f32 %v10123_v61, 0.0  ;;  %v10158_v21 = vsub.s32 %v1883_v2, %v10119_v36  ;;  %v2778_v2 = vunpack.c.h.b16 %v10052_v25 }
 0x2d8   : > { %v10113_v10 = vpop.permute.xlu1 %2881  ;;  %12562 = vst [vmem:[#allocation121_spill] sm:$0xff] %v10115_v41  ;;  %3166 = vperm.xlu0 %7588, %v2809_v37   ;;  %v12577_v46 = vmax.f32 %v12576_v6, 0.0 }
 0x2d9   : > { %12561 = vst [vmem:[#allocation120_spill] sm:$0xff] %v10113_v10  ;;  %3157 = vperm.xlu1 %7587, %v2806_v60   ;;  %v2812_v60 = vunpack.c.h.b16 %v2616_v17  ;;  %v10147_v10 = vsub.s32 %v1864_v5, %v10119_v36  ;;  %v10152_v17 = vsub.s32 %v1876_v42, %v10119_v36  ;;  %v3214_v11 = vrot.slane %v9758_v12, %v10134_v63 }
 0x2da   : > { %v3233_v5 = vrot.slane %v9801_v51, %v10134_v63  ;;  %v10177_v51 = vpack.c.bf16 %v12210_v48, %v12211_v27  ;;  %v12571_v42 = vmax.f32 %v9460_v18, 0.0  ;;  %v12574_v36 = vmax.f32 %v9243_v33, 0.0  ;;  %v12578_v18 = vld [vmem:[#allocation98_spill] sm:$0xff] }
 0x2db   : > { %v10138_v41 = vpop.permute.xlu0 %2899  ;;  %v3210_v12 = vrot.slane %v9748_v49, %v10147_v10  ;;  %v3229_v49 = vrot.slane %v9799_v8, %v10147_v10  ;;  %v12575_v48 = vmax.f32 %v9235_v13, 0.0  ;;  %v12583_v13 = vmax.f32 %v12582_v26, 0.0 }
 0x2dc   : > { %v10136_v37 = vpop.permute.xlu1 %2896  ;;  %3175 = vperm.xlu0 %7588, %v2812_v60   ;;  %v10183_v62 = vpack.c.bf16 %v12571_v42, %v12570_v30  ;;  %v12579_v30 = vmax.f32 %v12578_v18, 0.0  ;;  %v3381_v26 = vrot.slane %v9844_v3, %v10147_v10  ;;  %v3248_v6 = vrot.slane %v9863_v56, %v10147_v10 }
 0x2dd   : > { %3172 = vperm.xlu1 %7587, %v2811_v59   ;;  %v10197_v27 = vpack.i.bf16 %v12575_v48, %v12574_v36  ;;  %v3215_v8 = vsel %vm1874_vm1, %v3214_v11, %v3210_v12  ;;  %v3234_v48 = vsel %vm1874_vm1, %v3233_v5, %v3229_v49  ;;  %v3224_v11 = vrot.slane %v9911_v0, %v10158_v21  ;;  %v12585_v49 = vld [vmem:[#allocation88_spill] sm:$0xff] }
 0x2de   : > { %v10203_v42 = vpack.i.bf16 %v12579_v30, %v12577_v46  ;;  %v3362_v46 = vrot.slane %v9814_v1, %v10147_v10  ;;  %v3252_v5 = vrot.slane %v9865_v31, %v10134_v63  ;;  %v12584_v1 = vld [vmem:[#allocation87_spill] sm:$0xff]  ;;  %v2810_v0 = vunpack.c.h.b16 %v10092_v29 }
 0x2df   : > { %v10164_v60 = vpop.permute.xlu0 %2986  ;;  %v3390_v18 = vrot.slane %v9889_v28, %v10152_v17  ;;  %v3400_v3 = vrot.slane %v9895_v35, %v10147_v10  ;;  %v3404_v56 = vrot.slane %v9897_v54, %v10134_v63  ;;  %v3366_v31 = vrot.slane %v9812_v15, %v10134_v63 }
 0x2e0   : > { %v10162_v59 = vpop.permute.xlu1 %2977  ;;  %7615 = vperm.xlu0 %7588, %v9121_v50   ;;  %v12573_v50 = vmax.f32 %v10131_v47, 0.0  ;;  %v3385_v30 = vrot.slane %v9842_v53, %v10134_v63  ;;  %v3395_v35 = vrot.slane %v9950_v58, %v10158_v21  ;;  %v2781_v15 = vunpack.c.l.b16 %v10177_v51 }
 0x2e1   : > { %7610 = vperm.xlu1 %7587, %v9371_v7   ;;  %v12572_v7 = vmax.f32 %v9495_v38, 0.0  ;;  %v3219_v38 = vrot.slane %v9851_v14, %v10152_v17  ;;  %v3243_v14 = vrot.slane %v9913_v16, %v10158_v21  ;;  %v3371_v16 = vrot.slane %v9887_v9, %v10152_v17 }
 0x2e2   : > { %v3386_v53 = vsel %vm1874_vm1, %v3385_v30, %v3381_v26  ;;  %v3253_v58 = vsel %vm1874_vm1, %v3252_v5, %v3248_v6  ;;  %v3257_v26 = vrot.slane %v9916_v32, %v10152_v17  ;;  %v3376_v30 = vrot.slane %v9934_v22, %v10158_v21 }
 0x2e3   : > { %v10191_v25 = vpack.c.bf16 %v12573_v50, %v12572_v7  ;;  %v3238_v7 = vrot.slane %v9853_v24, %v10152_v17  ;;  %v12580_v50 = vld [vmem:[#allocation97_spill] sm:$0xff]  ;;  %v10225_v24 = vpop.permute.xlu0 %2995  ;;  %v3271_v6 = vrot.slane %v9932_v39, %v10134_v63  ;;  %v3262_v22 = vrot.slane %v9989_v23, %v10158_v21 }
 0x2e4   : > { %v12581_v33 = vmax.f32 %v12580_v50, 0.0  ;;  %v10223_v12 = vpop.permute.xlu1 %2992  ;;  %7625 = vperm.xlu0 %7588, %v12585_v49   ;;  %v3220_v50 = vsel %vm1881_vm2, %v3219_v38, %v3215_v8  ;;  %v12586_v8 = vld [vmem:[#allocation48_spill] sm:$0xff]  ;;  %v12587_v38 = vld [vmem:[#allocation89_spill] sm:$0xff]  ;;  %v3405_v49 = vsel %vm1874_vm1, %v3404_v56, %v3400_v3  ;;  %v3276_v39 = vrot.slane %v9991_v44, %v10152_v17 }
 0x2e5   : > { %7620 = vperm.xlu1 %7587, %v12584_v1   ;;  %v3225_v9 = vsel %vm1888_vm3, %v3224_v11, %v3220_v50  ;;  %v3367_v1 = vsel %vm1874_vm1, %v3366_v31, %v3362_v46  ;;  %v3267_v31 = vrot.slane %v9918_v34, %v10147_v10  ;;  %v3423_v34 = vrot.slane %v9972_v45, %v10134_v63 }
 0x2e6   : > { %v10214_v36 = vpack.i.bf16 %v12583_v13, %v12581_v33  ;;  %v3239_v33 = vsel %vm1881_vm2, %v3238_v7, %v3234_v48  ;;  %v2815_v7 = vunpack.c.l.b16 %v10183_v62  ;;  %v2816_v48 = vunpack.c.h.b16 %v10183_v62 }
 0x2e7   : > { %v3244_v28 = vsel %vm1888_vm3, %v3243_v14, %v3239_v33  ;;  %v10256_v54 = vpop.permute.xlu0 %2902  ;;  %v3372_v11 = vsel %vm1881_vm2, %v3371_v16, %v3367_v1  ;;  %v3391_v14 = vsel %vm1881_vm2, %v3390_v18, %v3386_v53  ;;  %v3409_v16 = vrot.slane %v9952_v20, %v10152_v17  ;;  %v12588_v33 = vld [vmem:[#allocation113_spill] sm:$0xff] }
 0x2e8   : > { %v10254_v13 = vpop.permute.xlu1 %2893  ;;  %7635 = vperm.xlu0 %7588, %v12587_v38   ;;  %v3815_v46 = vsel %vm2479_vm4, %v3244_v28, %v3225_v9  ;;  %v3396_v5 = vsel %vm1888_vm3, %v3395_v35, %v3391_v14  ;;  %v3419_v18 = vrot.slane %v9970_v55, %v10147_v10  ;;  %v2813_v20 = vunpack.c.l.b16 %v10191_v25 }
 0x2e9   : > { %7630 = vperm.xlu1 %7587, %v12586_v8   ;;  %v3286_v55 = vrot.slane %v10001_v57, %v10147_v10  ;;  %v3290_v56 = vrot.slane %v10003_v52, %v10134_v63  ;;  %v3414_v50 = vrot.slane %v10010_v4, %v10158_v21  ;;  %v3428_v45 = vrot.slane %v10012_v19, %v10152_v17  ;;  %v12589_v4 = vld [vmem:[#allocation116_spill] sm:$0xff] }
 0x2ea   : > { %v3258_v23 = vsel %vm1881_vm2, %v3257_v26, %v3253_v58  ;;  %v3377_v44 = vsel %vm1888_vm3, %v3376_v30, %v3372_v11  ;;  %v3295_v9 = vrot.slane %v12588_v33, %v10152_v17  ;;  %v3272_v57 = vsel %vm1874_vm1, %v3271_v6, %v3267_v31  ;;  %v12593_v31 = vld [vmem:[#allocation64_spill] sm:$0xff]  ;;  %v12594_v6 = vld [vmem:[#allocation63_spill] sm:$0xff] }
 0x2eb   : > { %v10285_v32 = vpop.permute.xlu0 %2911  ;;  %v3822_v52 = vsel %vm2479_vm4, %v3396_v5, %v3377_v44  ;;  %v3410_v28 = vsel %vm1881_vm2, %v3409_v16, %v3405_v49  ;;  %v3433_v35 = vrot.slane %v12589_v4, %v10158_v21  ;;  %v3424_v1 = vsel %vm1874_vm1, %v3423_v34, %v3419_v18  ;;  %v12592_v49 = vld [vmem:[#allocation120_spill] sm:$0xff]  ;;  %v12595_v18 = vld [vmem:[#allocation114_spill] sm:$0xff]  ;;  %v12599_v33 = vld [vmem:[#allocation119_spill] sm:$0xff] }
 0x2ec   : > { %v10283_v3 = vpop.permute.xlu1 %2908  ;;  %3082 = vperm.xlu0 %7588, %v2781_v15   ;;  %v3277_v53 = vsel %vm1881_vm2, %v3276_v39, %v3272_v57  ;;  %v12590_v8 = vunpack.c.l.b16 %v10144_v43  ;;  %v12591_v38 = vunpack.c.h.b16 %v10144_v43  ;;  %v3291_v58 = vsel %vm1874_vm1, %v3290_v56, %v3286_v55  ;;  %v12597_v56 = vld [vmem:[#allocation117_spill] sm:$0xff]  ;;  %v12598_v44 = vld [vmem:[#allocation118_spill] sm:$0xff] }
 0x2ed   : > { %3073 = vperm.xlu1 %7587, %v2778_v2   ;;  %v3281_v2 = vrot.slane %v10036_v40, %v10158_v21  ;;  %v3263_v40 = vsel %vm1888_vm3, %v3262_v22, %v3258_v23  ;;  %v3415_v11 = vsel %vm1888_vm3, %v3414_v50, %v3410_v28  ;;  %v3429_v14 = vsel %vm1881_vm2, %v3428_v45, %v3424_v1  ;;  %v12596_v22 = vld [vmem:[#allocation115_spill] sm:$0xff]  ;;  %v12600_v57 = vld [vmem:[#allocation121_spill] sm:$0xff] }
 0x2ee   : > { %v3300_v26 = vrot.slane %v12592_v49, %v10158_v21  ;;  %v3438_v30 = vrot.slane %v12593_v31, %v10147_v10  ;;  %v3442_v5 = vrot.slane %v12594_v6, %v10134_v63  ;;  %v3296_v43 = vsel %vm1881_vm2, %v3295_v9, %v3291_v58 }
 0x2ef   : > { %v10315_v15 = vpop.permute.xlu0 %2998  ;;  %v3282_v16 = vsel %vm1888_vm3, %v3281_v2, %v3277_v53  ;;  %v3305_v34 = vrot.slane %v12595_v18, %v10147_v10  ;;  %v3309_v39 = vrot.slane %v12596_v22, %v10134_v63  ;;  %v3434_v55 = vsel %vm1888_vm3, %v3433_v35, %v3429_v14  ;;  %v12601_v14 = vld [vmem:[#allocation100_spill] sm:$0xff]  ;;  %v12605_v22 = vld [vmem:[#allocation13_spill] sm:$0xff] }
 0x2f0   : > { %v10313_v19 = vpop.permute.xlu1 %2989  ;;  %3091 = vperm.xlu0 %7588, %v12591_v38   ;;  %v3447_v50 = vrot.slane %v12597_v56, %v10152_v17  ;;  %v3457_v2 = vrot.slane %v12598_v44, %v10147_v10  ;;  %v3461_v9 = vrot.slane %v12599_v33, %v10134_v63  ;;  %v3314_v28 = vrot.slane %v12600_v57, %v10152_v17 }
 0x2f1   : > { %3088 = vperm.xlu1 %7587, %v12590_v8   ;;  %v3816_v4 = vsel %vm2481_vm5, %v3263_v40, %v3815_v46  ;;  %v3301_v35 = vsel %vm1888_vm3, %v3300_v26, %v3296_v43  ;;  %v3324_v1 = vrot.slane %v10136_v37, %v10147_v10  ;;  %v3328_v53 = vrot.slane %v10138_v41, %v10134_v63 }
 0x2f2   : > { %v3823_v8 = vsel %vm2481_vm5, %v3415_v11, %v3822_v52  ;;  %v3443_v38 = vsel %vm1874_vm1, %v3442_v5, %v3438_v30  ;;  %v3817_v58 = vsel %vm2483_vm6, %v3282_v16, %v3816_v4  ;;  %v12602_v29 = vmax.f32 %v12601_v14, 0.0 }
 0x2f3   : > { %v10344_v23 = vpop.permute.xlu0 %3007  ;;  %v3310_v46 = vsel %vm1874_vm1, %v3309_v39, %v3305_v34  ;;  %v3824_v40 = vsel %vm2483_vm6, %v3434_v55, %v3823_v8  ;;  %v3448_v37 = vsel %vm1881_vm2, %v3447_v50, %v3443_v38  ;;  %v3452_v41 = vrot.slane %v10162_v59, %v10158_v21 }
 0x2f4   : > { %v10342_v45 = vpop.permute.xlu1 %3004  ;;  %3178 = vperm.xlu0 %7588, %v2813_v20   ;;  %v3462_v26 = vsel %vm1874_vm1, %v3461_v9, %v3457_v2  ;;  %v3818_v31 = vsel %vm2485_vm7, %v3301_v35, %v3817_v58  ;;  %v3315_v30 = vsel %vm1881_vm2, %v3314_v28, %v3310_v46  ;;  %v3329_v6 = vsel %vm1874_vm1, %v3328_v53, %v3324_v1 }
 0x2f5   : > { %3169 = vperm.xlu1 %7587, %v2810_v0   ;;  %v12603_v0 = vld [vmem:[#allocation46_spill] sm:$0xff]  ;;  %v3466_v59 = vrot.slane %v10164_v60, %v10152_v17  ;;  %v3476_v5 = vrot.slane %v10223_v12, %v10147_v10  ;;  %v3480_v16 = vrot.slane %v10225_v24, %v10134_v63  ;;  %v3319_v43 = vrot.slane %v10254_v13, %v10158_v21 }
 0x2f6   : > { %v12604_v20 = vmax.f32 %v12603_v0, 0.0  ;;  %v3471_v62 = vrot.slane %v10313_v19, %v10158_v21  ;;  %v3453_v60 = vsel %vm1888_vm3, %v3452_v41, %v3448_v37  ;;  %v3343_v12 = vrot.slane %v10283_v3, %v10147_v10 }
 0x2f7   : > { %v2915_v11 = vpop.permute.xlu0 %2914  ;;  %v3347_v24 = vrot.slane %v10285_v32, %v10134_v63  ;;  %v3499_v19 = vrot.slane %v10344_v23, %v10134_v63  ;;  %v3467_v3 = vsel %vm1881_vm2, %v3466_v59, %v3462_v26  ;;  %v3481_v32 = vsel %vm1874_vm1, %v3480_v16, %v3476_v5  ;;  %v12609_v26 = vld [vmem:[#allocation34_spill] sm:$0xff]  ;;  %v12613_v5 = vld [vmem:[#allocation43_spill] sm:$0xff] }
 0x2f8   : > { %v10367_v49 = vpack.i.bf16 %v12604_v20, %v12602_v29  ;;  %v2906_v52 = vpop.permute.xlu1 %2905  ;;  %3187 = vperm.xlu0 %7588, %v2816_v48   ;;  %v3485_v48 = vrot.slane %v10315_v15, %v10152_v17  ;;  %v3352_v39 = vrot.slane %v2915_v11, %v10152_v17  ;;  %v3320_v56 = vsel %vm1888_vm3, %v3319_v43, %v3315_v30 }
 0x2f9   : > { %3184 = vperm.xlu1 %7587, %v2815_v7   ;;  %v3333_v7 = vrot.slane %v10256_v54, %v10152_v17  ;;  %v3338_v18 = vrot.slane %v2906_v52, %v10158_v21  ;;  %v3495_v54 = vrot.slane %v10342_v45, %v10147_v10  ;;  %v3472_v45 = vsel %vm1888_vm3, %v3471_v62, %v3467_v3  ;;  %v12607_v52 = vld [vmem:[#allocation29_spill] sm:$0xff] }
 0x2fa   : > { %v3486_v23 = vsel %vm1881_vm2, %v3485_v48, %v3481_v32  ;;  %v3825_v44 = vsel %vm2485_vm7, %v3453_v60, %v3824_v40  ;;  %v3819_v1 = vsel %vm2487_vm8, %v3320_v56, %v3818_v31  ;;  %v12606_v40 = vld [vmem:[#allocation78_spill] sm:$0xff]  ;;  %v2782_v41 = vunpack.c.h.b16 %v10177_v51  ;;  %v12618_v51 = vld [vmem:[#allocation92_spill] sm:$0xff] }
 0x2fb   : > { %v3011_v34 = vpop.permute.xlu0 %3010  ;;  %v3334_v50 = vsel %vm1881_vm2, %v3333_v7, %v3329_v6  ;;  %v3500_v28 = vsel %vm1874_vm1, %v3499_v19, %v3495_v54  ;;  %v3826_v53 = vsel %vm2487_vm8, %v3472_v45, %v3825_v44  ;;  %v12608_v11 = vmax.f32 %v12607_v52, 0.0  ;;  %v12611_v6 = vld [vmem:[#allocation84_spill] sm:$0xff]  ;;  %v12616_v7 = vld [vmem:[#allocation93_spill] sm:$0xff]  ;;  %v12636_v52 = vld [vmem:[#allocation91_spill] sm:$0xff] }
 0x2fc   : > { %v3002_v13 = vpop.permute.xlu1 %3001  ;;  %7645 = vperm.xlu0 %7588, %v10197_v27   ;;  %v3504_v55 = vrot.slane %v3011_v34, %v10152_v17  ;;  %v3348_v27 = vsel %vm1874_vm1, %v3347_v24, %v3343_v12  ;;  %v3339_v2 = vsel %vm1888_vm3, %v3338_v18, %v3334_v50  ;;  %v12610_v31 = vmax.f32 %v12609_v26, 0.0  ;;  %v12623_v56 = vld [vmem:[#allocation76_spill] sm:$0xff] }
 0x2fd   : > { %v3490_v15 = vrot.slane %v3002_v13, %v10158_v21  ;;  %7640 = vperm.xlu1 %7587, %v12605_v22   ;;  %v3353_v8 = vsel %vm1881_vm2, %v3352_v39, %v3348_v27  ;;  %v3820_v58 = vsel %vm2489_vm9, %v3339_v2, %v3819_v1  ;;  %v12612_v59 = vmax.f32 %v12611_v6, 0.0  ;;  %v12619_v22 = vld [vmem:[#allocation25_spill] sm:$0xff] }
 0x2fe   : > { %v3505_v38 = vsel %vm1881_vm2, %v3504_v55, %v3500_v28  ;;  %v2603_v30 = vpack.c.bf16 %v12610_v31, %v12608_v11  ;;  %v12614_v16 = vmax.f32 %v12613_v5, 0.0  ;;  %v12617_v12 = vmov 0   ;;  %v12621_v39 = vld [vmem:[#allocation21_spill] sm:$0xff]  ;;  %v12637_v11 = vld [vmem:[#allocation94_spill] sm:$0xff] }
 0x2ff   : > { %v3491_v33 = vsel %vm1888_vm3, %v3490_v15, %v3486_v23  ;;  %v3014_v57 = vpop.permute.xlu0 %3013  ;;  %v2814_v15 = vunpack.c.h.b16 %v10191_v25  ;;  %v12620_v3 = vmax.f32 %v12619_v22, 0.0  ;;  %v12622_v55 = vmax.f32 %v12621_v39, 0.0  ;;  %v12638_v31 = vld [vmem:[#allocation90_spill] sm:$0xff] }
 0x300   : > { %v2918_v9 = vpop.permute.xlu1 %2917  ;;  %v3509_v35 = vrot.slane %v3014_v57, %v10158_v21  ;;  %7655 = vperm.xlu0 %7588, %v10214_v36   ;;  %v3827_v14 = vsel %vm2489_vm9, %v3491_v33, %v3826_v53  ;;  %v2604_v43 = vpack.c.bf16 %v12614_v16, %v12612_v59  ;;  %v2785_v24 = vunpack.c.l.b16 %v2603_v30  ;;  %v12626_v53 = vld [vmem:[#allocation95_spill] sm:$0xff]  ;;  %v12639_v16 = vld [vmem:[#allocation58_spill] sm:$0xff] }
 0x301   : > { %v3357_v4 = vrot.slane %v2918_v9, %v10158_v21  ;;  %7650 = vperm.xlu1 %7587, %v10203_v42   ;;  %v12624_v50 = vmax.f32 %v12623_v56, 0.0  ;;  %v10507_v26 = vadd.f32 %v12637_v11, %v12636_v52  ;;  %v10511_v6 = vadd.f32 %v12616_v7, %v12638_v31  ;;  %v12647_v39 = vld [vmem:[#allocation86_spill] sm:$0xff]  ;;  %v12655_v52 = vld [vmem:[#allocation11_spill] sm:$0xff] }
 0x302   : > { %v3510_v0 = vsel %vm1888_vm3, %v3509_v35, %v3505_v38  ;;  %v2787_v18 = vunpack.c.l.b16 %v2604_v43  ;;  %v2788_v19 = vunpack.c.h.b16 %v2604_v43  ;;  %v12628_v38 = vld [vmem:[#allocation102_spill] sm:$0xff]  ;;  %v12640_v43 = vmax.f32 %v12639_v16, 0.0  ;;  %v12657_v31 = vld [vmem:[#allocation103_spill] sm:$0xff] }
 0x303   : > { %v3358_v29 = vsel %vm1888_vm3, %v3357_v4, %v3353_v8  ;;  %v10436_v36 = vpop.permute.xlu0 %3019  ;;  %v3828_v46 = vsel %vm2491_vm10, %v3510_v0, %v3827_v14  ;;  %v2620_v45 = vpack.c.bf16 %v12624_v50, %v12622_v55  ;;  %v12625_v4 = vld [vmem:[#allocation77_spill] sm:$0xff]  ;;  %v12630_v14 = vld [vmem:[#allocation104_spill] sm:$0xff]  ;;  %v12648_v55 = vmax.f32 %v12647_v39, 0.0 }
 0x304   : > { %v10434_v42 = vpop.permute.xlu1 %3016  ;;  %v3821_v20 = vsel %vm2491_vm10, %v3358_v29, %v3820_v58  ;;  %7665 = vperm.xlu0 %7588, %v12606_v40   ;;  %v12627_v8 = vld [vmem:[#allocation17_spill] sm:$0xff]  ;;  %v12629_v58 = vmax.f32 %v12628_v38, 0.0  ;;  %v12631_v29 = vmax.f32 %v12630_v14, 0.0  ;;  %v12634_v40 = vld [vmem:[#allocation50_spill] sm:$0xff]  ;;  %v12656_v11 = vmax.f32 %v12655_v52, 0.0 }
 0x305   : > { %7660 = vperm.xlu1 %7587, %v10367_v49   ;;  %v3843_v37 = vpack.c.b16 %v3828_v46, %v3821_v20  ;;  %v12615_v49 = vld [vmem:[#allocation83_spill] sm:$0xff]  ;;  %v2819_v2 = vunpack.c.l.b16 %v2620_v45  ;;  %v2820_v9 = vunpack.c.h.b16 %v2620_v45  ;;  %v12632_v20 = vld [vmem:[#allocation105_spill] sm:$0xff]  ;;  %v1339_v45 = vmax.f32 %v10507_v26, 0.0 }
 0x306   : > { %v10455_v62 = vadd.f32 %v12616_v7, %v12615_v49  ;;  %v7689_v0 = vpack.i.bf16 %v12631_v29, %v12629_v58  ;;  %v12633_v46 = vmax.f32 %v12632_v20, 0.0  ;;  %v12641_v49 = vld [vmem:[#allocation60_spill] sm:$0xff]  ;;  %v12658_v16 = vmax.f32 %v12657_v31, 0.0  ;;  %v12665_v39 = vld [vmem:[#allocation57_spill] sm:$0xff] }
 0x307   : > { %6965 = vmatmul.mubr.msk.bf16.vlgmr.msra.gmra.mrb[0].mxu0 %vm675_vm0, %v3843_v37  ;;  %6967 = vmatmul.mubr.msk.bf16.vlgmr.msra.gmra.mrb[0].mxu1 %vm675_vm0, %v3843_v37  ;;  %v10459_v60 = vpop.permute.xlu0 %3031  ;;  %v12635_v37 = vmax.f32 %v12634_v40, 0.0  ;;  %v12649_v7 = vld [vmem:[#allocation36_spill] sm:$0xff] }
 0x308   : > { %v10457_v48 = vpop.permute.xlu1 %3028  ;;  %3933 = vmatprep.mubr.bf16.mxu0 %v12617_v12  ;;  %3986 = vmatprep.mubr.bf16.mxu1 %v12617_v12  ;;  %v1336_v13 = vmax.f32 %v10455_v62, 0.0  ;;  %v12650_v56 = vmax.f32 %v12649_v7, 0.0  ;;  %v12653_v40 = vld [vmem:[#allocation12_spill] sm:$0xff] }
 0x309   : > { %7670 = vperm.xlu1 %7587, %v12618_v51   ;;  %3085 = vperm.xlu0 %7588, %v2782_v41   ;;  %v7694_v41 = vpack.i.bf16 %v12635_v37, %v12633_v46  ;;  %v12642_v51 = vmax.f32 %v12641_v49, 0.0  ;;  %v12654_v37 = vmax.f32 %v12653_v40, 0.0  ;;  %v12671_v40 = vld [vmem:[#allocation69_spill] sm:$0xff] }
 0x30a   : > { %v2619_v32 = vpack.c.bf16 %v1336_v13, %v12620_v3  ;;  %v2605_v50 = vpack.c.bf16 %v12650_v56, %v12648_v55  ;;  %v12666_v55 = vmax.f32 %v12665_v39, 0.0 }
 0x30b   : > { %v10467_v54 = vpop.permute.xlu0 %3115 }
 0x30c   : > { %v10465_v34 = vpop.permute.xlu1 %3112  ;;  %v2817_v27 = vunpack.c.l.b16 %v2619_v32  ;;  %v2818_v14 = vunpack.c.h.b16 %v2619_v32 }
 0x30d   : > { %3094 = vperm.xlu1 %7587, %v2785_v24   ;;  %3100 = vperm.xlu0 %7588, %v2787_v18   ;;  %v7699_v24 = vpack.i.bf16 %v12642_v51, %v12640_v43  ;;  %v12643_v18 = vld [vmem:[#allocation59_spill] sm:$0xff]  ;;  %v7714_v43 = vpack.i.bf16 %v12658_v16, %v12656_v11 }
 0x30e   : > { %v12659_v51 = vld [vmem:[#allocation107_spill] sm:$0xff] }
 0x30f   : > { %v10480_v44 = vpop.permute.xlu0 %3127 }
 0x310   : > { %v10478_v23 = vpop.permute.xlu1 %3124 }
 0x311   : > { %3103 = vperm.xlu1 %7587, %v2788_v19   ;;  %3181 = vperm.xlu0 %7588, %v2814_v15   ;;  %v12644_v19 = vmax.f32 %v12643_v18, 0.0  ;;  %v12645_v15 = vld [vmem:[#allocation106_spill] sm:$0xff]  ;;  %v12661_v18 = vld [vmem:[#allocation109_spill] sm:$0xff] }
 0x312   : > { %v12646_v22 = vmax.f32 %v12645_v15, 0.0 }
 0x313   : > { %v10484_v25 = vpop.permute.xlu0 %3034 }
 0x314   : > { %v10482_v33 = vpop.permute.xlu1 %3022  ;;  %v7704_v3 = vpack.i.bf16 %v12646_v22, %v12644_v19  ;;  %v12662_v19 = vmax.f32 %v12661_v18, 0.0  ;;  %v12663_v22 = vld [vmem:[#allocation8_spill] sm:$0xff] }
 0x315   : > { %3190 = vperm.xlu1 %7587, %v2817_v27   ;;  %3196 = vperm.xlu0 %7588, %v2819_v2   ;;  %v1340_v27 = vmax.f32 %v10511_v6, 0.0 }
 0x317   : > { %v10488_v28 = vpop.permute.xlu0 %3043 }
 0x318   : > { %v10486_v57 = vpop.permute.xlu1 %3040 }
 0x319   : > { %3199 = vperm.xlu1 %7587, %v2820_v9   ;;  %7675 = vperm.xlu0 %7588, %v12625_v4   ;;  %v2786_v4 = vunpack.c.h.b16 %v2603_v30  ;;  %v12651_v30 = vld [vmem:[#allocation10_spill] sm:$0xff] }
 0x31a   : > { %v12652_v46 = vmax.f32 %v12651_v30, 0.0 }
 0x31b   : > { %v10493_v1 = vpop.permute.xlu0 %3130 }
 0x31c   : > { %v10491_v35 = vpop.permute.xlu1 %3118 }
 0x31d   : > { %7680 = vperm.xlu1 %7587, %v12626_v53   ;;  %7685 = vperm.xlu0 %7588, %v12627_v8   ;;  %v2789_v53 = vunpack.c.l.b16 %v2605_v50  ;;  %v2621_v8 = vpack.c.bf16 %v1340_v27, %v1339_v45 }
 0x31f   : > { %v10515_v5 = vpop.permute.xlu0 %3139  ;;  %v2821_v29 = vunpack.c.l.b16 %v2621_v8 }
 0x320   : > { %v10513_v59 = vpop.permute.xlu1 %3136 }
 0x321   : > { %7690 = vperm.xlu1 %7587, %v7689_v0   ;;  %7695 = vperm.xlu0 %7588, %v7694_v41   ;;  %v7709_v41 = vpack.i.bf16 %v12654_v37, %v12652_v46  ;;  %v12672_v37 = vmax.f32 %v12671_v40, 0.0  ;;  %v12685_v40 = vld [vmem:[#allocation16_spill] sm:$0xff] }
 0x323   : > { %v10533_v9 = vpop.permute.xlu0 %3037 }
 0x324   : > { %v10531_v2 = vpop.permute.xlu1 %3025 }
 0x325   : > { %7700 = vperm.xlu1 %7587, %v7699_v24   ;;  %7705 = vperm.xlu0 %7588, %v7704_v3   ;;  %v12660_v24 = vmax.f32 %v12659_v51, 0.0  ;;  %v12664_v3 = vmax.f32 %v12663_v22, 0.0  ;;  %v2822_v51 = vunpack.c.h.b16 %v2621_v8  ;;  %v12677_v22 = vld [vmem:[#allocation20_spill] sm:$0xff] }
 0x327   : > { %v10541_v58 = vpop.permute.xlu0 %3052  ;;  %v7719_v15 = vpack.i.bf16 %v12662_v19, %v12660_v24  ;;  %v7724_v7 = vpack.i.bf16 %v12666_v55, %v12664_v3  ;;  %v12675_v19 = vld [vmem:[#allocation18_spill] sm:$0xff]  ;;  %v12678_v3 = vmax.f32 %v12677_v22, 0.0  ;;  %v12679_v55 = vld [vmem:[#allocation19_spill] sm:$0xff] }
 0x328   : > { %v10539_v38 = vpop.permute.xlu1 %3046 }
 0x329   : > { %3097 = vperm.xlu1 %7587, %v2786_v4   ;;  %3106 = vperm.xlu0 %7588, %v2789_v53   ;;  %v12667_v53 = vld [vmem:[#allocation68_spill] sm:$0xff] }
 0x32b   : > { %v10545_v20 = vpop.permute.xlu0 %3121 }
 0x32c   : > { %v10543_v0 = vpop.permute.xlu1 %3055 }
 0x32d   : > { %3193 = vperm.xlu1 %7587, %v2818_v14   ;;  %3202 = vperm.xlu0 %7588, %v2821_v29   ;;  %v12668_v14 = vmax.f32 %v12667_v53, 0.0  ;;  %v12669_v29 = vld [vmem:[#allocation70_spill] sm:$0xff]  ;;  %v12681_v53 = vld [vmem:[#allocation108_spill] sm:$0xff] }
 0x32e   : > { %v12670_v30 = vmax.f32 %v12669_v29, 0.0 }
 0x32f   : > { %v10557_v32 = vpop.permute.xlu0 %3142 }
 0x330   : > { %v10555_v49 = vpop.permute.xlu1 %3133  ;;  %v7729_v46 = vpack.i.bf16 %v12670_v30, %v12668_v14  ;;  %v12682_v14 = vmax.f32 %v12681_v53, 0.0  ;;  %v12693_v53 = vld [vmem:[#allocation26_spill] sm:$0xff] }
 0x331   : > { %7710 = vperm.xlu1 %7587, %v7709_v41   ;;  %7715 = vperm.xlu0 %7588, %v7714_v43   ;;  %v12673_v41 = vld [vmem:[#allocation9_spill] sm:$0xff]  ;;  %v2790_v43 = vunpack.c.h.b16 %v2605_v50  ;;  %v12683_v50 = vld [vmem:[#allocation54_spill] sm:$0xff] }
 0x332   : > { %v12674_v52 = vmax.f32 %v12673_v41, 0.0  ;;  %v12684_v8 = vmax.f32 %v12683_v50, 0.0 }
 0x333   : > { %v10569_v4 = vpop.permute.xlu0 %3151 }
 0x334   : > { %v10567_v56 = vpop.permute.xlu1 %3148  ;;  %v7734_v11 = vpack.i.bf16 %v12674_v52, %v12672_v37  ;;  %v12686_v37 = vmax.f32 %v12685_v40, 0.0  ;;  %v12687_v52 = vld [vmem:[#allocation15_spill] sm:$0xff] }
 0x335   : > { %7720 = vperm.xlu1 %7587, %v7719_v15   ;;  %7725 = vperm.xlu0 %7588, %v7724_v7   ;;  %v12676_v15 = vmax.f32 %v12675_v19, 0.0  ;;  %v12680_v7 = vmax.f32 %v12679_v55, 0.0  ;;  %v12691_v55 = vld [vmem:[#allocation44_spill] sm:$0xff]  ;;  %v12697_v40 = vld [vmem:[#allocation27_spill] sm:$0xff] }
 0x336   : > { %v7749_v41 = vpack.i.bf16 %v12686_v37, %v12684_v8  ;;  %v12698_v37 = vmax.f32 %v12697_v40, 0.0  ;;  %v3666_v40 = vrot.slane %v10465_v34, %v10147_v10  ;;  %v3708_v34 = vrot.slane %v10515_v5, %v10134_v63 }
 0x337   : > { %v10581_v16 = vpop.permute.xlu0 %3058  ;;  %v7739_v39 = vpack.i.bf16 %v12678_v3, %v12676_v15  ;;  %v7744_v29 = vpack.i.bf16 %v12682_v14, %v12680_v7  ;;  %v12692_v7 = vld [vmem:[#allocation42_spill] sm:$0xff]  ;;  %v12694_v14 = vmax.f32 %v12693_v53, 0.0 }
 0x338   : > { %v10579_v31 = vpop.permute.xlu1 %3049 }
 0x339   : > { %7730 = vperm.xlu1 %7587, %v7729_v46   ;;  %7735 = vperm.xlu0 %7588, %v7734_v11   ;;  %v12688_v11 = vmax.f32 %v12687_v52, 0.0  ;;  %v12699_v52 = vld [vmem:[#allocation14_spill] sm:$0xff] }
 0x33b   : > { %v10585_v18 = vpop.permute.xlu0 %3067 }
 0x33c   : > { %v10583_v24 = vpop.permute.xlu1 %3064 }
 0x33d   : > { %3109 = vperm.xlu1 %7587, %v2790_v43   ;;  %3205 = vperm.xlu0 %7588, %v2822_v51   ;;  %v12689_v43 = vld [vmem:[#allocation67_spill] sm:$0xff] }
 0x33e   : > { %v12690_v51 = vmax.f32 %v12689_v43, 0.0 }
 0x33f   : > { %v10595_v46 = vpop.permute.xlu0 %3154 }
 0x340   : > { %v3146_v30 = vpop.permute.xlu1 %3145  ;;  %v7754_v19 = vpack.i.bf16 %v12690_v51, %v12688_v11  ;;  %v12700_v11 = vmax.f32 %v12699_v52, 0.0  ;;  %v12705_v52 = vld [vmem:[#allocation23_spill] sm:$0xff] }
 0x341   : > { %7740 = vperm.xlu1 %7587, %v7739_v39   ;;  %7745 = vperm.xlu0 %7588, %v7744_v29   ;;  %v12695_v29 = vld [vmem:[#allocation28_spill] sm:$0xff] }
 0x342   : > { %v12696_v50 = vmax.f32 %v12695_v29, 0.0  ;;  %v7774_v43 = vpack.i.bf16 %v12700_v11, %v12698_v37  ;;  %v3670_v37 = vrot.slane %v10467_v54, %v10134_v63  ;;  %v12706_v11 = vmax.f32 %v12705_v52, 0.0 }
 0x343   : > { %v10607_v22 = vpop.permute.xlu0 %3163  ;;  %v3699_v54 = vrot.slane %v10555_v49, %v10158_v21 }
 0x344   : > { %v10605_v15 = vpop.permute.xlu1 %3160  ;;  %v7769_v8 = vpack.i.bf16 %v12696_v50, %v12694_v14  ;;  %v12703_v14 = vld [vmem:[#allocation24_spill] sm:$0xff]  ;;  %v3671_v5 = vsel %vm1874_vm1, %v3670_v37, %v3666_v40  ;;  %v3727_v40 = vrot.slane %v10569_v4, %v10134_v63 }
 0x345   : > { %7750 = vperm.xlu1 %7587, %v7749_v41   ;;  %7755 = vperm.xlu0 %7588, %v7754_v19   ;;  %v3685_v19 = vrot.slane %v10478_v23, %v10147_v10  ;;  %v12704_v29 = vmax.f32 %v12703_v14, 0.0  ;;  %v12707_v23 = vmax.f32 %v10131_v47, 0.0  ;;  %v12708_v14 = vld [vmem:[#allocation30_spill] sm:$0xff] }
 0x347   : > { %v10611_v39 = vpop.permute.xlu0 %7595 }
 0x348   : > { %v10609_v3 = vpop.permute.xlu1 %7590 }
 0x349   : > { %7760 = vperm.xlu1 %7587, %v12691_v55   ;;  %7765 = vperm.xlu0 %7588, %v12692_v7   ;;  %v3689_v55 = vrot.slane %v10480_v44, %v10134_v63  ;;  %v12701_v7 = vld [vmem:[#allocation85_spill] sm:$0xff]  ;;  %v3675_v44 = vrot.slane %v10491_v35, %v10152_v17  ;;  %v3713_v35 = vrot.slane %v10557_v32, %v10152_v17 }
 0x34a   : > { %v12702_v53 = vmax.f32 %v12701_v7, 0.0  ;;  %v3704_v7 = vrot.slane %v10513_v59, %v10147_v10  ;;  %v12710_v59 = vld [vmem:[#allocation32_spill] sm:$0xff] }
 0x34b   : > { %v10625_v51 = vpop.permute.xlu0 %7605  ;;  %v3690_v47 = vsel %vm1874_vm1, %v3689_v55, %v3685_v19  ;;  %v12711_v52 = vmax.f32 %v12710_v59, 0.0  ;;  %v3723_v55 = vrot.slane %v10567_v56, %v10147_v10  ;;  %v3742_v56 = vrot.slane %v10605_v15, %v10147_v10  ;;  %v12714_v59 = vld [vmem:[#allocation31_spill] sm:$0xff] }
 0x34c   : > { %v10623_v41 = vpop.permute.xlu1 %7600  ;;  %v7779_v50 = vpack.i.bf16 %v12704_v29, %v12702_v53  ;;  %v12709_v29 = vmax.f32 %v12708_v14, 0.0  ;;  %v3709_v19 = vsel %vm1874_vm1, %v3708_v34, %v3704_v7  ;;  %v3732_v7 = vrot.slane %v10595_v46, %v10152_v17 }
 0x34d   : > { %7770 = vperm.xlu1 %7587, %v7769_v8   ;;  %7775 = vperm.xlu0 %7588, %v7774_v43   ;;  %v3694_v8 = vrot.slane %v10493_v1, %v10152_v17  ;;  %v7784_v43 = vpack.i.bf16 %v12707_v23, %v12706_v11  ;;  %v3680_v23 = vrot.slane %v10545_v20, %v10158_v21 }
 0x34e   : > { %v7804_v11 = vpack.i.bf16 %v12711_v52, %v12709_v29  ;;  %v3746_v34 = vrot.slane %v10607_v22, %v10134_v63  ;;  %v12715_v52 = vmax.f32 %v12714_v59, 0.0  ;;  %v3514_v46 = vrot.slane %v10434_v42, %v10147_v10  ;;  %v12723_v59 = vld [vmem:[#allocation37_spill] sm:$0xff] }
 0x34f   : > { %v10655_v1 = vpop.permute.xlu0 %3070  ;;  %v3695_v49 = vsel %vm1881_vm2, %v3694_v8, %v3690_v47  ;;  %v12712_v8 = vld [vmem:[#allocation41_spill] sm:$0xff]  ;;  %v3518_v15 = vrot.slane %v10436_v36, %v10134_v63  ;;  %v3533_v42 = vrot.slane %v10457_v48, %v10147_v10  ;;  %v7598_v48 = vunpack.i.h.bf16 %v10611_v39 }
 0x350   : > { %v10653_v53 = vpop.permute.xlu1 %3061  ;;  %v3700_v32 = vsel %vm1888_vm3, %v3699_v54, %v3695_v49  ;;  %v3747_v26 = vsel %vm1874_vm1, %v3746_v34, %v3742_v56 }
 0x351   : > { %7780 = vperm.xlu1 %7587, %v7779_v50   ;;  %7785 = vperm.xlu0 %7588, %v7784_v43   ;;  %v3718_v50 = vrot.slane %v3146_v30, %v10158_v21  ;;  %v3676_v43 = vsel %vm1881_vm2, %v3675_v44, %v3671_v5  ;;  %v12713_v30 = vld [vmem:[#allocation80_spill] sm:$0xff]  ;;  %v3714_v44 = vsel %vm1881_vm2, %v3713_v35, %v3709_v19 }
 0x352   : > { %v3681_v4 = vsel %vm1888_vm3, %v3680_v23, %v3676_v43  ;;  %v7809_v35 = vpack.i.bf16 %v1336_v13, %v12715_v52  ;;  %v12716_v23 = vld [vmem:[#allocation33_spill] sm:$0xff]  ;;  %v3728_v19 = vsel %vm1874_vm1, %v3727_v40, %v3723_v55  ;;  %v7592_v55 = vunpack.i.l.bf16 %v10609_v3 }
 0x353   : > { %v3080_v29 = vpop.permute.xlu0 %3079  ;;  %v3719_v54 = vsel %vm1888_vm3, %v3718_v50, %v3714_v44  ;;  %v3836_v22 = vsel %vm2479_vm4, %v3700_v32, %v3681_v4  ;;  %v12717_v50 = vmax.f32 %v12716_v23, 0.0  ;;  %v3733_v32 = vsel %vm1881_vm2, %v3732_v7, %v3728_v19  ;;  %v12721_v4 = vld [vmem:[#allocation38_spill] sm:$0xff] }
 0x354   : > { %v3077_v14 = vpop.permute.xlu1 %3076  ;;  %v3613_v20 = vrot.slane %v3080_v29, %v10134_v63  ;;  %v3837_v36 = vsel %vm2481_vm5, %v3719_v54, %v3836_v22  ;;  %v3523_v7 = vrot.slane %v10482_v33, %v10152_v17  ;;  %v12722_v54 = vmax.f32 %v12721_v4, 0.0  ;;  %v12725_v33 = vld [vmem:[#allocation40_spill] sm:$0xff] }
 0x355   : > { %v3609_v37 = vrot.slane %v3077_v14, %v10147_v10  ;;  %7790 = vperm.xlu1 %7587, %v12712_v8   ;;  %7795 = vperm.xlu0 %7588, %v12713_v30   ;;  %v7814_v43 = vpack.i.bf16 %v12717_v50, %v1339_v45  ;;  %v12718_v14 = vld [vmem:[#allocation79_spill] sm:$0xff]  ;;  %v7593_v45 = vunpack.i.h.bf16 %v10609_v3  ;;  %v12724_v52 = vmax.f32 %v12723_v59, 0.0 }
 0x356   : > { %v12726_v23 = vmax.f32 %v12725_v33, 0.0  ;;  %v1897_v19 = vrot.slane %v7598_v48, %v10134_v63  ;;  %v3571_v4 = vrot.slane %v10541_v58, %v10147_v10  ;;  %v3580_v59 = vrot.slane %v10581_v16, %v10152_v17 }
 0x357   : > { %v10690_v47 = vsel %vm1874_vm1, %v3613_v20, %v3609_v37  ;;  %v3167_v49 = vpop.permute.xlu0 %3166  ;;  %v7597_v37 = vunpack.i.l.bf16 %v10611_v39  ;;  %v12719_v39 = vld [vmem:[#allocation35_spill] sm:$0xff]  ;;  %v7834_v22 = vpack.i.bf16 %v12724_v52, %v12722_v54  ;;  %v3566_v54 = vrot.slane %v10579_v31, %v10158_v21 }
 0x358   : > { %v3158_v5 = vpop.permute.xlu1 %3157  ;;  %v3751_v13 = vrot.slane %v3167_v49, %v10152_v17  ;;  %v12720_v56 = vmax.f32 %v12719_v39, 0.0  ;;  %v12730_v39 = vld [vmem:[#allocation96_spill] sm:$0xff]  ;;  %v3590_v58 = vrot.slane %v10583_v24, %v10147_v10  ;;  %v3594_v31 = vrot.slane %v10585_v18, %v10134_v63 }
 0x359   : > { %v3737_v62 = vrot.slane %v3158_v5, %v10158_v21  ;;  %7800 = vperm.xlu1 %7587, %v12718_v14   ;;  %7805 = vperm.xlu0 %7588, %v7804_v11   ;;  %v3537_v11 = vrot.slane %v10459_v60, %v10134_v63  ;;  %v3542_v60 = vrot.slane %v10484_v25, %v10152_v17  ;;  %v12727_v25 = vld [vmem:[#allocation39_spill] sm:$0xff] }
 0x35a   : > { %v10718_v40 = vsel %vm1881_vm2, %v3751_v13, %v3747_v26  ;;  %v7824_v34 = vpack.i.bf16 %v12720_v56, %v1340_v27  ;;  %v1873_v5 = vrot.slane %v7593_v45, %v10134_v63  ;;  %v12728_v50 = vmax.f32 %v12727_v25, 0.0  ;;  %v12731_v25 = vld [vmem:[#allocation22_spill] sm:$0xff] }
 0x35b   : > { %v3738_v29 = vsel %vm1888_vm3, %v3737_v62, %v3733_v32  ;;  %v3176_v30 = vpop.permute.xlu0 %3175  ;;  %v3538_v27 = vsel %vm1874_vm1, %v3537_v11, %v3533_v42  ;;  %v1893_v62 = vrot.slane %v7597_v37, %v10147_v10  ;;  %v3556_v32 = vrot.slane %v10488_v28, %v10134_v63 }
 0x35c   : > { %v10725_v20 = vsel %vm2483_vm6, %v3738_v29, %v3837_v36  ;;  %v3173_v8 = vpop.permute.xlu1 %3172  ;;  %v3765_v3 = vrot.slane %v3176_v30, %v10134_v63  ;;  %v7844_v6 = vpack.i.bf16 %v12728_v50, %v12726_v23  ;;  %v3552_v36 = vrot.slane %v10486_v57, %v10147_v10 }
 0x35d   : > { %v3761_v44 = vrot.slane %v3173_v8, %v10147_v10  ;;  %7810 = vperm.xlu1 %7587, %v7809_v35   ;;  %7815 = vperm.xlu0 %7588, %v7814_v43   ;;  %v1868_v35 = vrot.slane %v7592_v55, %v10147_v10  ;;  %v3519_v43 = vsel %vm1874_vm1, %v3518_v15, %v3514_v46  ;;  %v12729_v55 = vld [vmem:[#allocation82_spill] sm:$0xff]  ;;  %v7603_v11 = vunpack.i.h.bf16 %v10623_v41 }
 0x35e   : > { %v3524_v46 = vsel %vm1881_vm2, %v3523_v7, %v3519_v43  ;;  %v3543_v15 = vsel %vm1881_vm2, %v3542_v60, %v3538_v27  ;;  %v3528_v42 = vrot.slane %v10531_v2, %v10158_v21  ;;  %v3547_v29 = vrot.slane %v10533_v9, %v10158_v21  ;;  %v12732_v27 = vld [vmem:[#allocation52_spill] sm:$0xff] }
 0x35f   : > { %v10744_v49 = vsel %vm1874_vm1, %v3765_v3, %v3761_v44  ;;  %v10754_v14 = vpop.permute.xlu0 %7615  ;;  %v1875_v57 = vsel %vm1874_vm1, %v1873_v5, %v1868_v35  ;;  %v1898_v37 = vsel %vm1874_vm1, %v1897_v19, %v1893_v62  ;;  %v7602_v8 = vunpack.i.l.bf16 %v10623_v41  ;;  %v12734_v62 = vld [vmem:[#allocation45_spill] sm:$0xff] }
 0x360   : > { %v7611_v13 = vpop.permute.xlu1 %7610  ;;  %v7608_v30 = vunpack.i.h.bf16 %v10625_v51  ;;  %v7607_v44 = vunpack.i.l.bf16 %v10625_v51  ;;  %v3557_v9 = vsel %vm1874_vm1, %v3556_v32, %v3552_v36  ;;  %v3529_v41 = vsel %vm1888_vm3, %v3528_v42, %v3524_v46 }
 0x361   : > { %v7613_v26 = vunpack.i.h.bf16 %v7611_v13  ;;  %v7612_v45 = vunpack.i.l.bf16 %v7611_v13  ;;  %7820 = vperm.xlu1 %7587, %v12729_v55   ;;  %7825 = vperm.xlu0 %7588, %v7824_v34   ;;  %v3548_v56 = vsel %vm1888_vm3, %v3547_v29, %v3543_v15  ;;  %v3561_v51 = vrot.slane %v10539_v38, %v10152_v17 }
 0x362   : > { %v3575_v34 = vrot.slane %v10543_v0, %v10134_v63  ;;  %v2334_v52 = vrot.slane %v7603_v11, %v10134_v63  ;;  %v2353_v5 = vrot.slane %v7608_v30, %v10134_v63  ;;  %v2349_v38 = vrot.slane %v7607_v44, %v10147_v10 }
 0x363   : > { %v1902_v28 = vrot.slane %v7613_v26, %v10152_v17  ;;  %v1880_v48 = vrot.slane %v7612_v45, %v10152_v17  ;;  %v10777_v3 = vpop.permute.xlu0 %7625  ;;  %v3585_v0 = vrot.slane %v10653_v53, %v10158_v21  ;;  %v3562_v50 = vsel %vm1881_vm2, %v3561_v51, %v3557_v9  ;;  %v12737_v51 = vld [vmem:[#allocation47_spill] sm:$0xff] }
 0x364   : > { %v10775_v2 = vpop.permute.xlu1 %7620  ;;  %v3576_v43 = vsel %vm1874_vm1, %v3575_v34, %v3571_v4  ;;  %v3599_v53 = vrot.slane %v10655_v1, %v10152_v17  ;;  %v12733_v19 = vmax.f32 %v12732_v27, 0.0  ;;  %v12735_v13 = vmax.f32 %v12734_v62, 0.0  ;;  %v12739_v4 = vld [vmem:[#allocation51_spill] sm:$0xff] }
 0x365   : > { %v10781_v7 = vsel %vm1881_vm2, %v1880_v48, %v1875_v57  ;;  %v10784_v60 = vsel %vm1881_vm2, %v1902_v28, %v1898_v37  ;;  %7830 = vperm.xlu1 %7587, %v12730_v39   ;;  %7835 = vperm.xlu0 %7588, %v7834_v22   ;;  %v2330_v22 = vrot.slane %v7602_v8, %v10147_v10  ;;  %v12736_v28 = vld [vmem:[#allocation81_spill] sm:$0xff]  ;;  %v7921_v48 = vld [vmem:[%s12055_s3] ss:$16 sps:$4 sm:$0xff]   ;;  %v7923_v37 = vld [vmem:[%s12055_s3 + $0x4] ss:$16 sps:$4 sm:$0xff]   ;;  %v12738_v34 = vmax.f32 %v12737_v51, 0.0 }
 0x366   : > { %v7854_v24 = vpack.i.bf16 %v12735_v13, %v12733_v19  ;;  %v3567_v36 = vsel %vm1888_vm3, %v3566_v54, %v3562_v50  ;;  %v3581_v18 = vsel %vm1881_vm2, %v3580_v59, %v3576_v43  ;;  %v3829_v26 = vsel %vm2479_vm4, %v3548_v56, %v3529_v41  ;;  %v7924_v8 = vld [vmem:[%s12055_s3 + $0x8] ss:$16 sps:$4 sm:$0xff]   ;;  %v7926_v39 = vld [vmem:[%s12055_s3 + $0xc] ss:$16 sps:$4 sm:$0xff]   ;;  %4043 = vmatprep.subr.bf16.mxu0 %v7923_v37  ;;  %v12758_v51 = vld [vmem:[#allocation74_spill] sm:$0xff] }
 0x367   : > { %v10805_v33 = vpop.permute.xlu0 %7635  ;;  %v2335_v45 = vsel %vm1874_vm1, %v2334_v52, %v2330_v22  ;;  %v2354_v55 = vsel %vm1874_vm1, %v2353_v5, %v2349_v38  ;;  %v3586_v1 = vsel %vm1888_vm3, %v3585_v0, %v3581_v18  ;;  %v3595_v42 = vsel %vm1874_vm1, %v3594_v31, %v3590_v58  ;;  %v12741_v0 = vld [vmem:[#allocation49_spill] sm:$0xff]  ;;  %v12743_v58 = vld [vmem:[#allocation56_spill] sm:$0xff]  ;;  %4096 = vmatprep.subr.bf16.mxu1 %v7926_v39  ;;  %v12745_v19 = vld [vmem:[#allocation55_spill] sm:$0xff] }
 0x368   : > { %v7631_v35 = vpop.permute.xlu1 %7630  ;;  %v3830_v30 = vsel %vm2481_vm5, %v3567_v36, %v3829_v26  ;;  %v3600_v44 = vsel %vm1881_vm2, %v3599_v53, %v3595_v42  ;;  %v12740_v54 = vmax.f32 %v12739_v4, 0.0  ;;  %v12744_v31 = vmax.f32 %v12743_v58, 0.0  ;;  %4044 = vmatpush1.bf16.msra.mxu0 %v7921_v48  ;;  %4097 = vmatpush1.bf16.msra.mxu1 %v7924_v8  ;;  %v7930_v43 = vld [vmem:[%s12055_s3 + $0x28] ss:$16 sps:$4 sm:$0xff]   ;;  %v7932_v53 = vld [vmem:[%s12055_s3 + $0x2c] ss:$16 sps:$4 sm:$0xff]  }
 0x369   : > { %v7633_v16 = vunpack.i.h.bf16 %v7631_v35  ;;  %v7632_v23 = vunpack.i.l.bf16 %v7631_v35  ;;  %7840 = vperm.xlu1 %7587, %v12731_v25   ;;  %7845 = vperm.xlu0 %7588, %v7844_v6   ;;  %v3831_v41 = vsel %vm2483_vm6, %v3586_v1, %v3830_v30  ;;  %v12742_v35 = vmax.f32 %v12741_v0, 0.0  ;;  %v7929_v25 = vld [vmem:[%s12055_s3 + $0x24] ss:$16 sps:$4 sm:$0xff]   ;;  %v12747_v13 = vld [vmem:[#allocation53_spill] sm:$0xff] }
 0x36a   : > { %v7859_v59 = vpack.i.bf16 %v12740_v54, %v12738_v34  ;;  %4045 = vmatprep.subr.bf16.mxu0 %v7929_v25  ;;  %v12746_v62 = vmax.f32 %v12745_v19, 0.0  ;;  %4098 = vmatprep.subr.bf16.mxu1 %v7932_v53  ;;  %v12755_v37 = vld [vmem:[#allocation61_spill] sm:$0xff] }
 0x36b   : > { %v2358_v32 = vrot.slane %v7633_v16, %v10152_v17  ;;  %v2339_v6 = vrot.slane %v7632_v23, %v10152_v17  ;;  %v3083_v15 = vpop.permute.xlu0 %3082  ;;  %v7864_v16 = vpack.i.bf16 %v12744_v31, %v12742_v35  ;;  %v7927_v23 = vld [vmem:[%s12055_s3 + $0x20] ss:$16 sps:$4 sm:$0xff]   ;;  %v12756_v8 = vmax.f32 %v12755_v37, 0.0 }
 0x36c   : > { %v3074_v46 = vpop.permute.xlu1 %3073  ;;  %v3618_v9 = vrot.slane %v3083_v15, %v10152_v17  ;;  %4046 = vmatpush1.bf16.msra.mxu0 %v7927_v23  ;;  %4099 = vmatpush1.bf16.msra.mxu1 %v7930_v43  ;;  %v12762_v35 = vld [vmem:[#allocation72_spill] sm:$0xff] }
 0x36d   : > { %v10830_v29 = vsel %vm1881_vm2, %v2339_v6, %v2335_v45  ;;  %v10833_v57 = vsel %vm1881_vm2, %v2358_v32, %v2354_v55  ;;  %v3604_v11 = vrot.slane %v3074_v46, %v10158_v21  ;;  %7850 = vperm.xlu1 %7587, %v12736_v28   ;;  %7855 = vperm.xlu0 %7588, %v7854_v24   ;;  %v12748_v24 = vmax.f32 %v12747_v13, 0.0  ;;  %v12749_v6 = vld [vmem:[#allocation62_spill] sm:$0xff]  ;;  %v12753_v28 = vld [vmem:[#allocation65_spill] sm:$0xff] }
 0x36e   : > { %v10863_v22 = vsel %vm1881_vm2, %v3618_v9, %v10690_v47  ;;  %v12750_v26 = vmax.f32 %v12749_v6, 0.0  ;;  %v12751_v45 = vld [vmem:[#allocation66_spill] sm:$0xff]  ;;  %v12754_v48 = vmax.f32 %v12753_v28, 0.0  ;;  %v7617_v9 = vunpack.i.l.bf16 %v10754_v14 }
 0x36f   : > { %v3605_v56 = vsel %vm1888_vm3, %v3604_v11, %v3600_v44  ;;  %v3092_v38 = vpop.permute.xlu0 %3091  ;;  %v7869_v36 = vpack.i.bf16 %v12748_v24, %v12746_v62  ;;  %v12752_v55 = vmax.f32 %v12751_v45, 0.0  ;;  %v7618_v44 = vunpack.i.h.bf16 %v10754_v14  ;;  %v12764_v13 = vld [vmem:[#allocation110_spill] sm:$0xff] }
 0x370   : > { %v10859_v52 = vsel %vm2485_vm7, %v3605_v56, %v3831_v41  ;;  %v3089_v5 = vpop.permute.xlu1 %3088  ;;  %v3632_v50 = vrot.slane %v3092_v38, %v10134_v63  ;;  %v7879_v30 = vpack.i.bf16 %v12756_v8, %v12754_v48  ;;  %v7622_v14 = vunpack.i.l.bf16 %v10775_v2  ;;  %v12765_v48 = vld [vmem:[#allocation111_spill] sm:$0xff] }
 0x371   : > { %v3628_v47 = vrot.slane %v3089_v5, %v10147_v10  ;;  %7860 = vperm.xlu1 %7587, %v7859_v59   ;;  %7865 = vperm.xlu0 %7588, %v7864_v16   ;;  %v7874_v1 = vpack.i.bf16 %v12752_v55, %v12750_v26  ;;  %v7623_v59 = vunpack.i.h.bf16 %v10775_v2  ;;  %v7628_v5 = vunpack.i.h.bf16 %v10777_v3 }
 0x372   : > { %v12763_v58 = vmax.f32 %v12762_v35, 0.0  ;;  %v1916_v16 = vrot.slane %v7618_v44, %v10134_v63  ;;  %v1912_v23 = vrot.slane %v7617_v9, %v10147_v10  ;;  %v2026_v53 = vrot.slane %v7622_v14, %v10147_v10  ;;  %v12766_v44 = vld [vmem:[#allocation112_spill] sm:$0xff] }
 0x373   : > { %v10884_v27 = vsel %vm1874_vm1, %v3632_v50, %v3628_v47  ;;  %v3179_v32 = vpop.permute.xlu0 %3178  ;;  %v2049_v19 = vrot.slane %v7628_v5, %v10134_v63  ;;  %v7638_v24 = vunpack.i.h.bf16 %v10805_v33  ;;  %v7637_v26 = vunpack.i.l.bf16 %v10805_v33 }
 0x374   : > { %v3170_v18 = vpop.permute.xlu1 %3169  ;;  %v3770_v15 = vrot.slane %v3179_v32, %v10152_v17  ;;  %v1917_v6 = vsel %vm1874_vm1, %v1916_v16, %v1912_v23 }
 0x375   : > { %v3756_v46 = vrot.slane %v3170_v18, %v10158_v21  ;;  %7870 = vperm.xlu1 %7587, %v7869_v36   ;;  %7875 = vperm.xlu0 %7588, %v7874_v1  }
 0x376   : > { %v10900_v11 = vsel %vm1881_vm2, %v3770_v15, %v10744_v49  ;;  %v12759_v49 = vmax.f32 %v12758_v51, 0.0 }
 0x377   : > { %v3757_v42 = vsel %vm1888_vm3, %v3756_v46, %v10718_v40  ;;  %v3188_v56 = vpop.permute.xlu0 %3187  ;;  %v12757_v40 = vmax.f32 %v10123_v61, 0.0  ;;  %v12760_v61 = vld [vmem:[#allocation73_spill] sm:$0xff] }
 0x378   : > { %v10910_v39 = vsel %vm2485_vm7, %v3757_v42, %v10725_v20  ;;  %v3185_v41 = vpop.permute.xlu1 %3184  ;;  %v3784_v54 = vrot.slane %v3188_v56, %v10134_v63  ;;  %v7627_v20 = vunpack.i.l.bf16 %v10777_v3  ;;  %v12761_v0 = vmax.f32 %v12760_v61, 0.0 }
 0x379   : > { %v7884_v34 = vpack.i.bf16 %v12759_v49, %v12757_v40  ;;  %v3780_v4 = vrot.slane %v3185_v41, %v10147_v10  ;;  %7880 = vperm.xlu1 %7587, %v7879_v30   ;;  %v2030_v3 = vrot.slane %v7623_v59, %v10134_v63  ;;  %v2368_v56 = vrot.slane %v7637_v26, %v10147_v10 }
 0x37a   : > { %v7889_v31 = vpack.i.bf16 %v12763_v58, %v12761_v0  ;;  %v2045_v62 = vrot.slane %v7627_v20, %v10147_v10 }
 0x37b   : > { %7885 = vperm.xlu0 %7588, %v7884_v34   ;;  %v10923_v38 = vsel %vm1874_vm1, %v3784_v54, %v3780_v4  ;;  %v7646_v47 = vpop.permute.xlu0 %7645  ;;  %v2031_v37 = vsel %vm1874_vm1, %v2030_v3, %v2026_v53 }
 0x37c   : > { %v7641_v25 = vpop.permute.xlu1 %7640  ;;  %v7647_v43 = vunpack.i.l.bf16 %v7646_v47  ;;  %v7648_v45 = vunpack.i.h.bf16 %v7646_v47  ;;  %v2050_v9 = vsel %vm1874_vm1, %v2049_v19, %v2045_v62 }
 0x37d   : > { %v7643_v2 = vunpack.i.h.bf16 %v7641_v25  ;;  %v7642_v50 = vunpack.i.l.bf16 %v7641_v25  ;;  %7890 = vperm.xlu1 %7587, %v7889_v31  }
 0x37e   : > { %v1921_v32 = vrot.slane %v7647_v43, %v10152_v17  ;;  %v1931_v40 = vrot.slane %v7648_v45, %v10147_v10 }
 0x37f   : > { %7895 = vperm.xlu0 %7588, %v12764_v13   ;;  %v1907_v36 = vrot.slane %v7643_v2, %v10158_v21  ;;  %v1887_v18 = vrot.slane %v7642_v50, %v10158_v21  ;;  %v7656_v1 = vpop.permute.xlu0 %7655 }
 0x380   : > { %v7651_v55 = vpop.permute.xlu1 %7650  ;;  %v10947_v42 = vsel %vm1881_vm2, %v1921_v32, %v1917_v6  ;;  %v7657_v30 = vunpack.i.l.bf16 %v7656_v1  ;;  %v7658_v41 = vunpack.i.h.bf16 %v7656_v1 }
 0x381   : > { %v1889_v46 = vsel %vm1888_vm3, %v1887_v18, %v10781_v7  ;;  %v1908_v15 = vsel %vm1888_vm3, %v1907_v36, %v10784_v60  ;;  %v7653_v28 = vunpack.i.h.bf16 %v7651_v55  ;;  %7900 = vperm.xlu1 %7587, %v12765_v48   ;;  %v7652_v33 = vunpack.i.l.bf16 %v7651_v55  ;;  %v7935_v18 = vld [vmem:[%s12055_s3 + $0x84] ss:$16 sps:$4 sm:$0xff]  }
 0x382   : > { %v2480_v8 = vsel %vm2479_vm4, %v1908_v15, %v1889_v46  ;;  %v2372_v7 = vrot.slane %v7638_v24, %v10134_v63  ;;  %v2054_v49 = vrot.slane %v7657_v30, %v10152_v17  ;;  %v2064_v35 = vrot.slane %v7658_v41, %v10147_v10  ;;  %4206 = vmatprep.subr.bf16.mxu0 %v7935_v18 }
 0x383   : > { %7905 = vperm.xlu0 %7588, %v12766_v44   ;;  %v2035_v60 = vrot.slane %v7653_v28, %v10152_v17  ;;  %v1935_v51 = vrot.slane %v7652_v33, %v10134_v63  ;;  %v7666_v4 = vpop.permute.xlu0 %7665 }
 0x384   : > { %v7661_v34 = vpop.permute.xlu1 %7660  ;;  %v7668_v5 = vunpack.i.h.bf16 %v7666_v4  ;;  %v2055_v61 = vsel %vm1881_vm2, %v2054_v49, %v2050_v9  ;;  %v7667_v0 = vunpack.i.l.bf16 %v7666_v4  ;;  %v2373_v23 = vsel %vm1874_vm1, %v2372_v7, %v2368_v56 }
 0x385   : > { %v2036_v54 = vsel %vm1881_vm2, %v2035_v60, %v2031_v37  ;;  %v7663_v59 = vunpack.i.h.bf16 %v7661_v34  ;;  %v7662_v14 = vunpack.i.l.bf16 %v7661_v34  ;;  %v1936_v20 = vsel %vm1874_vm1, %v1935_v51, %v1931_v40 }
 0x386   : > { %v2377_v16 = vrot.slane %v7668_v5, %v10152_v17  ;;  %v2363_v25 = vrot.slane %v7667_v0, %v10158_v21 }
 0x387   : > { %v2344_v58 = vrot.slane %v7663_v59, %v10158_v21  ;;  %v2068_v31 = vrot.slane %v7662_v14, %v10134_v63 }
 0x388   : > { %v10969_v47 = vpop.permute.xlu1 %7670  ;;  %v3086_v2 = vpop.permute.xlu0 %3085  ;;  %v2378_v3 = vsel %vm1881_vm2, %v2377_v16, %v2373_v23  ;;  %v2364_v53 = vsel %vm1888_vm3, %v2363_v25, %v10833_v57  ;;  %v7941_v57 = vld [vmem:[%s12055_s3 + $0x8c] ss:$16 sps:$4 sm:$0xff]  }
 0x389   : > { %v10972_v50 = vsel %vm1874_vm1, %v2068_v31, %v2064_v35  ;;  %v2345_v43 = vsel %vm1888_vm3, %v2344_v58, %v10830_v29  ;;  %v3623_v19 = vrot.slane %v3086_v2, %v10158_v21  ;;  %4259 = vmatprep.subr.bf16.mxu1 %v7941_v57 }
 0x38a   : > { %v2507_v62 = vsel %vm2479_vm4, %v2364_v53, %v2345_v43 }
 0x38b   : > { %v3624_v13 = vsel %vm1888_vm3, %v3623_v19, %v10863_v22 }
 0x38c   : > { %v3095_v24 = vpop.permute.xlu1 %3094  ;;  %v10983_v36 = vpop.permute.xlu0 %3100  ;;  %v3833_v29 = vsel %vm2487_vm8, %v3624_v13, %v10859_v52  ;;  %v7673_v13 = vunpack.i.h.bf16 %v10969_v47 }
 0x38d   : > { %v3637_v5 = vrot.slane %v3095_v24, %v10152_v17  ;;  %v7672_v24 = vunpack.i.l.bf16 %v10969_v47 }
 0x38f   : > { %v3638_v31 = vsel %vm1881_vm2, %v3637_v5, %v10884_v27 }
 0x390   : > { %v10993_v32 = vpop.permute.xlu1 %3103  ;;  %v3182_v6 = vpop.permute.xlu0 %3181 }
 0x391   : > { %v3775_v22 = vrot.slane %v3182_v6, %v10158_v21 }
 0x393   : > { %v3776_v26 = vsel %vm1888_vm3, %v3775_v22, %v10900_v11 }
 0x394   : > { %v3840_v45 = vsel %vm2487_vm8, %v3776_v26, %v10910_v39  ;;  %v3191_v55 = vpop.permute.xlu1 %3190  ;;  %v11000_v1 = vpop.permute.xlu0 %3196 }
 0x395   : > { %v3789_v16 = vrot.slane %v3191_v55, %v10152_v17 }
 0x397   : > { %v3790_v27 = vsel %vm1881_vm2, %v3789_v16, %v10923_v38  ;;  %v2387_v38 = vrot.slane %v7672_v24, %v10147_v10 }
 0x398   : > { %v11002_v52 = vpop.permute.xlu1 %3199  ;;  %v7676_v46 = vpop.permute.xlu0 %7675 }
 0x399   : > { %v7678_v15 = vunpack.i.h.bf16 %v7676_v46  ;;  %v7677_v28 = vunpack.i.l.bf16 %v7676_v46  ;;  %v2391_v46 = vrot.slane %v7673_v13, %v10134_v63 }
 0x39b   : > { %v1940_v48 = vrot.slane %v7678_v15, %v10152_v17  ;;  %v1926_v37 = vrot.slane %v7677_v28, %v10158_v21 }
 0x39c   : > { %v7681_v33 = vpop.permute.xlu1 %7680  ;;  %v7686_v30 = vpop.permute.xlu0 %7685 }
 0x39d   : > { %v1927_v11 = vsel %vm1888_vm3, %v1926_v37, %v10947_v42  ;;  %v1941_v44 = vsel %vm1881_vm2, %v1940_v48, %v1936_v20  ;;  %v7688_v9 = vunpack.i.h.bf16 %v7686_v30  ;;  %v7687_v7 = vunpack.i.l.bf16 %v7686_v30 }
 0x39e   : > { %v2482_v39 = vsel %vm2481_vm5, %v1927_v11, %v2480_v8  ;;  %v7683_v15 = vunpack.i.h.bf16 %v7681_v33  ;;  %v7682_v47 = vunpack.i.l.bf16 %v7681_v33 }
 0x39f   : > { %v2059_v60 = vrot.slane %v7688_v9, %v10158_v21  ;;  %v2040_v41 = vrot.slane %v7687_v7, %v10158_v21  ;;  %v2392_v9 = vsel %vm1874_vm1, %v2391_v46, %v2387_v38 }
 0x3a0   : > { %v11012_v56 = vpop.permute.xlu1 %7690  ;;  %v11014_v40 = vpop.permute.xlu0 %7695  ;;  %v1954_v7 = vrot.slane %v7683_v15, %v10134_v63 }
 0x3a1   : > { %v7698_v51 = vunpack.i.h.bf16 %v11014_v40  ;;  %v2041_v49 = vsel %vm1888_vm3, %v2040_v41, %v2036_v54  ;;  %v2060_v42 = vsel %vm1888_vm3, %v2059_v60, %v2055_v61  ;;  %v7692_v43 = vunpack.i.l.bf16 %v11012_v56 }
 0x3a2   : > { %v2493_v34 = vsel %vm2479_vm4, %v2060_v42, %v2041_v49  ;;  %v3651_v60 = vrot.slane %v10993_v32, %v10134_v63  ;;  %v3803_v41 = vrot.slane %v11002_v52, %v10134_v63  ;;  %v3799_v32 = vrot.slane %v11000_v1, %v10147_v10 }
 0x3a3   : > { %v2382_v8 = vrot.slane %v7698_v51, %v10158_v21  ;;  %v2073_v57 = vrot.slane %v7692_v43, %v10152_v17 }
 0x3a4   : > { %v11021_v4 = vpop.permute.xlu1 %7700  ;;  %v11023_v59 = vpop.permute.xlu0 %7705  ;;  %v3804_v16 = vsel %vm1874_vm1, %v3803_v41, %v3799_v32 }
 0x3a5   : > { %v2383_v14 = vsel %vm1888_vm3, %v2382_v8, %v2378_v3  ;;  %v7708_v0 = vunpack.i.h.bf16 %v11023_v59  ;;  %v7702_v26 = vunpack.i.l.bf16 %v11021_v4  ;;  %v2074_v48 = vsel %vm1881_vm2, %v2073_v57, %v10972_v50 }
 0x3a6   : > { %v2508_v20 = vsel %vm2481_vm5, %v2383_v14, %v2507_v62  ;;  %v1950_v50 = vrot.slane %v7682_v47, %v10147_v10  ;;  %v3647_v8 = vrot.slane %v10983_v36, %v10147_v10  ;;  %v7703_v24 = vunpack.i.h.bf16 %v11021_v4 }
 0x3a7   : > { %v1945_v54 = vrot.slane %v7708_v0, %v10158_v21  ;;  %v2396_v11 = vrot.slane %v7702_v26, %v10152_v17 }
 0x3a8   : > { %v3098_v35 = vpop.permute.xlu1 %3097  ;;  %v11030_v61 = vpop.permute.xlu0 %3106  ;;  %v2406_v4 = vrot.slane %v7703_v24, %v10147_v10 }
 0x3a9   : > { %v3642_v58 = vrot.slane %v3098_v35, %v10158_v21  ;;  %v1946_v23 = vsel %vm1888_vm3, %v1945_v54, %v1941_v44  ;;  %v2397_v14 = vsel %vm1881_vm2, %v2396_v11, %v2392_v9  ;;  %v3656_v52 = vrot.slane %v11030_v61, %v10152_v17 }
 0x3aa   : > { %v2484_v25 = vsel %vm2483_vm6, %v1946_v23, %v2482_v39  ;;  %v1955_v35 = vsel %vm1874_vm1, %v1954_v7, %v1950_v50  ;;  %v7693_v61 = vunpack.i.h.bf16 %v11012_v56 }
 0x3ab   : > { %v3643_v2 = vsel %vm1888_vm3, %v3642_v58, %v3638_v31  ;;  %v3652_v31 = vsel %vm1874_vm1, %v3651_v60, %v3647_v8 }
 0x3ac   : > { %v11041_v3 = vsel %vm2489_vm9, %v3643_v2, %v3833_v29  ;;  %v3194_v53 = vpop.permute.xlu1 %3193  ;;  %v3203_v19 = vpop.permute.xlu0 %3202  ;;  %v2083_v15 = vrot.slane %v7693_v61, %v10147_v10 }
 0x3ad   : > { %v3794_v62 = vrot.slane %v3194_v53, %v10158_v21  ;;  %v3808_v0 = vrot.slane %v3203_v19, %v10152_v17 }
 0x3af   : > { %v3795_v18 = vsel %vm1888_vm3, %v3794_v62, %v3790_v27  ;;  %v3657_v62 = vsel %vm1881_vm2, %v3656_v52, %v3652_v31  ;;  %v3809_v13 = vsel %vm1881_vm2, %v3808_v0, %v3804_v16 }
 0x3b0   : > { %v3841_v6 = vsel %vm2489_vm9, %v3795_v18, %v3840_v45  ;;  %v11051_v22 = vpop.permute.xlu1 %7710  ;;  %v11053_v29 = vpop.permute.xlu0 %7715  ;;  %v7707_v18 = vunpack.i.l.bf16 %v11023_v59 }
 0x3b1   : > { %v7718_v55 = vunpack.i.h.bf16 %v11053_v29  ;;  %v7712_v45 = vunpack.i.l.bf16 %v11051_v22 }
 0x3b2   : > { %v2410_v59 = vrot.slane %v7707_v18, %v10134_v63 }
 0x3b3   : > { %v2078_v28 = vrot.slane %v7718_v55, %v10158_v21  ;;  %v1959_v51 = vrot.slane %v7712_v45, %v10152_v17 }
 0x3b4   : > { %v11063_v37 = vpop.permute.xlu1 %7720  ;;  %v11065_v30 = vpop.permute.xlu0 %7725 }
 0x3b5   : > { %v2079_v44 = vsel %vm1888_vm3, %v2078_v28, %v2074_v48  ;;  %v7728_v33 = vunpack.i.h.bf16 %v11065_v30  ;;  %v1960_v1 = vsel %vm1881_vm2, %v1959_v51, %v1955_v35  ;;  %v7722_v47 = vunpack.i.l.bf16 %v11063_v37 }
 0x3b6   : > { %v11070_v39 = vsel %vm2481_vm5, %v2079_v44, %v2493_v34  ;;  %v7717_v48 = vunpack.i.l.bf16 %v11053_v29  ;;  %v7723_v9 = vunpack.i.h.bf16 %v11063_v37  ;;  %v7727_v7 = vunpack.i.l.bf16 %v11065_v30 }
 0x3b7   : > { %v2401_v49 = vrot.slane %v7728_v33, %v10158_v21  ;;  %v2411_v33 = vsel %vm1874_vm1, %v2410_v59, %v2406_v4  ;;  %v2092_v50 = vrot.slane %v7722_v47, %v10152_v17 }
 0x3b8   : > { %v11082_v42 = vpop.permute.xlu1 %7730  ;;  %v11084_v34 = vpop.permute.xlu0 %7735  ;;  %v1973_v8 = vrot.slane %v7717_v48, %v10134_v63  ;;  %v2102_v0 = vrot.slane %v7723_v9, %v10147_v10 }
 0x3b9   : > { %v7738_v5 = vunpack.i.h.bf16 %v11084_v34  ;;  %v2402_v54 = vsel %vm1888_vm3, %v2401_v49, %v2397_v14  ;;  %v7732_v45 = vunpack.i.l.bf16 %v11082_v42  ;;  %v7737_v29 = vunpack.i.l.bf16 %v11084_v34 }
 0x3ba   : > { %v11098_v58 = vsel %vm2483_vm6, %v2402_v54, %v2508_v20  ;;  %v7697_v20 = vunpack.i.l.bf16 %v11014_v40 }
 0x3bb   : > { %v1964_v36 = vrot.slane %v7738_v5, %v10158_v21  ;;  %v2415_v14 = vrot.slane %v7732_v45, %v10152_v17  ;;  %v2429_v31 = vrot.slane %v7737_v29, %v10134_v63 }
 0x3bc   : > { %v3110_v23 = vpop.permute.xlu1 %3109  ;;  %v3206_v2 = vpop.permute.xlu0 %3205 }
 0x3bd   : > { %v1965_v43 = vsel %vm1888_vm3, %v1964_v36, %v1960_v1  ;;  %v3661_v53 = vrot.slane %v3110_v23, %v10158_v21  ;;  %v3813_v19 = vrot.slane %v3206_v2, %v10158_v21  ;;  %v2416_v2 = vsel %vm1881_vm2, %v2415_v14, %v2411_v33 }
 0x3be   : > { %v11112_v27 = vsel %vm2485_vm7, %v1965_v43, %v2484_v25  ;;  %v2087_v25 = vrot.slane %v7697_v20, %v10134_v63 }
 0x3bf   : > { %v3662_v56 = vsel %vm1888_vm3, %v3661_v53, %v3657_v62  ;;  %v3814_v57 = vsel %vm1888_vm3, %v3813_v19, %v3809_v13 }
 0x3c0   : > { %v3835_v26 = vsel %vm2491_vm10, %v3662_v56, %v11041_v3  ;;  %v3842_v40 = vsel %vm2491_vm10, %v3814_v57, %v3841_v6  ;;  %v7741_v55 = vpop.permute.xlu1 %7740  ;;  %v7746_v46 = vpop.permute.xlu0 %7745  ;;  %v7713_v6 = vunpack.i.h.bf16 %v11051_v22  ;;  %v2088_v44 = vsel %vm1874_vm1, %v2087_v25, %v2083_v15 }
 0x3c1   : > { %v3844_v38 = vpack.c.b16 %v3842_v40, %v3835_v26  ;;  %v7748_v11 = vunpack.i.h.bf16 %v7746_v46  ;;  %v7733_v22 = vunpack.i.h.bf16 %v11082_v42  ;;  %v7743_v5 = vunpack.i.h.bf16 %v7741_v55 }
 0x3c2   : > { %v1969_v49 = vrot.slane %v7713_v6, %v10147_v10  ;;  %v7742_v32 = vunpack.i.l.bf16 %v7741_v55  ;;  %v7747_v30 = vunpack.i.l.bf16 %v7746_v46  ;;  %v2106_v42 = vrot.slane %v7727_v7, %v10134_v63 }
 0x3c3   : > { %6966 = vmatmul.mubr.msk.bf16.gmra.mrb[4].mxu0 %vm675_vm0, %v3844_v38  ;;  %6968 = vmatmul.mubr.msk.bf16.gmra.mrb[4].mxu1 %vm675_vm0, %v3844_v38  ;;  %v2097_v37 = vrot.slane %v7748_v11, %v10158_v21  ;;  %v2093_v35 = vsel %vm1881_vm2, %v2092_v50, %v2088_v44  ;;  %v2425_v36 = vrot.slane %v7733_v22, %v10147_v10 }
 0x3c4   : > { %v7751_v3 = vpop.permute.xlu1 %7750  ;;  %v7756_v28 = vpop.permute.xlu0 %7755  ;;  %4075 = vmatprep.mubr.bf16.mxu0 %v12617_v12  ;;  %4128 = vmatprep.mubr.bf16.mxu1 %v12617_v12  ;;  %v1988_v61 = vrot.slane %v7743_v5, %v10147_v10  ;;  %v1978_v19 = vrot.slane %v7742_v32, %v10152_v17  ;;  %v1992_v20 = vrot.slane %v7747_v30, %v10134_v63 }
 0x3c5   : > { %v7758_v60 = vunpack.i.h.bf16 %v7756_v28  ;;  %v7753_v52 = vunpack.i.h.bf16 %v7751_v3  ;;  %v7752_v34 = vunpack.i.l.bf16 %v7751_v3  ;;  %v7757_v54 = vunpack.i.l.bf16 %v7756_v28 }
 0x3c6   : > { %v2098_v62 = vsel %vm1888_vm3, %v2097_v37, %v2093_v35  ;;  %v1974_v26 = vsel %vm1874_vm1, %v1973_v8, %v1969_v49  ;;  %v2107_v40 = vsel %vm1874_vm1, %v2106_v42, %v2102_v0  ;;  %v2430_v47 = vsel %vm1874_vm1, %v2429_v31, %v2425_v36 }
 0x3c7   : > { %v2420_v16 = vrot.slane %v7758_v60, %v10158_v21  ;;  %v2121_v13 = vrot.slane %v7753_v52, %v10147_v10  ;;  %v2111_v24 = vrot.slane %v7752_v34, %v10152_v17  ;;  %v2125_v18 = vrot.slane %v7757_v54, %v10134_v63 }
 0x3c8   : > { %v7761_v41 = vpop.permute.xlu1 %7760  ;;  %v7766_v51 = vpop.permute.xlu0 %7765  ;;  %v1979_v3 = vsel %vm1881_vm2, %v1978_v19, %v1974_v26  ;;  %v1993_v28 = vsel %vm1874_vm1, %v1992_v20, %v1988_v61  ;;  %v2495_v6 = vsel %vm2483_vm6, %v2098_v62, %v11070_v39 }
 0x3c9   : > { %v7762_v43 = vunpack.i.l.bf16 %v7761_v41  ;;  %v7768_v53 = vunpack.i.h.bf16 %v7766_v51  ;;  %v7763_v56 = vunpack.i.h.bf16 %v7761_v41  ;;  %v7767_v57 = vunpack.i.l.bf16 %v7766_v51 }
 0x3ca   : > { %v2421_v55 = vsel %vm1888_vm3, %v2420_v16, %v2416_v2  ;;  %v2112_v48 = vsel %vm1881_vm2, %v2111_v24, %v2107_v40  ;;  %v2126_v45 = vsel %vm1874_vm1, %v2125_v18, %v2121_v13 }
 0x3cb   : > { %v2434_v15 = vrot.slane %v7762_v43, %v10152_v17  ;;  %v1983_v25 = vrot.slane %v7768_v53, %v10158_v21  ;;  %v2444_v11 = vrot.slane %v7763_v56, %v10147_v10  ;;  %v2448_v44 = vrot.slane %v7767_v57, %v10134_v63 }
 0x3cc   : > { %v7771_v1 = vpop.permute.xlu1 %7770  ;;  %v7776_v23 = vpop.permute.xlu0 %7775  ;;  %v11174_v33 = vsel %vm2485_vm7, %v2421_v55, %v11098_v58 }
 0x3cd   : > { %v7772_v4 = vunpack.i.l.bf16 %v7771_v1  ;;  %v7778_v59 = vunpack.i.h.bf16 %v7776_v23  ;;  %v7773_v9 = vunpack.i.h.bf16 %v7771_v1  ;;  %v7777_v7 = vunpack.i.l.bf16 %v7776_v23 }
 0x3ce   : > { %v2435_v60 = vsel %vm1881_vm2, %v2434_v15, %v2430_v47  ;;  %v1984_v39 = vsel %vm1888_vm3, %v1983_v25, %v1979_v3  ;;  %v2449_v58 = vsel %vm1874_vm1, %v2448_v44, %v2444_v11 }
 0x3cf   : > { %v1997_v41 = vrot.slane %v7772_v4, %v10152_v17  ;;  %v2116_v51 = vrot.slane %v7778_v59, %v10158_v21  ;;  %v2488_v52 = vsel %vm2487_vm8, %v1984_v39, %v11112_v27  ;;  %v2007_v0 = vrot.slane %v7773_v9, %v10147_v10 }
 0x3d0   : > { %v7781_v46 = vpop.permute.xlu1 %7780  ;;  %v7786_v38 = vpop.permute.xlu0 %7785  ;;  %v2011_v42 = vrot.slane %v7777_v7, %v10134_v63 }
 0x3d1   : > { %v7782_v50 = vunpack.i.l.bf16 %v7781_v46  ;;  %v7783_v49 = vunpack.i.h.bf16 %v7781_v46  ;;  %v7788_v8 = vunpack.i.h.bf16 %v7786_v38  ;;  %v7787_v14 = vunpack.i.l.bf16 %v7786_v38 }
 0x3d2   : > { %v1998_v36 = vsel %vm1881_vm2, %v1997_v41, %v1993_v28  ;;  %v2117_v31 = vsel %vm1888_vm3, %v2116_v51, %v2112_v48  ;;  %v2012_v62 = vsel %vm1874_vm1, %v2011_v42, %v2007_v0 }
 0x3d3   : > { %v2130_v34 = vrot.slane %v7782_v50, %v10152_v17  ;;  %v2140_v23 = vrot.slane %v7783_v49, %v10147_v10  ;;  %v2439_v2 = vrot.slane %v7788_v8, %v10158_v21  ;;  %v2144_v27 = vrot.slane %v7787_v14, %v10134_v63 }
 0x3d4   : > { %v7791_v22 = vpop.permute.xlu1 %7790  ;;  %v7796_v29 = vpop.permute.xlu0 %7795  ;;  %v2496_v13 = vsel %vm2485_vm7, %v2117_v31, %v2495_v6  ;;  %v12767_v6 = vld [vmem:[#allocation122_spill] sm:$0xff] }
 0x3d5   : > { %v7798_v5 = vunpack.i.h.bf16 %v7796_v29  ;;  %v7793_v32 = vunpack.i.h.bf16 %v7791_v22  ;;  %v7792_v37 = vunpack.i.l.bf16 %v7791_v22  ;;  %v7797_v30 = vunpack.i.l.bf16 %v7796_v29 }
 0x3d6   : > { %v2131_v24 = vsel %vm1881_vm2, %v2130_v34, %v2126_v45  ;;  %v2440_v38 = vsel %vm1888_vm3, %v2439_v2, %v2435_v60  ;;  %v2145_v59 = vsel %vm1874_vm1, %v2144_v27, %v2140_v23  ;;  %vm2522_vm11 = vcmp.lt.s32.totalorder %v12767_v6, 1 }
 0x3d7   : > { %v2002_v16 = vrot.slane %v7798_v5, %v10158_v21  ;;  %v2463_v43 = vrot.slane %v7793_v32, %v10147_v10  ;;  %v2453_v53 = vrot.slane %v7792_v37, %v10152_v17  ;;  %v2467_v19 = vrot.slane %v7797_v30, %v10134_v63 }
 0x3d8   : > { %v7801_v54 = vpop.permute.xlu1 %7800  ;;  %v7806_v35 = vpop.permute.xlu0 %7805  ;;  %vm2539_vm12 = vcmp.lt.s32.totalorder %v12767_v6, 7  ;;  %v2511_v31 = vsel %vm2487_vm8, %v2440_v38, %v11174_v33  ;;  %vm1347_vm13 = vcmp.gt.s32.totalorder %v12767_v6, 0 }
 0x3d9   : > { %v7802_v1 = vunpack.i.l.bf16 %v7801_v54  ;;  %v7803_v61 = vunpack.i.h.bf16 %v7801_v54  ;;  %v7807_v20 = vunpack.i.l.bf16 %v7806_v35  ;;  %v7808_v18 = vunpack.i.h.bf16 %v7806_v35 }
 0x3da   : > { %v2003_v26 = vsel %vm1888_vm3, %v2002_v16, %v1998_v36  ;;  %v2454_v47 = vsel %vm1881_vm2, %v2453_v53, %v2449_v58  ;;  %v2468_v3 = vsel %vm1874_vm1, %v2467_v19, %v2463_v43 }
 0x3db   : > { %v2016_v40 = vrot.slane %v7802_v1, %v10152_v17  ;;  %v2135_v15 = vrot.slane %v7803_v61, %v10158_v21  ;;  %v2149_v28 = vrot.slane %v7807_v20, %v10152_v17  ;;  %v2490_v48 = vsel %vm2489_vm9, %v2003_v26, %v2488_v52 }
 0x3dc   : > { %v7811_v56 = vpop.permute.xlu1 %7810  ;;  %v7816_v57 = vpop.permute.xlu0 %7815  ;;  %v2159_v22 = vrot.slane %v7808_v18, %v10147_v10 }
 0x3dd   : > { %v7813_v55 = vunpack.i.h.bf16 %v7811_v56  ;;  %v7812_v46 = vunpack.i.l.bf16 %v7811_v56  ;;  %v7818_v25 = vunpack.i.h.bf16 %v7816_v57  ;;  %v7817_v4 = vunpack.i.l.bf16 %v7816_v57 }
 0x3de   : > { %v2017_v50 = vsel %vm1881_vm2, %v2016_v40, %v2012_v62  ;;  %v2136_v39 = vsel %vm1888_vm3, %v2135_v15, %v2131_v24  ;;  %v2150_v8 = vsel %vm1881_vm2, %v2149_v28, %v2145_v59 }
 0x3df   : > { %v2458_v45 = vrot.slane %v7813_v55, %v10158_v21  ;;  %v2163_v11 = vrot.slane %v7812_v46, %v10134_v63  ;;  %v2021_v44 = vrot.slane %v7818_v25, %v10158_v21  ;;  %v2472_v51 = vrot.slane %v7817_v4, %v10152_v17  ;;  %v7933_v4 = vld [vmem:[%s12055_s3 + $0x80] ss:$16 sps:$4 sm:$0xff]  }
 0x3e0   : > { %v7821_v9 = vpop.permute.xlu1 %7820  ;;  %v7826_v7 = vpop.permute.xlu0 %7825  ;;  %v2497_v34 = vsel %vm2487_vm8, %v2136_v39, %v2496_v13 }
 0x3e1   : > { %v7823_v29 = vunpack.i.h.bf16 %v7821_v9  ;;  %v7822_v60 = vunpack.i.l.bf16 %v7821_v9  ;;  %v2022_v41 = vsel %vm1888_vm3, %v2021_v44, %v2017_v50  ;;  %v7828_v49 = vunpack.i.h.bf16 %v7826_v7  ;;  %v7944_v50 = vld [vmem:[%s12055_s3 + $0xac] ss:$16 sps:$4 sm:$0xff]  }
 0x3e2   : > { %v7827_v58 = vunpack.i.l.bf16 %v7826_v7  ;;  %v2164_v32 = vsel %vm1874_vm1, %v2163_v11, %v2159_v22  ;;  %v2459_v37 = vsel %vm1888_vm3, %v2458_v45, %v2454_v47  ;;  %v2492_v30 = vsel %vm2491_vm10, %v2022_v41, %v2490_v48  ;;  %v7938_v48 = vld [vmem:[%s12055_s3 + $0xa4] ss:$16 sps:$4 sm:$0xff]   ;;  %v7939_v11 = vld [vmem:[%s12055_s3 + $0x88] ss:$16 sps:$4 sm:$0xff]  }
 0x3e3   : > { %v2168_v14 = vrot.slane %v7823_v29, %v10152_v17  ;;  %v2154_v5 = vrot.slane %v7822_v60, %v10158_v21  ;;  %v2173_v52 = vrot.slane %v7828_v49, %v10158_v21  ;;  %v2473_v16 = vsel %vm1881_vm2, %v2472_v51, %v2468_v3  ;;  %v7936_v51 = vld [vmem:[%s12055_s3 + $0xa0] ss:$16 sps:$4 sm:$0xff]  }
 0x3e4   : > { %v7831_v0 = vpop.permute.xlu1 %7830  ;;  %v7836_v42 = vpop.permute.xlu0 %7835  ;;  %v2477_v36 = vrot.slane %v7827_v58, %v10158_v21  ;;  %v2512_v2 = vsel %vm2489_vm9, %v2459_v37, %v2511_v31  ;;  %v2518_v27 = vrot.slane %v2492_v30, 7  ;;  %v2535_v53 = vrot.slane %v2492_v30, 1 }
 0x3e5   : > { %v2155_v54 = vsel %vm1888_vm3, %v2154_v5, %v2150_v8  ;;  %v2169_v35 = vsel %vm1881_vm2, %v2168_v14, %v2164_v32  ;;  %v7833_v40 = vunpack.i.h.bf16 %v7831_v0  ;;  %v7832_v55 = vunpack.i.l.bf16 %v7831_v0  ;;  %v7956_v14 = vld [vmem:[#allocation4 + $0x4] ss:$8 sps:$4 sm:$0xff]   ;;  %v7942_v32 = vld [vmem:[%s12055_s3 + $0xa8] ss:$16 sps:$4 sm:$0xff]  }
 0x3e6   : > { %v2498_v1 = vsel %vm2489_vm9, %v2155_v54, %v2497_v34  ;;  %v2174_v23 = vsel %vm1888_vm3, %v2173_v52, %v2169_v35  ;;  %v2478_v61 = vsel %vm1888_vm3, %v2477_v36, %v2473_v16  ;;  %v7838_v38 = vunpack.i.h.bf16 %v7836_v42  ;;  %v7947_v34 = vld [vmem:[#allocation4 + $0x204] ss:$8 sps:$4 sm:$0xff]  }
 0x3e7   : > { %v11236_v43 = vsel %vm2491_vm10, %v2174_v23, %v2498_v1  ;;  %v11239_v19 = vsel %vm2491_vm10, %v2478_v61, %v2512_v2  ;;  %v7837_v15 = vunpack.i.l.bf16 %v7836_v42  ;;  %v2182_v44 = vrot.slane %v7833_v40, %v10134_v63 }
 0x3e8   : > { %v2519_v33 = vrot.slane %v11236_v43, 7  ;;  %v2536_v20 = vrot.slane %v11236_v43, 1  ;;  %v7841_v62 = vpop.permute.xlu1 %7840  ;;  %v7846_v13 = vpop.permute.xlu0 %7845  ;;  %v2521_v24 = vrot.slane %v11239_v19, 7  ;;  %v2538_v18 = vrot.slane %v11239_v19, 1  ;;  %v7945_v43 = vld [vmem:[#allocation4 + $0x200] ss:$8 sps:$4 sm:$0xff]  }
 0x3e9   : > { %v7843_v3 = vunpack.i.h.bf16 %v7841_v62  ;;  %v7842_v45 = vunpack.i.l.bf16 %v7841_v62  ;;  %v7848_v9 = vunpack.i.h.bf16 %v7846_v13  ;;  %v7847_v7 = vunpack.i.l.bf16 %v7846_v13  ;;  %v7948_v19 = vld [vmem:[#allocation4 + $0x210] ss:$8 sps:$4 sm:$0xff]  }
 0x3ea   : > { %v2525_v56 = vsel %vm2522_vm11, %v2518_v27, %v2519_v33  ;;  %v11254_v57 = vsel %vm2539_vm12, %v2535_v53, %v2536_v20  ;;  %v2526_v26 = vsel %vm2522_vm11, %v2521_v24, %v2518_v27  ;;  %v11269_v59 = vsel %vm2539_vm12, %v2538_v18, %v2535_v53 }
 0x3eb   : > { %v2527_v46 = vsel %vm1347_vm13, %v2526_v26, 0.0  ;;  %v2178_v22 = vrot.slane %v7832_v55, %v10147_v10  ;;  %v2201_v29 = vrot.slane %v7838_v38, %v10134_v63  ;;  %v2197_v60 = vrot.slane %v7837_v15, %v10147_v10 }
 0x3ec   : > { %v7851_v25 = vpop.permute.xlu1 %7850  ;;  %v2548_v47 = vpack.c.bf16 %v2525_v56, %v2527_v46  ;;  %v7856_v28 = vpop.permute.xlu0 %7855  ;;  %v2206_v49 = vrot.slane %v7843_v3, %v10152_v17  ;;  %v2187_v5 = vrot.slane %v7842_v45, %v10152_v17  ;;  %v11297_v37 = vadd.s32 24, %v12767_v6 }
 0x3ed   : > { %v7853_v39 = vunpack.i.h.bf16 %v7851_v25  ;;  %v7852_v58 = vunpack.i.l.bf16 %v7851_v25  ;;  %v2220_v30 = vrot.slane %v7848_v9, %v10134_v63  ;;  %v2216_v52 = vrot.slane %v7847_v7, %v10147_v10 }
 0x3ee   : > { %6977 = vmatmul.mubr.msk.bf16.vlgmr.msra.gmra.mrb[0].mxu0 %vm675_vm0, %v2548_v47  ;;  %6979 = vmatmul.mubr.msk.bf16.vlgmr.msra.gmra.mrb[0].mxu1 %vm675_vm0, %v2548_v47  ;;  %v7858_v0 = vunpack.i.h.bf16 %v7856_v28  ;;  %v2183_v54 = vsel %vm1874_vm1, %v2182_v44, %v2178_v22  ;;  %v2202_v35 = vsel %vm1874_vm1, %v2201_v29, %v2197_v60  ;;  %v7857_v31 = vunpack.i.l.bf16 %v7856_v28 }
 0x3ef   : > { %4207 = vmatpush1.bf16.msra.mxu0 %v7933_v4  ;;  %4085 = vmatprep.mubr.bf16.mxu0 %v12617_v12  ;;  %v2211_v36 = vrot.slane %v7853_v39, %v10158_v21  ;;  %v2207_v1 = vsel %vm1881_vm2, %v2206_v49, %v2202_v35  ;;  %v2188_v53 = vsel %vm1881_vm2, %v2187_v5, %v2183_v54  ;;  %vm2534_vm14 = vcmp.lt.s32.totalorder %v11297_v37, 31  ;;  %v8191_v37 = vld [vmem:[#allocation4 + $0x520] ss:$8 sps:$4 sm:$0xff]  }
 0x3f0   : > { %v7861_v41 = vpop.permute.xlu1 %7860  ;;  %v7866_v8 = vpop.permute.xlu0 %7865  ;;  %4138 = vmatprep.mubr.bf16.mxu1 %v12617_v12  ;;  %4208 = vmatprep.subr.bf16.mxu0 %v7938_v48  ;;  %v2192_v62 = vrot.slane %v7852_v58, %v10158_v21  ;;  %v2221_v26 = vsel %vm1874_vm1, %v2220_v30, %v2216_v52  ;;  %v2235_v40 = vrot.slane %v7858_v0, %v10147_v10 }
 0x3f1   : > { %4260 = vmatpush1.bf16.msra.mxu1 %v7939_v11  ;;  %v7862_v42 = vunpack.i.l.bf16 %v7861_v41  ;;  %v7863_v23 = vunpack.i.h.bf16 %v7861_v41  ;;  %v7868_v2 = vunpack.i.h.bf16 %v7866_v8  ;;  %v7867_v13 = vunpack.i.l.bf16 %v7866_v8 }
 0x3f2   : > { %4261 = vmatprep.subr.bf16.mxu1 %v7944_v50  ;;  %v2212_v38 = vsel %vm1888_vm3, %v2211_v36, %v2207_v1  ;;  %v2225_v15 = vrot.slane %v7857_v31, %v10152_v17  ;;  %v2193_v44 = vsel %vm1888_vm3, %v2192_v62, %v2188_v53 }
 0x3f3   : > { %4209 = vmatpush1.bf16.msra.mxu0 %v7936_v51  ;;  %v2239_v55 = vrot.slane %v7862_v42, %v10134_v63  ;;  %v2230_v3 = vrot.slane %v7863_v23, %v10158_v21  ;;  %v2254_v28 = vrot.slane %v7868_v2, %v10147_v10  ;;  %v2244_v9 = vrot.slane %v7867_v13, %v10152_v17 }
 0x3f4   : > { %v7871_v16 = vpop.permute.xlu1 %7870  ;;  %v7876_v61 = vpop.permute.xlu0 %7875  ;;  %5369 = vmatprep.subr.bf16.mxu0 %v7956_v14  ;;  %v2226_v41 = vsel %vm1881_vm2, %v2225_v15, %v2221_v26  ;;  %v2500_v1 = vsel %vm2479_vm4, %v2212_v38, %v2193_v44 }
 0x3f5   : > { %v7872_v27 = vunpack.i.l.bf16 %v7871_v16  ;;  %v7877_v56 = vunpack.i.l.bf16 %v7876_v61  ;;  %4262 = vmatpush1.bf16.msra.mxu1 %v7942_v32  ;;  %v7873_v25 = vunpack.i.h.bf16 %v7871_v16  ;;  %v7878_v4 = vunpack.i.h.bf16 %v7876_v61 }
 0x3f6   : > { %4943 = vmatprep.subr.bf16.mxu1 %v7947_v34  ;;  %v2240_v22 = vsel %vm1874_vm1, %v2239_v55, %v2235_v40  ;;  %v2231_v5 = vsel %vm1888_vm3, %v2230_v3, %v2226_v41 }
 0x3f7   : > { %v2258_v46 = vrot.slane %v7872_v27, %v10134_v63  ;;  %v2263_v7 = vrot.slane %v7877_v56, %v10152_v17  ;;  %v2249_v51 = vrot.slane %v7873_v25, %v10158_v21  ;;  %v2273_v49 = vrot.slane %v7878_v4, %v10147_v10 }
 0x3f8   : > { %v7881_v47 = vpop.permute.xlu1 %7880  ;;  %v2245_v0 = vsel %vm1881_vm2, %v2244_v9, %v2240_v22  ;;  %v2501_v40 = vsel %vm2481_vm5, %v2231_v5, %v2500_v1  ;;  %v7966_v5 = vld [vmem:[#allocation4 + $0x20] ss:$8 sps:$4 sm:$0xff]   ;;  %v7992_v1 = vld [vmem:[#allocation4 + $0x64] ss:$8 sps:$4 sm:$0xff]  }
 0x3f9   : > { %v7883_v48 = vunpack.i.h.bf16 %v7881_v47  ;;  %v7882_v45 = vunpack.i.l.bf16 %v7881_v47  ;;  %v2259_v29 = vsel %vm1874_vm1, %v2258_v46, %v2254_v28  ;;  %v2250_v23 = vsel %vm1888_vm3, %v2249_v51, %v2245_v0  ;;  %v7980_v0 = vld [vmem:[#allocation4 + $0x44] ss:$8 sps:$4 sm:$0xff]  }
 0x3fa   : > { %v7886_v11 = vpop.permute.xlu0 %7885  ;;  %v2264_v42 = vsel %vm1881_vm2, %v2263_v7, %v2259_v29  ;;  %v2502_v15 = vsel %vm2483_vm6, %v2250_v23, %v2501_v40  ;;  %v2547_v29 = vsel %vm2534_vm14, %v11269_v59, 0.0  ;;  %v7975_v23 = vld [vmem:[#allocation4 + $0x260] ss:$8 sps:$4 sm:$0xff]  }
 0x3fb   : > { %v7887_v50 = vunpack.i.l.bf16 %v7886_v11  ;;  %v2277_v60 = vrot.slane %v7882_v45, %v10134_v63  ;;  %v7888_v39 = vunpack.i.h.bf16 %v7886_v11  ;;  %v2268_v8 = vrot.slane %v7883_v48, %v10158_v21  ;;  %v8002_v40 = vld [vmem:[#allocation4 + $0x80] ss:$8 sps:$4 sm:$0xff]  }
 0x3fc   : > { %v7891_v14 = vpop.permute.xlu1 %7890 }
 0x3fd   : > { %v2282_v58 = vrot.slane %v7887_v50, %v10152_v17  ;;  %v7893_v32 = vunpack.i.h.bf16 %v7891_v14  ;;  %v7892_v30 = vunpack.i.l.bf16 %v7891_v14  ;;  %v2278_v34 = vsel %vm1874_vm1, %v2277_v60, %v2273_v49  ;;  %v7951_v14 = vld [vmem:[#allocation4 + $0x220] ss:$8 sps:$4 sm:$0xff]  }
 0x3fe   : > { %v7896_v52 = vpop.permute.xlu0 %7895  ;;  %v2292_v35 = vrot.slane %v7888_v39, %v10147_v10  ;;  %v2269_v2 = vsel %vm1888_vm3, %v2268_v8, %v2264_v42  ;;  %v7968_v8 = vld [vmem:[#allocation4 + $0x24] ss:$8 sps:$4 sm:$0xff]   ;;  %v7963_v42 = vld [vmem:[#allocation4 + $0x240] ss:$8 sps:$4 sm:$0xff]  }
 0x3ff   : > { %v7897_v54 = vunpack.i.l.bf16 %v7896_v52  ;;  %v2287_v36 = vrot.slane %v7893_v32, %v10158_v21  ;;  %v2296_v31 = vrot.slane %v7892_v30, %v10134_v63  ;;  %v7898_v16 = vunpack.i.h.bf16 %v7896_v52  ;;  %v7974_v32 = vld [vmem:[#allocation4 + $0x34] ss:$8 sps:$4 sm:$0xff]   ;;  %v7972_v30 = vld [vmem:[#allocation4 + $0x30] ss:$8 sps:$4 sm:$0xff]   ;;  %v7965_v52 = vld [vmem:[#allocation4 + $0x244] ss:$8 sps:$4 sm:$0xff]  }
 0x400   : > { %v7901_v61 = vpop.permute.xlu1 %7900  ;;  %v2283_v53 = vsel %vm1881_vm2, %v2282_v58, %v2278_v34  ;;  %v2503_v3 = vsel %vm2485_vm7, %v2269_v2, %v2502_v15  ;;  %v7959_v58 = vld [vmem:[#allocation4 + $0x234] ss:$8 sps:$4 sm:$0xff]   ;;  %v7978_v34 = vld [vmem:[#allocation4 + $0x40] ss:$8 sps:$4 sm:$0xff]   ;;  %v8008_v15 = vld [vmem:[#allocation4 + $0x90] ss:$8 sps:$4 sm:$0xff]  }
 0x401   : > { %v2301_v27 = vrot.slane %v7897_v54, %v10152_v17  ;;  %v2297_v62 = vsel %vm1874_vm1, %v2296_v31, %v2292_v35  ;;  %v7903_v13 = vunpack.i.h.bf16 %v7901_v61  ;;  %v7902_v56 = vunpack.i.l.bf16 %v7901_v61  ;;  %v7971_v54 = vld [vmem:[#allocation4 + $0x254] ss:$8 sps:$4 sm:$0xff]   ;;  %v7984_v31 = vld [vmem:[#allocation4 + $0x50] ss:$8 sps:$4 sm:$0xff]   ;;  %v7990_v2 = vld [vmem:[#allocation4 + $0x60] ss:$8 sps:$4 sm:$0xff]  }
 0x402   : > { %v7906_v26 = vpop.permute.xlu0 %7905  ;;  %v2288_v55 = vsel %vm1888_vm3, %v2287_v36, %v2283_v53  ;;  %v2311_v25 = vrot.slane %v7898_v16, %v10147_v10  ;;  %v7986_v35 = vld [vmem:[#allocation4 + $0x54] ss:$8 sps:$4 sm:$0xff]   ;;  %v7969_v36 = vld [vmem:[#allocation4 + $0x250] ss:$8 sps:$4 sm:$0xff]   ;;  %v7977_v16 = vld [vmem:[#allocation4 + $0x264] ss:$8 sps:$4 sm:$0xff]  }
 0x403   : > { %v7908_v46 = vunpack.i.h.bf16 %v7906_v26  ;;  %v7907_v38 = vunpack.i.l.bf16 %v7906_v26  ;;  %v2306_v4 = vrot.slane %v7903_v13, %v10158_v21  ;;  %v2315_v47 = vrot.slane %v7902_v56, %v10134_v63  ;;  %v7998_v61 = vld [vmem:[#allocation4 + $0x74] ss:$8 sps:$4 sm:$0xff]   ;;  %v7981_v53 = vld [vmem:[#allocation4 + $0x270] ss:$8 sps:$4 sm:$0xff]   ;;  %v7989_v13 = vld [vmem:[#allocation4 + $0x284] ss:$8 sps:$4 sm:$0xff]  }
 0x404   : > { %v2302_v28 = vsel %vm1881_vm2, %v2301_v27, %v2297_v62  ;;  %v2504_v45 = vsel %vm2487_vm8, %v2288_v55, %v2503_v3  ;;  %v7983_v27 = vld [vmem:[#allocation4 + $0x274] ss:$8 sps:$4 sm:$0xff]   ;;  %v7996_v62 = vld [vmem:[#allocation4 + $0x70] ss:$8 sps:$4 sm:$0xff]   ;;  %v8004_v56 = vld [vmem:[#allocation4 + $0x84] ss:$8 sps:$4 sm:$0xff]  }
 0x405   : > { %v2320_v48 = vrot.slane %v7907_v38, %v10152_v17  ;;  %v2307_v11 = vsel %vm1888_vm3, %v2306_v4, %v2302_v28  ;;  %v2316_v44 = vsel %vm1874_vm1, %v2315_v47, %v2311_v25  ;;  %v2325_v9 = vrot.slane %v7908_v46, %v10158_v21  ;;  %v7987_v26 = vld [vmem:[#allocation4 + $0x280] ss:$8 sps:$4 sm:$0xff]   ;;  %v7995_v55 = vld [vmem:[#allocation4 + $0x294] ss:$8 sps:$4 sm:$0xff]   ;;  %v7993_v38 = vld [vmem:[#allocation4 + $0x290] ss:$8 sps:$4 sm:$0xff]  }
 0x406   : > { %v2505_v10 = vsel %vm2489_vm9, %v2307_v11, %v2504_v45  ;;  %v8010_v46 = vld [vmem:[#allocation4 + $0x94] ss:$8 sps:$4 sm:$0xff]   ;;  %v8001_v25 = vld [vmem:[#allocation4 + $0x2a4] ss:$8 sps:$4 sm:$0xff]   ;;  %v7999_v47 = vld [vmem:[#allocation4 + $0x2a0] ss:$8 sps:$4 sm:$0xff]  }
 0x407   : > { %v2321_v7 = vsel %vm1881_vm2, %v2320_v48, %v2316_v44  ;;  %v8016_v4 = vld [vmem:[#allocation4 + $0xa4] ss:$8 sps:$4 sm:$0xff]   ;;  %v8014_v3 = vld [vmem:[#allocation4 + $0xa0] ss:$8 sps:$4 sm:$0xff]   ;;  %v8007_v28 = vld [vmem:[#allocation4 + $0x2b4] ss:$8 sps:$4 sm:$0xff]  }
 0x408   : > { %v2326_v63 = vsel %vm1888_vm3, %v2325_v9, %v2321_v7  ;;  %v8005_v48 = vld [vmem:[#allocation4 + $0x2b0] ss:$8 sps:$4 sm:$0xff]   ;;  %v8013_v45 = vld [vmem:[#allocation4 + $0x2c4] ss:$8 sps:$4 sm:$0xff]   ;;  %v8011_v11 = vld [vmem:[#allocation4 + $0x2c0] ss:$8 sps:$4 sm:$0xff]  }
 0x409   : > { %v2506_v50 = vsel %vm2491_vm10, %v2326_v63, %v2505_v10  ;;  %v8019_v44 = vld [vmem:[#allocation4 + $0x2d4] ss:$8 sps:$4 sm:$0xff]   ;;  %v8017_v9 = vld [vmem:[#allocation4 + $0x2d0] ss:$8 sps:$4 sm:$0xff]   ;;  %v8023_v63 = vld [vmem:[#allocation4 + $0x2e0] ss:$8 sps:$4 sm:$0xff]  }
 0x40a   : > { %v2520_v22 = vrot.slane %v2506_v50, 7  ;;  %v2537_v17 = vrot.slane %v2506_v50, 1  ;;  %v8020_v10 = vld [vmem:[#allocation4 + $0xb0] ss:$8 sps:$4 sm:$0xff]   ;;  %v8022_v7 = vld [vmem:[#allocation4 + $0xb4] ss:$8 sps:$4 sm:$0xff]   ;;  %vm11561_vm1 = vmpackc.low %vm8365_vm15, %vm1347_vm13 }
 0x40b   : > { %v8025_v50 = vld [vmem:[#allocation4 + $0x2e4] ss:$8 sps:$4 sm:$0xff]   ;;  %vm11735_vm2 = vmpackc.low %vm2534_vm14, %vm8365_vm15  ;;  %vm8367_vm3 = vmmov 0  }
 0x40c   : > { %v2541_v21 = vsel %vm2539_vm12, %v2536_v20, %v2537_v17  ;;  %v2523_v60 = vsel %vm2522_vm11, %v2520_v22, %v2521_v24  ;;  %v2524_v39 = vsel %vm2522_vm11, %v2519_v33, %v2520_v22  ;;  %v2540_v59 = vsel %vm2539_vm12, %v2537_v17, %v2538_v18  ;;  %v7954_v20 = vld [vmem:[#allocation4] ss:$8 sps:$4 sm:$0xff]   ;;  %v7950_v33 = vld [vmem:[#allocation4 + $0x214] ss:$8 sps:$4 sm:$0xff]   ;;  %v7960_v18 = vld [vmem:[#allocation4 + $0x10] ss:$8 sps:$4 sm:$0xff]  }
 0x40d   : > { %v4149_v41 = vpack.c.bf16 %v2541_v21, %v11254_v57  ;;  %v2549_v51 = vpack.c.bf16 %v2523_v60, %v2524_v39  ;;  %v4150_v49 = vpack.c.bf16 %v2547_v29, %v2540_v59  ;;  %v7962_v24 = vld [vmem:[#allocation4 + $0x14] ss:$8 sps:$4 sm:$0xff]   ;;  %v7953_v57 = vld [vmem:[#allocation4 + $0x224] ss:$8 sps:$4 sm:$0xff]   ;;  %v8026_v22 = vld [vmem:[#allocation4 + $0xc0] ss:$8 sps:$4 sm:$0xff]  }
 0x40e   : > { %v8028_v17 = vld [vmem:[#allocation4 + $0xc4] ss:$8 sps:$4 sm:$0xff]   ;;  %v8031_v29 = vld [vmem:[#allocation4 + $0x2f4] ss:$8 sps:$4 sm:$0xff]   ;;  %v8029_v21 = vld [vmem:[#allocation4 + $0x2f0] ss:$8 sps:$4 sm:$0xff]  }
 0x40f   : > { %6978 = vmatmul.mubr.msk.bf16.gmra.mrb[4].mxu0 %vm675_vm0, %v2549_v51  ;;  %6980 = vmatmul.mubr.msk.bf16.gmra.mrb[4].mxu1 %vm675_vm0, %v2549_v51  ;;  %v8032_v60 = vld [vmem:[#allocation4 + $0xd0] ss:$8 sps:$4 sm:$0xff]   ;;  %v8034_v39 = vld [vmem:[#allocation4 + $0xd4] ss:$8 sps:$4 sm:$0xff]   ;;  %v8037_v59 = vld [vmem:[#allocation4 + $0x304] ss:$8 sps:$4 sm:$0xff]  }
 0x410   : > { %4238 = vmatprep.mubr.bf16.mxu0 %v12617_v12  ;;  %4291 = vmatprep.mubr.bf16.mxu1 %v12617_v12  ;;  %v8040_v51 = vld [vmem:[#allocation4 + $0xe4] ss:$8 sps:$4 sm:$0xff]  }
 0x417   : > { %6997 = vmatmul.mubr.msk.bf16.vlgmr.msra.gmra.mrb[0].mxu0 %vm675_vm0, %v4149_v41  ;;  %6999 = vmatmul.mubr.msk.bf16.vlgmr.msra.gmra.mrb[0].mxu1 %vm675_vm0, %v4149_v41  ;;  %v8038_v41 = vld [vmem:[#allocation4 + $0xe0] ss:$8 sps:$4 sm:$0xff]  }
 0x418   : > { %4248 = vmatprep.mubr.bf16.mxu0 %v12617_v12  ;;  %4301 = vmatprep.mubr.bf16.mxu1 %v12617_v12  ;;  %v7957_v12 = vld [vmem:[#allocation4 + $0x230] ss:$8 sps:$4 sm:$0xff]  }
 0x419   : > { %4944 = vmatpush1.bf16.msra.mxu1 %v7945_v43  ;;  %5370 = vmatpush1.bf16.msra.mxu0 %v7954_v20  ;;  %v8044_v43 = vld [vmem:[#allocation4 + $0xf0] ss:$8 sps:$4 sm:$0xff]   ;;  %v8052_v20 = vld [vmem:[#allocation4 + $0x104] ss:$8 sps:$4 sm:$0xff]  }
 0x41a   : > { %4945 = vmatprep.subr.bf16.mxu1 %v7950_v33  ;;  %5371 = vmatprep.subr.bf16.mxu0 %v7962_v24  ;;  %v12215_v33 = vsub.s32 0, %v12767_v6  ;;  %v4339_v24 = vsub.s32 2, %v12767_v6 }
 0x41d   : > { %4946 = vmatpush1.bf16.msra.mxu1 %v7948_v19  ;;  %5372 = vmatpush1.bf16.msra.mxu0 %v7960_v18  ;;  %v1341_v19 = vld [vmem:[%s12056_s4] sm:$0xf]  ;;  %v12214_v18 = vsub.s32 1, %v12767_v6 }
 0x41e   : > { %4947 = vmatprep.subr.bf16.mxu1 %v7953_v57  ;;  %5373 = vmatprep.subr.bf16.mxu0 %v7968_v8  ;;  %v4343_v57 = vsub.s32 3, %v12767_v6  ;;  %v4332_v8 = vrot.slane %v1341_v19, %v12215_v33  ;;  %v8055_v33 = vld [vmem:[#allocation4 + $0x334] ss:$8 sps:$4 sm:$0xff]  }
 0x41f   : > { %6998 = vmatmul.mubr.msk.bf16.gmra.mrb[4].mxu0 %vm675_vm0, %v4150_v49  ;;  %7000 = vmatmul.mubr.msk.bf16.gmra.mrb[4].mxu1 %vm675_vm0, %v4150_v49  ;;  %v8046_v49 = vld [vmem:[#allocation4 + $0xf4] ss:$8 sps:$4 sm:$0xff]  }
 0x421   : > { %4948 = vmatpush1.bf16.msra.mxu1 %v7951_v14  ;;  %5374 = vmatpush1.bf16.msra.mxu0 %v7966_v5  ;;  %v4340_v14 = vrot.slane %v1341_v19, %v4339_v24  ;;  %v11398_v5 = vrot.slane %v1341_v19, %v12214_v18 }
 0x422   : > { %4949 = vmatprep.subr.bf16.mxu1 %v7959_v58  ;;  %5375 = vmatprep.subr.bf16.mxu0 %v7974_v32  ;;  %v11400_v58 = vrot.slane %v1341_v19, %v4343_v57 }
 0x425   : > { %4950 = vmatpush1.bf16.msra.mxu1 %v7957_v12  ;;  %5376 = vmatpush1.bf16.msra.mxu0 %v7972_v30 }
 0x426   : > { %4951 = vmatprep.subr.bf16.mxu1 %v7965_v52  ;;  %5377 = vmatprep.subr.bf16.mxu0 %v7980_v0 }
 0x429   : > { %4952 = vmatpush1.bf16.msra.mxu1 %v7963_v42  ;;  %5378 = vmatpush1.bf16.msra.mxu0 %v7978_v34 }
 0x42a   : > { %4953 = vmatprep.subr.bf16.mxu1 %v7971_v54  ;;  %5379 = vmatprep.subr.bf16.mxu0 %v7986_v35 }
 0x42d   : > { %4954 = vmatpush1.bf16.msra.mxu1 %v7969_v36  ;;  %5380 = vmatpush1.bf16.msra.mxu0 %v7984_v31 }
 0x42e   : > { %4955 = vmatprep.subr.bf16.mxu1 %v7977_v16  ;;  %5381 = vmatprep.subr.bf16.mxu0 %v7992_v1 }
 0x431   : > { %4956 = vmatpush1.bf16.msra.mxu1 %v7975_v23  ;;  %5382 = vmatpush1.bf16.msra.mxu0 %v7990_v2 }
 0x432   : > { %4957 = vmatprep.subr.bf16.mxu1 %v7983_v27  ;;  %5383 = vmatprep.subr.bf16.mxu0 %v7998_v61 }
 0x435   : > { %4958 = vmatpush1.bf16.msra.mxu1 %v7981_v53  ;;  %5384 = vmatpush1.bf16.msra.mxu0 %v7996_v62 }
 0x436   : > { %4959 = vmatprep.subr.bf16.mxu1 %v7989_v13  ;;  %5385 = vmatprep.subr.bf16.mxu0 %v8004_v56 }
 0x439   : > { %4960 = vmatpush1.bf16.msra.mxu1 %v7987_v26  ;;  %5386 = vmatpush1.bf16.msra.mxu0 %v8002_v40 }
 0x43a   : > { %4961 = vmatprep.subr.bf16.mxu1 %v7995_v55  ;;  %5387 = vmatprep.subr.bf16.mxu0 %v8010_v46 }
 0x43d   : > { %4962 = vmatpush1.bf16.msra.mxu1 %v7993_v38  ;;  %5388 = vmatpush1.bf16.msra.mxu0 %v8008_v15 }
 0x43e   : > { %4963 = vmatprep.subr.bf16.mxu1 %v8001_v25  ;;  %5389 = vmatprep.subr.bf16.mxu0 %v8016_v4 }
 0x441   : > { %4964 = vmatpush1.bf16.msra.mxu1 %v7999_v47  ;;  %5390 = vmatpush1.bf16.msra.mxu0 %v8014_v3 }
 0x442   : > { %4965 = vmatprep.subr.bf16.mxu1 %v8007_v28  ;;  %5391 = vmatprep.subr.bf16.mxu0 %v8022_v7 }
 0x445   : > { %4966 = vmatpush1.bf16.msra.mxu1 %v8005_v48  ;;  %5392 = vmatpush1.bf16.msra.mxu0 %v8020_v10 }
 0x446   : > { %4967 = vmatprep.subr.bf16.mxu1 %v8013_v45  ;;  %5393 = vmatprep.subr.bf16.mxu0 %v8028_v17 }
 0x449   : > { %4968 = vmatpush1.bf16.msra.mxu1 %v8011_v11  ;;  %5394 = vmatpush1.bf16.msra.mxu0 %v8026_v22 }
 0x44a   : > { %4969 = vmatprep.subr.bf16.mxu1 %v8019_v44  ;;  %5395 = vmatprep.subr.bf16.mxu0 %v8034_v39 }
 0x44d   : > { %4970 = vmatpush1.bf16.msra.mxu1 %v8017_v9  ;;  %5396 = vmatpush1.bf16.msra.mxu0 %v8032_v60 }
 0x44e   : > { %4971 = vmatprep.subr.bf16.mxu1 %v8025_v50  ;;  %5397 = vmatprep.subr.bf16.mxu0 %v8040_v51 }
 0x451   : > { %4972 = vmatpush1.bf16.msra.mxu1 %v8023_v63  ;;  %5398 = vmatpush1.bf16.msra.mxu0 %v8038_v41 }
 0x452   : > { %4973 = vmatprep.subr.bf16.mxu1 %v8031_v29  ;;  %5399 = vmatprep.subr.bf16.mxu0 %v8046_v49 }
 0x455   : > { %4974 = vmatpush1.bf16.msra.mxu1 %v8029_v21  ;;  %5400 = vmatpush1.bf16.msra.mxu0 %v8044_v43 }
 0x456   : > { %4996 = vmatprep.subr.bf16.mxu1 %v8037_v59  ;;  %5422 = vmatprep.subr.bf16.mxu0 %v8052_v20 }
 0x4ea   : > { %v4240_v32 = vpop.f32.mrb[0].mxu0  ;;  %v4293_v12 = vpop.f32.mrb[0].mxu1 }
 0x4eb   : > { %v4349_v30 = vadd.f32 %v4332_v8, %v4240_v32  ;;  %v4351_v52 = vadd.f32 %v4340_v14, %v4293_v12  ;;  %v4242_v0 = vpop.f32.mrb[1].mxu0  ;;  %v4295_v42 = vpop.f32.mrb[1].mxu1 }
 0x4ec   : > { %v4350_v34 = vadd.f32 %v11398_v5, %v4242_v0  ;;  %v4352_v54 = vadd.f32 %v11400_v58, %v4295_v42  ;;  %v4244_v35 = vpop.f32.mrb[2].mxu0  ;;  %v4297_v36 = vpop.f32.mrb[2].mxu1 }
 0x4ed   : > { %v11404_v31 = vmax.f32 %v4349_v30, 0.0  ;;  %v11406_v16 = vmax.f32 %v4351_v52, 0.0  ;;  %v4353_v1 = vadd.f32 %v4332_v8, %v4244_v35  ;;  %v4355_v23 = vadd.f32 %v4340_v14, %v4297_v36  ;;  %v4246_v2 = vpop.f32.mrb[3].mxu0  ;;  %v4299_v27 = vpop.f32.mrb[3].mxu1 }
 0x4ee   : > { %v11408_v61 = vmax.f32 %v4350_v34, 0.0  ;;  %v11410_v53 = vmax.f32 %v4352_v54, 0.0  ;;  %v4354_v62 = vadd.f32 %v11398_v5, %v4246_v2  ;;  %v4356_v26 = vadd.f32 %v11400_v58, %v4299_v27  ;;  %v8035_v34 = vld [vmem:[#allocation4 + $0x300] ss:$8 sps:$4 sm:$0xff]  }
 0x4ef   : > { %v4382_v13 = vrot.slane %v11404_v31, 7  ;;  %v4430_v56 = vrot.slane %v11404_v31, 1  ;;  %v4384_v40 = vrot.slane %v11406_v16, 7  ;;  %v11417_v55 = vmax.f32 %v4353_v1, 0.0 }
 0x4f0   : > { %v11419_v46 = vmax.f32 %v4355_v23, 0.0  ;;  %v11421_v38 = vmax.f32 %v4354_v62, 0.0  ;;  %v4432_v15 = vrot.slane %v11406_v16, 1  ;;  %v4383_v25 = vrot.slane %v11408_v61, 7 }
 0x4f1   : > { %v4431_v4 = vrot.slane %v11408_v61, 1  ;;  %v4385_v47 = vrot.slane %v11410_v53, 7  ;;  %v4386_v48 = vrot.slane %v11417_v55, 7  ;;  %v4434_v45 = vrot.slane %v11417_v55, 1 }
 0x4f2   : > { %v4250_v3 = vpop.f32.mrb[4].mxu0  ;;  %v4303_v28 = vpop.f32.mrb[4].mxu1  ;;  %v4550_v11 = vpack.c.bf16 %v11417_v55, %v11404_v31  ;;  %v4388_v44 = vrot.slane %v11419_v46, 7  ;;  %v4433_v7 = vrot.slane %v11410_v53, 1  ;;  %v4436_v63 = vrot.slane %v11419_v46, 1  ;;  %v8271_v55 = vld [vmem:[%s12059_s7 + $0x158] sm:$0xff]  }
 0x4f3   : > { %v4252_v9 = vpop.f32.mrb[5].mxu0  ;;  %v4305_v10 = vpop.f32.mrb[5].mxu1  ;;  %v4552_v50 = vpack.c.bf16 %v11419_v46, %v11406_v16  ;;  %v11436_v22 = vmax.f32 %v4356_v26, 0.0  ;;  %v11444_v21 = vsel %vm2522_vm11, %v4382_v13, %v4386_v48  ;;  %v11450_v60 = vsel %vm2539_vm12, %v4430_v56, %v4434_v45  ;;  %v8067_v31 = vld [vmem:[#allocation4 + $0x354] ss:$8 sps:$4 sm:$0xff]  }
 0x4f4   : > { %v4254_v17 = vpop.f32.mrb[6].mxu0  ;;  %v4307_v29 = vpop.f32.mrb[6].mxu1  ;;  %v11458_v39 = vsel %vm2522_vm11, %v4384_v40, %v4388_v44  ;;  %v4387_v59 = vrot.slane %v11421_v38, 7  ;;  %v11465_v49 = vsel %vm2539_vm12, %v4432_v15, %v4436_v63  ;;  %v4435_v43 = vrot.slane %v11421_v38, 1  ;;  %v8142_v16 = vld [vmem:[#allocation4 + $0x414] ss:$8 sps:$4 sm:$0xff]  }
 0x4f5   : > { %v4256_v41 = vpop.f32.mrb[7].mxu0  ;;  %v4309_v51 = vpop.f32.mrb[7].mxu1  ;;  %v4357_v20 = vadd.f32 %v4332_v8, %v4250_v3  ;;  %v4359_v24 = vadd.f32 %v4340_v14, %v4303_v28  ;;  %v4358_v19 = vadd.f32 %v11398_v5, %v4252_v9  ;;  %v4360_v57 = vadd.f32 %v11400_v58, %v4305_v10  ;;  %v8140_v46 = vld [vmem:[#allocation4 + $0x410] ss:$8 sps:$4 sm:$0xff]  }
 0x4f6   : > { %v4361_v32 = vadd.f32 %v4332_v8, %v4254_v17  ;;  %v4363_v12 = vadd.f32 %v4340_v14, %v4307_v29  ;;  %v4389_v30 = vrot.slane %v11436_v22, 7  ;;  %v4551_v42 = vpack.c.bf16 %v11421_v38, %v11408_v61  ;;  %v8043_v8 = vld [vmem:[#allocation4 + $0x314] ss:$8 sps:$4 sm:$0xff]   ;;  %v8041_v29 = vld [vmem:[#allocation4 + $0x310] ss:$8 sps:$4 sm:$0xff]  }
 0x4f7   : > { %v11471_v52 = vmax.f32 %v4357_v20, 0.0  ;;  %v11473_v0 = vmax.f32 %v4359_v24, 0.0  ;;  %v11477_v54 = vmax.f32 %v4358_v19, 0.0  ;;  %v11479_v35 = vmax.f32 %v4360_v57, 0.0  ;;  %v8049_v24 = vld [vmem:[#allocation4 + $0x324] ss:$8 sps:$4 sm:$0xff]  }
 0x4f8   : > { %v11481_v36 = vmax.f32 %v4361_v32, 0.0  ;;  %v11483_v1 = vmax.f32 %v4363_v12, 0.0  ;;  %v4437_v14 = vrot.slane %v11436_v22, 1  ;;  %4975 = vmatprep.mubr.bf16.mxu1 %v4551_v42  ;;  %v4362_v27 = vadd.f32 %v11398_v5, %v4256_v41  ;;  %v8056_v38 = vld [vmem:[#allocation4 + $0x110] ss:$8 sps:$4 sm:$0xff]  }
 0x4f9   : > { %v4438_v23 = vrot.slane %v11471_v52, 1  ;;  %v4440_v2 = vrot.slane %v11473_v0, 1  ;;  %v4390_v62 = vrot.slane %v11471_v52, 7  ;;  %v4392_v26 = vrot.slane %v11473_v0, 7  ;;  %4976 = vmatmul.mubr.bf16.vlgmr.msra.gmra.mrb[8].mxu1 %v4550_v11  ;;  %v8059_v61 = vld [vmem:[#allocation4 + $0x340] ss:$8 sps:$4 sm:$0xff]  }
 0x4fa   : > { %v4391_v3 = vrot.slane %v11477_v54, 7  ;;  %v4439_v28 = vrot.slane %v11477_v54, 1  ;;  %v4393_v10 = vrot.slane %v11479_v35, 7  ;;  %v4394_v17 = vrot.slane %v11481_v36, 7  ;;  %4997 = vmatpush1.bf16.msra.mxu1 %v8035_v34 }
 0x4fb   : > { %v11497_v9 = vsel %vm2539_vm12, %v4434_v45, %v4438_v23  ;;  %v11503_v5 = vsel %vm2539_vm12, %v4436_v63, %v4440_v2  ;;  %v4441_v45 = vrot.slane %v11479_v35, 1  ;;  %v4396_v20 = vrot.slane %v11483_v1, 7  ;;  %4998 = vmatprep.subr.bf16.mxu1 %v8043_v8 }
 0x4fc   : > { %v5475_v11 = vpack.c.bf16 %v11497_v9, %v11450_v60  ;;  %v5477_v41 = vpack.c.bf16 %v11503_v5, %v11465_v49  ;;  %v4410_v63 = vsel %vm2522_vm11, %v4394_v17, %v4382_v13  ;;  %v4378_v19 = vmax.f32 %v4362_v27, 0.0  ;;  %v8047_v27 = vld [vmem:[#allocation4 + $0x320] ss:$8 sps:$4 sm:$0xff]   ;;  %v8194_v60 = vld [vmem:[#allocation4 + $0x530] ss:$8 sps:$4 sm:$0xff]  }
 0x4fd   : > { %v4364_v57 = vadd.f32 %v11400_v58, %v4309_v51  ;;  %v4554_v32 = vpack.c.bf16 %v11481_v36, %v11471_v52  ;;  %v7133_v12 = vpack.c.bf16 %v11444_v21, %v4410_v63  ;;  %v11525_v42 = vsel %vm2522_vm11, %v4396_v20, %v4384_v40  ;;  %v8199_v9 = vld [vmem:[#allocation4 + $0x544] ss:$8 sps:$4 sm:$0xff]  }
 0x4fe   : > { %v4553_v34 = vpack.c.bf16 %v11436_v22, %v11410_v53  ;;  %v4407_v13 = vsel %vm2522_vm11, %v4383_v25, %v4387_v59  ;;  %v4442_v58 = vrot.slane %v11481_v36, 1  ;;  %v7139_v51 = vpack.c.bf16 %v11458_v39, %v11525_v42  ;;  %4999 = vmatpush1.bf16.msra.mxu1 %v8041_v29  ;;  %v8062_v53 = vld [vmem:[#allocation4 + $0x120] ss:$8 sps:$4 sm:$0xff]   ;;  %v8146_v39 = vld [vmem:[#allocation4 + $0x430] ss:$8 sps:$4 sm:$0xff]  }
 0x4ff   : > { %v4395_v21 = vrot.slane %v4378_v19, 7  ;;  %v11536_v8 = vmax.f32 %v4364_v57, 0.0  ;;  %v4555_v40 = vpack.c.bf16 %v4378_v19, %v11477_v54  ;;  %5000 = vmatprep.subr.bf16.mxu1 %v8049_v24  ;;  %v4403_v63 = vsel %vm2522_vm11, %v4387_v59, %v4391_v3  ;;  %v8149_v42 = vld [vmem:[#allocation4 + $0x440] ss:$8 sps:$4 sm:$0xff]  }
 0x500   : > { %v11543_v18 = vsel %vm2522_vm11, %v4390_v62, %v4394_v17  ;;  %v11549_v36 = vsel %vm2522_vm11, %v4386_v48, %v4390_v62  ;;  %v4443_v57 = vrot.slane %v4378_v19, 1  ;;  %v11651_v54 = vsel %vm2539_vm12, %v4438_v23, %v4442_v58 }
 0x501   : > { %v4397_v29 = vrot.slane %v11536_v8, 7  ;;  %v4411_v24 = vsel %vm2522_vm11, %v4395_v21, %v4383_v25  ;;  %v4399_v59 = vsel %vm2522_vm11, %v4391_v3, %v4395_v21  ;;  %4985 = vmatprep.mubr.bf16.mxu1 %v4555_v40  ;;  %v4482_v17 = vpack.c.bf16 %v11543_v18, %v11549_v36  ;;  %v8050_v3 = vld [vmem:[#allocation4 + $0x100] ss:$8 sps:$4 sm:$0xff]  }
 0x502   : > { %v7130_v48 = vpack.c.bf16 %v4407_v13, %v4411_v24  ;;  %v4483_v62 = vpack.c.bf16 %v4399_v59, %v4403_v63  ;;  %v4409_v25 = vsel %vm2522_vm11, %v4385_v47, %v4389_v30  ;;  %4986 = vmatmul.mubr.bf16.gmra.mrb[12].mxu1 %v4554_v32  ;;  %v4557_v13 = vpack.c.bf16 %v11536_v8, %v11479_v35  ;;  %v8053_v32 = vld [vmem:[#allocation4 + $0x330] ss:$8 sps:$4 sm:$0xff]   ;;  %v8058_v63 = vld [vmem:[#allocation4 + $0x114] ss:$8 sps:$4 sm:$0xff]  }
 0x503   : > { %v4413_v19 = vsel %vm2522_vm11, %v4397_v29, %v4385_v47  ;;  %v4556_v18 = vpack.c.bf16 %v11483_v1, %v11473_v0  ;;  %v11583_v21 = vsel %vm2522_vm11, %v4393_v10, %v4397_v29  ;;  %v4444_v40 = vrot.slane %v11483_v1, 1  ;;  %5001 = vmatpush1.bf16.msra.mxu1 %v8047_v27  ;;  %5028 = vmatprep.mubr.bf16.mxu1 %v4553_v34  ;;  %v8061_v34 = vld [vmem:[#allocation4 + $0x344] ss:$8 sps:$4 sm:$0xff]   ;;  %v8143_v0 = vld [vmem:[#allocation4 + $0x420] ss:$8 sps:$4 sm:$0xff]  }
 0x504   : > { %v7136_v36 = vpack.c.bf16 %v4409_v25, %v4413_v19  ;;  %v11590_v47 = vsel %vm2522_vm11, %v4389_v30, %v4393_v10  ;;  %v11596_v24 = vsel %vm2522_vm11, %v4392_v26, %v4396_v20  ;;  %v4445_v29 = vrot.slane %v11536_v8, 1  ;;  %7131 = vmatprep.mubr.msk.bf16.mxu0 %vm11561_vm1, %v7130_v48  ;;  %5002 = vmatprep.subr.bf16.mxu1 %v8055_v33  ;;  %v8065_v48 = vld [vmem:[#allocation4 + $0x350] ss:$8 sps:$4 sm:$0xff]   ;;  %v8073_v25 = vld [vmem:[#allocation4 + $0x364] ss:$8 sps:$4 sm:$0xff]  }
 0x505   : > { %v4485_v27 = vpack.c.bf16 %v11583_v21, %v11590_v47  ;;  %v11609_v30 = vsel %vm2522_vm11, %v4388_v44, %v4392_v26  ;;  %v11617_v10 = vsel %vm2539_vm12, %v4435_v43, %v4439_v28  ;;  %7134 = vmatmul.mubr.msk.bf16.vlgmr.msra.gmra.mrb[8].mxu0 %vm11561_vm1, %v7133_v12  ;;  %v11629_v44 = vsel %vm2539_vm12, %v4431_v4, %v4435_v43  ;;  %v8079_v19 = vld [vmem:[#allocation4 + $0x374] ss:$8 sps:$4 sm:$0xff]   ;;  %v8151_v1 = vld [vmem:[#allocation4 + $0x444] ss:$8 sps:$4 sm:$0xff]   ;;  %v8152_v8 = vld [vmem:[#allocation4 + $0x450] ss:$8 sps:$4 sm:$0xff]  }
 0x506   : > { %v4484_v33 = vpack.c.bf16 %v11596_v24, %v11609_v30  ;;  %v11635_v26 = vsel %vm2539_vm12, %v4439_v28, %v4443_v57  ;;  %v11641_v20 = vsel %vm2539_vm12, %v4443_v57, %v4431_v4  ;;  %5423 = vmatpush1.bf16.msra.mxu0 %v8050_v3  ;;  %5411 = vmatprep.mubr.bf16.mxu0 %v4483_v62  ;;  %v8064_v4 = vld [vmem:[#allocation4 + $0x124] ss:$8 sps:$4 sm:$0xff]   ;;  %v8070_v62 = vld [vmem:[#allocation4 + $0x134] ss:$8 sps:$4 sm:$0xff]   ;;  %v8158_v47 = vld [vmem:[#allocation4 + $0x470] ss:$8 sps:$4 sm:$0xff]  }
 0x507   : > { %v5476_v12 = vpack.c.bf16 %v11617_v10, %v11629_v44  ;;  %v7206_v43 = vpack.c.bf16 %v11641_v20, %v11635_v26  ;;  %5003 = vmatpush1.bf16.msra.mxu1 %v8053_v32  ;;  %5424 = vmatprep.subr.bf16.mxu0 %v8058_v63  ;;  %v11657_v28 = vsel %vm2539_vm12, %v4442_v58, %v4430_v56  ;;  %v8076_v3 = vld [vmem:[#allocation4 + $0x144] ss:$8 sps:$4 sm:$0xff]   ;;  %v8077_v32 = vld [vmem:[#allocation4 + $0x370] ss:$8 sps:$4 sm:$0xff]   ;;  %v8082_v63 = vld [vmem:[#allocation4 + $0x154] ss:$8 sps:$4 sm:$0xff]  }
 0x508   : > { %v11665_v52 = vsel %vm2539_vm12, %v4437_v14, %v4441_v45  ;;  %v11673_v23 = vsel %vm2539_vm12, %v4433_v7, %v4437_v14  ;;  %5004 = vmatprep.subr.bf16.mxu1 %v8061_v34  ;;  %v7209_v56 = vpack.c.bf16 %v11657_v28, %v11651_v54  ;;  %v11683_v57 = vsel %vm2539_vm12, %v4441_v45, %v4445_v29  ;;  %v8088_v34 = vld [vmem:[#allocation4 + $0x164] ss:$8 sps:$4 sm:$0xff]   ;;  %v8148_v35 = vld [vmem:[#allocation4 + $0x434] ss:$8 sps:$4 sm:$0xff]   ;;  %v8164_v10 = vld [vmem:[#allocation4 + $0x490] ss:$8 sps:$4 sm:$0xff]  }
 0x509   : > { %v5478_v58 = vpack.c.bf16 %v11665_v52, %v11673_v23  ;;  %v11689_v22 = vsel %vm2539_vm12, %v4445_v29, %v4433_v7  ;;  %v11697_v59 = vsel %vm2539_vm12, %v4440_v2, %v4444_v40  ;;  %v11703_v45 = vsel %vm2539_vm12, %v4444_v40, %v4432_v15  ;;  %v8068_v2 = vld [vmem:[#allocation4 + $0x130] ss:$8 sps:$4 sm:$0xff]   ;;  %v8071_v15 = vld [vmem:[#allocation4 + $0x360] ss:$8 sps:$4 sm:$0xff]   ;;  %v8085_v29 = vld [vmem:[#allocation4 + $0x384] ss:$8 sps:$4 sm:$0xff]  }
 0x50a   : > { %v7212_v14 = vpack.c.bf16 %v11689_v22, %v11683_v57  ;;  %5425 = vmatpush1.bf16.msra.mxu0 %v8056_v38  ;;  %v7215_v7 = vpack.c.bf16 %v11703_v45, %v11697_v59  ;;  %v8074_v40 = vld [vmem:[#allocation4 + $0x140] ss:$8 sps:$4 sm:$0xff]   ;;  %v8091_v38 = vld [vmem:[#allocation4 + $0x394] ss:$8 sps:$4 sm:$0xff]   ;;  %v8163_v24 = vld [vmem:[#allocation4 + $0x484] ss:$8 sps:$4 sm:$0xff]  }
 0x50b   : > { %5005 = vmatpush1.bf16.msra.mxu1 %v8059_v61  ;;  %5426 = vmatprep.subr.bf16.mxu0 %v8064_v4  ;;  %v8086_v61 = vld [vmem:[#allocation4 + $0x160] ss:$8 sps:$4 sm:$0xff]   ;;  %v8089_v4 = vld [vmem:[#allocation4 + $0x390] ss:$8 sps:$4 sm:$0xff]   ;;  %v8160_v21 = vld [vmem:[#allocation4 + $0x474] ss:$8 sps:$4 sm:$0xff]  }
 0x50c   : > { %5006 = vmatprep.subr.bf16.mxu1 %v8067_v31  ;;  %v8094_v31 = vld [vmem:[#allocation4 + $0x174] ss:$8 sps:$4 sm:$0xff]   ;;  %v8167_v44 = vld [vmem:[#allocation4 + $0x4a0] ss:$8 sps:$4 sm:$0xff]   ;;  %v8200_v20 = vld [vmem:[#allocation4 + $0x550] ss:$8 sps:$4 sm:$0xff]  }
 0x50d   : > { %5412 = vmatmul.mubr.bf16.gmra.mrb[12].mxu0 %v4482_v17  ;;  %v8080_v17 = vld [vmem:[#allocation4 + $0x150] ss:$8 sps:$4 sm:$0xff]   ;;  %v8166_v30 = vld [vmem:[#allocation4 + $0x494] ss:$8 sps:$4 sm:$0xff]   ;;  %v8233_v54 = vld [vmem:[%s12059_s7 + $0xc0] sm:$0xff]  }
 0x50e   : > { %5427 = vmatpush1.bf16.msra.mxu0 %v8062_v53  ;;  %7137 = vmatprep.mubr.msk.bf16.mxu0 %vm11561_vm1, %v7136_v36  ;;  %v8083_v36 = vld [vmem:[#allocation4 + $0x380] ss:$8 sps:$4 sm:$0xff]   ;;  %v8097_v53 = vld [vmem:[#allocation4 + $0x3a4] ss:$8 sps:$4 sm:$0xff]   ;;  %v8202_v26 = vld [vmem:[#allocation4 + $0x554] ss:$8 sps:$4 sm:$0xff]  }
 0x50f   : > { %5007 = vmatpush1.bf16.msra.mxu1 %v8065_v48  ;;  %5428 = vmatprep.subr.bf16.mxu0 %v8070_v62  ;;  %v8092_v48 = vld [vmem:[#allocation4 + $0x170] ss:$8 sps:$4 sm:$0xff]   ;;  %v8095_v62 = vld [vmem:[#allocation4 + $0x3a0] ss:$8 sps:$4 sm:$0xff]  }
 0x510   : > { %5008 = vmatprep.subr.bf16.mxu1 %v8073_v25  ;;  %v8100_v25 = vld [vmem:[#allocation4 + $0x184] ss:$8 sps:$4 sm:$0xff]   ;;  %v8203_v23 = vld [vmem:[#allocation4 + $0x560] ss:$8 sps:$4 sm:$0xff]   ;;  %v8245_v22 = vld [vmem:[%s12059_s7 + $0xf0] sm:$0xff]  }
 0x511   : > { %v8234_v28 = vld [vmem:[%s12059_s7 + $0x80] sm:$0xff]   ;;  %v8235_v52 = vld [vmem:[%s12059_s7 + $0xc8] sm:$0xff]   ;;  %v8247_v59 = vld [vmem:[%s12059_s7 + $0xf8] sm:$0xff]  }
 0x512   : > { %5429 = vmatpush1.bf16.msra.mxu0 %v8068_v2  ;;  %v8103_v2 = vld [vmem:[#allocation4 + $0x3b4] ss:$8 sps:$4 sm:$0xff]   ;;  %v8244_v57 = vld [vmem:[%s12059_s7 + $0xa8] sm:$0xff]  }
 0x513   : > { %5009 = vmatpush1.bf16.msra.mxu1 %v8071_v15  ;;  %5430 = vmatprep.subr.bf16.mxu0 %v8076_v3  ;;  %v8098_v15 = vld [vmem:[#allocation4 + $0x180] ss:$8 sps:$4 sm:$0xff]   ;;  %v8101_v3 = vld [vmem:[#allocation4 + $0x3b0] ss:$8 sps:$4 sm:$0xff]  }
 0x514   : > { %5010 = vmatprep.subr.bf16.mxu1 %v8079_v19  ;;  %v8106_v19 = vld [vmem:[#allocation4 + $0x194] ss:$8 sps:$4 sm:$0xff]  }
 0x515   : > { %v8248_v45 = vld [vmem:[%s12059_s7 + $0xb8] sm:$0xff]  }
 0x516   : > { %5431 = vmatpush1.bf16.msra.mxu0 %v8074_v40  ;;  %v8109_v40 = vld [vmem:[#allocation4 + $0x3c4] ss:$8 sps:$4 sm:$0xff]  }
 0x517   : > { %5011 = vmatpush1.bf16.msra.mxu1 %v8077_v32  ;;  %5432 = vmatprep.subr.bf16.mxu0 %v8082_v63  ;;  %v8104_v32 = vld [vmem:[#allocation4 + $0x190] ss:$8 sps:$4 sm:$0xff]   ;;  %v8107_v63 = vld [vmem:[#allocation4 + $0x3c0] ss:$8 sps:$4 sm:$0xff]  }
 0x518   : > { %5012 = vmatprep.subr.bf16.mxu1 %v8085_v29  ;;  %v8112_v29 = vld [vmem:[#allocation4 + $0x1a4] ss:$8 sps:$4 sm:$0xff]  }
 0x51a   : > { %5433 = vmatpush1.bf16.msra.mxu0 %v8080_v17  ;;  %v8115_v17 = vld [vmem:[#allocation4 + $0x3d4] ss:$8 sps:$4 sm:$0xff]  }
 0x51b   : > { %5013 = vmatpush1.bf16.msra.mxu1 %v8083_v36  ;;  %5434 = vmatprep.subr.bf16.mxu0 %v8088_v34  ;;  %v8110_v36 = vld [vmem:[#allocation4 + $0x1a0] ss:$8 sps:$4 sm:$0xff]   ;;  %v8113_v34 = vld [vmem:[#allocation4 + $0x3d0] ss:$8 sps:$4 sm:$0xff]  }
 0x51c   : > { %5014 = vmatprep.subr.bf16.mxu1 %v8091_v38  ;;  %v8118_v38 = vld [vmem:[#allocation4 + $0x1b4] ss:$8 sps:$4 sm:$0xff]  }
 0x51e   : > { %5435 = vmatpush1.bf16.msra.mxu0 %v8086_v61  ;;  %v8121_v61 = vld [vmem:[#allocation4 + $0x3e4] ss:$8 sps:$4 sm:$0xff]  }
 0x51f   : > { %5015 = vmatpush1.bf16.msra.mxu1 %v8089_v4  ;;  %5436 = vmatprep.subr.bf16.mxu0 %v8094_v31  ;;  %v8116_v4 = vld [vmem:[#allocation4 + $0x1b0] ss:$8 sps:$4 sm:$0xff]   ;;  %v8119_v31 = vld [vmem:[#allocation4 + $0x3e0] ss:$8 sps:$4 sm:$0xff]  }
 0x520   : > { %5016 = vmatprep.subr.bf16.mxu1 %v8097_v53  ;;  %v8124_v53 = vld [vmem:[#allocation4 + $0x1c4] ss:$8 sps:$4 sm:$0xff]  }
 0x522   : > { %5437 = vmatpush1.bf16.msra.mxu0 %v8092_v48  ;;  %v8127_v48 = vld [vmem:[#allocation4 + $0x3f4] ss:$8 sps:$4 sm:$0xff]  }
 0x523   : > { %5017 = vmatpush1.bf16.msra.mxu1 %v8095_v62  ;;  %5438 = vmatprep.subr.bf16.mxu0 %v8100_v25  ;;  %v8122_v62 = vld [vmem:[#allocation4 + $0x1c0] ss:$8 sps:$4 sm:$0xff]   ;;  %v8125_v25 = vld [vmem:[#allocation4 + $0x3f0] ss:$8 sps:$4 sm:$0xff]  }
 0x524   : > { %5018 = vmatprep.subr.bf16.mxu1 %v8103_v2  ;;  %v8130_v2 = vld [vmem:[#allocation4 + $0x1d4] ss:$8 sps:$4 sm:$0xff]  }
 0x526   : > { %5439 = vmatpush1.bf16.msra.mxu0 %v8098_v15  ;;  %v8128_v15 = vld [vmem:[#allocation4 + $0x1d0] ss:$8 sps:$4 sm:$0xff]  }
 0x527   : > { %5019 = vmatpush1.bf16.msra.mxu1 %v8101_v3  ;;  %5440 = vmatprep.subr.bf16.mxu0 %v8106_v19  ;;  %v8133_v3 = vld [vmem:[#allocation4 + $0x1e4] ss:$8 sps:$4 sm:$0xff]   ;;  %v8131_v19 = vld [vmem:[#allocation4 + $0x1e0] ss:$8 sps:$4 sm:$0xff]  }
 0x528   : > { %5020 = vmatprep.subr.bf16.mxu1 %v8109_v40  ;;  %v8136_v40 = vld [vmem:[#allocation4 + $0x1f4] ss:$8 sps:$4 sm:$0xff]  }
 0x52a   : > { %5441 = vmatpush1.bf16.msra.mxu0 %v8104_v32  ;;  %v8134_v32 = vld [vmem:[#allocation4 + $0x1f0] ss:$8 sps:$4 sm:$0xff]  }
 0x52b   : > { %5021 = vmatpush1.bf16.msra.mxu1 %v8107_v63  ;;  %5442 = vmatprep.subr.bf16.mxu0 %v8112_v29  ;;  %v8139_v63 = vld [vmem:[#allocation4 + $0x404] ss:$8 sps:$4 sm:$0xff]   ;;  %v8137_v29 = vld [vmem:[#allocation4 + $0x400] ss:$8 sps:$4 sm:$0xff]  }
 0x52c   : > { %5022 = vmatprep.subr.bf16.mxu1 %v8115_v17  ;;  %v8170_v17 = vld [vmem:[#allocation4 + $0x4b0] ss:$8 sps:$4 sm:$0xff]  }
 0x52e   : > { %5443 = vmatpush1.bf16.msra.mxu0 %v8110_v36  ;;  %v8175_v36 = vld [vmem:[#allocation4 + $0x4c4] ss:$8 sps:$4 sm:$0xff]  }
 0x52f   : > { %5023 = vmatpush1.bf16.msra.mxu1 %v8113_v34  ;;  %5444 = vmatprep.subr.bf16.mxu0 %v8118_v38  ;;  %v8173_v34 = vld [vmem:[#allocation4 + $0x4c0] ss:$8 sps:$4 sm:$0xff]   ;;  %v8178_v38 = vld [vmem:[#allocation4 + $0x4d4] ss:$8 sps:$4 sm:$0xff]  }
 0x530   : > { %5024 = vmatprep.subr.bf16.mxu1 %v8121_v61  ;;  %v8176_v61 = vld [vmem:[#allocation4 + $0x4d0] ss:$8 sps:$4 sm:$0xff]  }
 0x532   : > { %5445 = vmatpush1.bf16.msra.mxu0 %v8116_v4  ;;  %v8181_v4 = vld [vmem:[#allocation4 + $0x4e4] ss:$8 sps:$4 sm:$0xff]  }
 0x533   : > { %5025 = vmatpush1.bf16.msra.mxu1 %v8119_v31  ;;  %5446 = vmatprep.subr.bf16.mxu0 %v8124_v53  ;;  %v8179_v31 = vld [vmem:[#allocation4 + $0x4e0] ss:$8 sps:$4 sm:$0xff]   ;;  %v8184_v53 = vld [vmem:[#allocation4 + $0x4f4] ss:$8 sps:$4 sm:$0xff]  }
 0x534   : > { %5026 = vmatprep.subr.bf16.mxu1 %v8127_v48  ;;  %v8182_v48 = vld [vmem:[#allocation4 + $0x4f0] ss:$8 sps:$4 sm:$0xff]  }
 0x536   : > { %5447 = vmatpush1.bf16.msra.mxu0 %v8122_v62  ;;  %v8187_v62 = vld [vmem:[#allocation4 + $0x504] ss:$8 sps:$4 sm:$0xff]  }
 0x537   : > { %5027 = vmatpush1.bf16.msra.mxu1 %v8125_v25  ;;  %5448 = vmatprep.subr.bf16.mxu0 %v8130_v2  ;;  %v8185_v25 = vld [vmem:[#allocation4 + $0x500] ss:$8 sps:$4 sm:$0xff]  }
 0x538   : > { %7363 = vmatprep.subr.bf16.mxu1 %v8233_v54 }
 0x53a   : > { %5029 = vmatmul.mubr.bf16.vlgmr.msra.gmra.mrb[8].mxu1 %v4552_v50  ;;  %5449 = vmatpush1.bf16.msra.mxu0 %v8128_v15  ;;  %v8145_v50 = vld [vmem:[#allocation4 + $0x424] ss:$8 sps:$4 sm:$0xff]   ;;  %v8190_v15 = vld [vmem:[#allocation4 + $0x514] ss:$8 sps:$4 sm:$0xff]  }
 0x53b   : > { %5038 = vmatprep.mubr.bf16.mxu1 %v4557_v13  ;;  %5450 = vmatprep.subr.bf16.mxu0 %v8133_v3  ;;  %v8157_v13 = vld [vmem:[#allocation4 + $0x464] ss:$8 sps:$4 sm:$0xff]   ;;  %v8188_v3 = vld [vmem:[#allocation4 + $0x510] ss:$8 sps:$4 sm:$0xff]  }
 0x53c   : > { %7364 = vmatpush3.bf16.msra.mxu1 %v8234_v28 }
 0x53d   : > { %7365 = vmatprep.subr.bf16.mxu1 %v8235_v52 }
 0x53e   : > { %5451 = vmatpush1.bf16.msra.mxu0 %v8131_v19  ;;  %v8193_v19 = vld [vmem:[#allocation4 + $0x524] ss:$8 sps:$4 sm:$0xff]  }
 0x53f   : > { %5452 = vmatprep.subr.bf16.mxu0 %v8136_v40  ;;  %v8196_v40 = vld [vmem:[#allocation4 + $0x534] ss:$8 sps:$4 sm:$0xff]  }
 0x542   : > { %5039 = vmatmul.mubr.bf16.gmra.mrb[12].mxu1 %v4556_v18  ;;  %5453 = vmatpush1.bf16.msra.mxu0 %v8134_v32  ;;  %v8155_v18 = vld [vmem:[#allocation4 + $0x460] ss:$8 sps:$4 sm:$0xff]   ;;  %v8237_v32 = vld [vmem:[%s12059_s7 + $0xd0] sm:$0xff]  }
 0x543   : > { %5868 = vmatprep.subr.bf16.mxu0 %v8139_v63  ;;  %v8206_v63 = vld [vmem:[#allocation4 + $0x570] ss:$8 sps:$4 sm:$0xff]  }
 0x545   : > { %7140 = vmatmul.mubr.msk.bf16.vlgmr.msra.gmra.mrb[8].mxu0 %vm11561_vm1, %v7139_v51  ;;  %v8154_v51 = vld [vmem:[#allocation4 + $0x454] ss:$8 sps:$4 sm:$0xff]  }
 0x546   : > { %5464 = vmatprep.mubr.bf16.mxu0 %v4485_v27  ;;  %5869 = vmatpush1.bf16.msra.mxu0 %v8137_v29  ;;  %v8161_v27 = vld [vmem:[#allocation4 + $0x480] ss:$8 sps:$4 sm:$0xff]   ;;  %v8211_v29 = vld [vmem:[#allocation4 + $0x584] ss:$8 sps:$4 sm:$0xff]  }
 0x547   : > { %5870 = vmatprep.subr.bf16.mxu0 %v8142_v16  ;;  %v8238_v16 = vld [vmem:[%s12059_s7 + $0x90] sm:$0xff]  }
 0x54a   : > { %5871 = vmatpush1.bf16.msra.mxu0 %v8140_v46  ;;  %v8239_v46 = vld [vmem:[%s12059_s7 + $0xd8] sm:$0xff]  }
 0x54b   : > { %5872 = vmatprep.subr.bf16.mxu0 %v8145_v50  ;;  %v8209_v50 = vld [vmem:[#allocation4 + $0x580] ss:$8 sps:$4 sm:$0xff]  }
 0x54d   : > { %5465 = vmatmul.mubr.bf16.gmra.mrb[12].mxu0 %v4484_v33  ;;  %v8169_v33 = vld [vmem:[#allocation4 + $0x4a4] ss:$8 sps:$4 sm:$0xff]  }
 0x54e   : > { %5873 = vmatpush1.bf16.msra.mxu0 %v8143_v0  ;;  %5900 = vmatprep.mubr.bf16.mxu0 %v5476_v12  ;;  %v8172_v12 = vld [vmem:[#allocation4 + $0x4b4] ss:$8 sps:$4 sm:$0xff]  }
 0x54f   : > { %5874 = vmatprep.subr.bf16.mxu0 %v8148_v35  ;;  %v8214_v0 = vld [vmem:[#allocation4 + $0x594] ss:$8 sps:$4 sm:$0xff]  }
 0x550   : > { %v8240_v35 = vld [vmem:[%s12059_s7 + $0x98] sm:$0xff]  }
 0x552   : > { %5875 = vmatpush1.bf16.msra.mxu0 %v8146_v39  ;;  %v8241_v39 = vld [vmem:[%s12059_s7 + $0xe0] sm:$0xff]  }
 0x553   : > { %5876 = vmatprep.subr.bf16.mxu0 %v8151_v1  ;;  %v8212_v1 = vld [vmem:[#allocation4 + $0x590] ss:$8 sps:$4 sm:$0xff]  }
 0x556   : > { %5877 = vmatpush1.bf16.msra.mxu0 %v8149_v42  ;;  %v8217_v42 = vld [vmem:[#allocation4 + $0x5a4] ss:$8 sps:$4 sm:$0xff]  }
 0x557   : > { %5878 = vmatprep.subr.bf16.mxu0 %v8154_v51  ;;  %v8242_v51 = vld [vmem:[%s12059_s7 + $0xa0] sm:$0xff]  }
 0x55a   : > { %5879 = vmatpush1.bf16.msra.mxu0 %v8152_v8  ;;  %v8215_v8 = vld [vmem:[#allocation4 + $0x5a0] ss:$8 sps:$4 sm:$0xff]  }
 0x55b   : > { %5880 = vmatprep.subr.bf16.mxu0 %v8157_v13  ;;  %v8220_v13 = vld [vmem:[#allocation4 + $0x5b4] ss:$8 sps:$4 sm:$0xff]  }
 0x55e   : > { %5881 = vmatpush1.bf16.msra.mxu0 %v8155_v18  ;;  %v8218_v18 = vld [vmem:[#allocation4 + $0x5b0] ss:$8 sps:$4 sm:$0xff]  }
 0x55f   : > { %5882 = vmatprep.subr.bf16.mxu0 %v8160_v21  ;;  %v8223_v21 = vld [vmem:[#allocation4 + $0x5c4] ss:$8 sps:$4 sm:$0xff]  }
 0x562   : > { %5883 = vmatpush1.bf16.msra.mxu0 %v8158_v47  ;;  %v8221_v47 = vld [vmem:[#allocation4 + $0x5c0] ss:$8 sps:$4 sm:$0xff]  }
 0x563   : > { %5884 = vmatprep.subr.bf16.mxu0 %v8163_v24  ;;  %v8226_v24 = vld [vmem:[#allocation4 + $0x5d4] ss:$8 sps:$4 sm:$0xff]  }
 0x566   : > { %5885 = vmatpush1.bf16.msra.mxu0 %v8161_v27  ;;  %v8224_v27 = vld [vmem:[#allocation4 + $0x5d0] ss:$8 sps:$4 sm:$0xff]  }
 0x567   : > { %5886 = vmatprep.subr.bf16.mxu0 %v8166_v30  ;;  %v8229_v30 = vld [vmem:[#allocation4 + $0x5e4] ss:$8 sps:$4 sm:$0xff]  }
 0x56a   : > { %5887 = vmatpush1.bf16.msra.mxu0 %v8164_v10  ;;  %v8227_v10 = vld [vmem:[#allocation4 + $0x5e0] ss:$8 sps:$4 sm:$0xff]  }
 0x56b   : > { %5888 = vmatprep.subr.bf16.mxu0 %v8169_v33  ;;  %v8232_v33 = vld [vmem:[#allocation4 + $0x5f4] ss:$8 sps:$4 sm:$0xff]  }
 0x56e   : > { %5889 = vmatpush1.bf16.msra.mxu0 %v8167_v44  ;;  %v8230_v44 = vld [vmem:[#allocation4 + $0x5f0] ss:$8 sps:$4 sm:$0xff]  }
 0x56f   : > { %5890 = vmatprep.subr.bf16.mxu0 %v8172_v12 }
 0x572   : > { %5891 = vmatpush1.bf16.msra.mxu0 %v8170_v17 }
 0x573   : > { %5892 = vmatprep.subr.bf16.mxu0 %v8175_v36 }
 0x576   : > { %5893 = vmatpush1.bf16.msra.mxu0 %v8173_v34 }
 0x577   : > { %5894 = vmatprep.subr.bf16.mxu0 %v8178_v38 }
 0x57a   : > { %5895 = vmatpush1.bf16.msra.mxu0 %v8176_v61 }
 0x57b   : > { %5896 = vmatprep.subr.bf16.mxu0 %v8181_v4  ;;  %v4381_v4 = vld [vmem:[%s12058_s6] sm:$0x3] }
 0x57e   : > { %5897 = vmatpush1.bf16.msra.mxu0 %v8179_v31  ;;  %v12772_v31 = vsub.s32 0, %v12767_v6 }
 0x57f   : > { %5898 = vmatprep.subr.bf16.mxu0 %v8184_v53 }
 0x580   : > { %v5986_v53 = vrot.slane %v4381_v4, %v12772_v31 }
 0x582   : > { %5899 = vmatpush1.bf16.msra.mxu0 %v8182_v48 }
 0x583   : > { %5921 = vmatprep.subr.bf16.mxu0 %v8187_v62  ;;  %v12773_v62 = vsub.s32 1, %v12767_v6 }
 0x585   : > { %5901 = vmatmul.mubr.bf16.vlgmr.msra.gmra.mrb[8].mxu0 %v5475_v11  ;;  %v8197_v11 = vld [vmem:[#allocation4 + $0x540] ss:$8 sps:$4 sm:$0xff]  }
 0x586   : > { %7207 = vmatprep.mubr.msk.bf16.mxu0 %vm11735_vm2, %v7206_v43  ;;  %5922 = vmatpush1.bf16.msra.mxu0 %v8185_v25  ;;  %v8205_v43 = vld [vmem:[#allocation4 + $0x564] ss:$8 sps:$4 sm:$0xff]   ;;  %v5990_v25 = vrot.slane %v4381_v4, %v12773_v62 }
 0x587   : > { %5923 = vmatprep.subr.bf16.mxu0 %v8190_v15 }
 0x58a   : > { %5924 = vmatpush1.bf16.msra.mxu0 %v8188_v3 }
 0x58b   : > { %5925 = vmatprep.subr.bf16.mxu0 %v8193_v19 }
 0x58d   : > { %7210 = vmatmul.mubr.msk.bf16.gmra.mrb[12].mxu0 %vm11735_vm2, %v7209_v56  ;;  %v8208_v56 = vld [vmem:[#allocation4 + $0x574] ss:$8 sps:$4 sm:$0xff]  }
 0x58e   : > { %5926 = vmatpush1.bf16.msra.mxu0 %v8191_v37  ;;  %5953 = vmatprep.mubr.bf16.mxu0 %v5478_v58  ;;  %v8236_v58 = vld [vmem:[%s12059_s7 + $0x88] sm:$0xff]  }
 0x58f   : > { %5927 = vmatprep.subr.bf16.mxu0 %v8196_v40  ;;  %7366 = vmatpush3.bf16.msra.mxu1 %v8236_v58 }
 0x590   : > { %7367 = vmatprep.subr.bf16.mxu1 %v8237_v32 }
 0x592   : > { %5928 = vmatpush1.bf16.msra.mxu0 %v8194_v60 }
 0x593   : > { %5929 = vmatprep.subr.bf16.mxu0 %v8199_v9  ;;  %7368 = vmatpush3.bf16.msra.mxu1 %v8238_v16 }
 0x594   : > { %7369 = vmatprep.subr.bf16.mxu1 %v8239_v46 }
 0x596   : > { %5930 = vmatpush1.bf16.msra.mxu0 %v8197_v11 }
 0x597   : > { %5931 = vmatprep.subr.bf16.mxu0 %v8202_v26  ;;  %7370 = vmatpush3.bf16.msra.mxu1 %v8240_v35 }
 0x598   : > { %7371 = vmatprep.subr.bf16.mxu1 %v8241_v39 }
 0x59a   : > { %5932 = vmatpush1.bf16.msra.mxu0 %v8200_v20 }
 0x59b   : > { %5933 = vmatprep.subr.bf16.mxu0 %v8205_v43  ;;  %7372 = vmatpush3.bf16.msra.mxu1 %v8242_v51 }
 0x59e   : > { %5934 = vmatpush1.bf16.msra.mxu0 %v8203_v23 }
 0x59f   : > { %5935 = vmatprep.subr.bf16.mxu0 %v8208_v56 }
 0x5a2   : > { %5936 = vmatpush1.bf16.msra.mxu0 %v8206_v63 }
 0x5a3   : > { %5937 = vmatprep.subr.bf16.mxu0 %v8211_v29 }
 0x5a6   : > { %5938 = vmatpush1.bf16.msra.mxu0 %v8209_v50 }
 0x5a7   : > { %5939 = vmatprep.subr.bf16.mxu0 %v8214_v0 }
 0x5aa   : > { %5940 = vmatpush1.bf16.msra.mxu0 %v8212_v1 }
 0x5ab   : > { %5941 = vmatprep.subr.bf16.mxu0 %v8217_v42 }
 0x5ae   : > { %5942 = vmatpush1.bf16.msra.mxu0 %v8215_v8 }
 0x5af   : > { %5943 = vmatprep.subr.bf16.mxu0 %v8220_v13  ;;  %v8250_v13 = vld [vmem:[%s12059_s7] sm:$0xff]  }
 0x5b2   : > { %5944 = vmatpush1.bf16.msra.mxu0 %v8218_v18 }
 0x5b3   : > { %5945 = vmatprep.subr.bf16.mxu0 %v8223_v21 }
 0x5b6   : > { %5946 = vmatpush1.bf16.msra.mxu0 %v8221_v47 }
 0x5b7   : > { %5947 = vmatprep.subr.bf16.mxu0 %v8226_v24 }
 0x5ba   : > { %5948 = vmatpush1.bf16.msra.mxu0 %v8224_v27 }
 0x5bb   : > { %5949 = vmatprep.subr.bf16.mxu0 %v8229_v30  ;;  %v8251_v30 = vld [vmem:[%s12059_s7 + $0x48] sm:$0xff]  }
 0x5be   : > { %5950 = vmatpush1.bf16.msra.mxu0 %v8227_v10 }
 0x5bf   : > { %5951 = vmatprep.subr.bf16.mxu0 %v8232_v33 }
 0x5c2   : > { %5952 = vmatpush1.bf16.msra.mxu0 %v8230_v44 }
 0x5c5   : > { %5954 = vmatmul.mubr.bf16.vlgmr.msra.gmra.mrb[8].mxu0 %v5477_v41  ;;  %v8243_v41 = vld [vmem:[%s12059_s7 + $0xe8] sm:$0xff]  }
 0x5c6   : > { %7213 = vmatprep.mubr.msk.bf16.mxu0 %vm11735_vm2, %v7212_v14  ;;  %7373 = vmatprep.subr.bf16.mxu1 %v8243_v41  ;;  %v8246_v14 = vld [vmem:[%s12059_s7 + $0xb0] sm:$0xff]  }
 0x5c7   : > { %7374 = vmatpush3.bf16.msra.mxu1 %v8244_v57  ;;  %v8253_v57 = vld [vmem:[%s12059_s7 + $0x50] sm:$0xff]  }
 0x5c8   : > { %7375 = vmatprep.subr.bf16.mxu1 %v8245_v22 }
 0x5cb   : > { %7376 = vmatpush3.bf16.msra.mxu1 %v8246_v14 }
 0x5cc   : > { %7377 = vmatprep.subr.bf16.mxu1 %v8247_v59 }
 0x5cd   : > { %7216 = vmatmul.mubr.msk.bf16.gmra.mrb[12].mxu0 %vm11735_vm2, %v7215_v7  ;;  %v8249_v7 = vld [vmem:[%s12059_s7 + $0x40] sm:$0xff]  }
 0x5cf   : > { %7378 = vmatpush3.bf16.msra.mxu1 %v8248_v45 }
 0x5d0   : > { %7391 = vmatprep.subr.bf16.mxu1 %v8249_v7 }
 0x60d   : > { %v5030_v12 = vpop.f32.mrb[8].mxu1 }
 0x60e   : > { %v5032_v17 = vpop.f32.mrb[9].mxu1 }
 0x60f   : > { %v5034_v36 = vpop.f32.mrb[10].mxu1 }
 0x610   : > { %v5036_v34 = vpop.f32.mrb[11].mxu1 }
 0x615   : > { %v5040_v38 = vpop.f32.mrb[12].mxu1 }
 0x616   : > { %v5042_v61 = vpop.f32.mrb[13].mxu1 }
 0x617   : > { %v5044_v49 = vpop.f32.mrb[14].mxu1 }
 0x618   : > { %v5046_v5 = vpop.f32.mrb[15].mxu1 }
 0x698   : > { %v5955_v48 = vpop.f32.mrb[8].mxu0 }
 0x699   : > { %v7480_v15 = vadd.f32 %v5955_v48, %v5030_v12  ;;  %v5957_v3 = vpop.f32.mrb[9].mxu0 }
 0x69a   : > { %v7481_v19 = vadd.f32 %v5957_v3, %v5032_v17  ;;  %v5959_v37 = vpop.f32.mrb[10].mxu0 }
 0x69b   : > { %v5993_v40 = vadd.f32 %v7480_v15, %v5986_v53  ;;  %v7482_v60 = vadd.f32 %v5959_v37, %v5034_v36  ;;  %v5961_v9 = vpop.f32.mrb[11].mxu0 }
 0x69c   : > { %v5994_v11 = vadd.f32 %v7481_v19, %v5990_v25  ;;  %v7483_v26 = vadd.f32 %v5961_v9, %v5036_v34  ;;  %v8255_v19 = vld [vmem:[%s12059_s7 + $0x58] sm:$0xff]  }
 0x69d   : > { %v11826_v20 = vmax.f32 %v5993_v40, 0.0  ;;  %v5995_v43 = vadd.f32 %v7482_v60, %v5986_v53 }
 0x69e   : > { %v11828_v54 = vmax.f32 %v5994_v11, 0.0  ;;  %v5996_v28 = vadd.f32 %v7483_v26, %v5990_v25 }
 0x69f   : > { %v6010_v52 = vrot.slane %v11826_v20, 7  ;;  %v6003_v23 = vmax.f32 %v5995_v43, 0.0  ;;  %v6034_v56 = vrot.slane %v11826_v20, 1 }
 0x6a0   : > { %v6011_v58 = vrot.slane %v11828_v54, 7  ;;  %v6035_v32 = vrot.slane %v11828_v54, 1  ;;  %v6004_v63 = vmax.f32 %v5996_v28, 0.0  ;;  %v5965_v29 = vpop.f32.mrb[12].mxu0 }
 0x6a1   : > { %v6012_v16 = vrot.slane %v6003_v23, 7  ;;  %v6036_v46 = vrot.slane %v6003_v23, 1  ;;  %v6094_v50 = vpack.c.bf16 %v6003_v23, %v11826_v20  ;;  %v7484_v0 = vadd.f32 %v5965_v29, %v5040_v38  ;;  %v5967_v35 = vpop.f32.mrb[13].mxu0  ;;  %v8256_v29 = vld [vmem:[%s12059_s7 + $0x18] sm:$0xff]   ;;  %v8259_v20 = vld [vmem:[%s12059_s7 + $0x68] sm:$0xff]  }
 0x6a2   : > { %v6013_v39 = vrot.slane %v6004_v63, 7  ;;  %v6037_v1 = vrot.slane %v6004_v63, 1  ;;  %v7485_v42 = vadd.f32 %v5967_v35, %v5042_v61  ;;  %v5969_v51 = vpop.f32.mrb[14].mxu0  ;;  %v6095_v8 = vpack.c.bf16 %v6004_v63, %v11828_v54  ;;  %v8252_v61 = vld [vmem:[%s12059_s7 + $0x8] sm:$0xff]  }
 0x6a3   : > { %v11841_v18 = vsel %vm2522_vm11, %v6010_v52, %v6012_v16  ;;  %v11847_v21 = vsel %vm2539_vm12, %v6034_v56, %v6036_v46  ;;  %v5997_v47 = vadd.f32 %v7484_v0, %v5986_v53  ;;  %v7486_v24 = vadd.f32 %v5969_v51, %v5044_v49  ;;  %v5971_v27 = vpop.f32.mrb[15].mxu0  ;;  %v8257_v0 = vld [vmem:[%s12059_s7 + $0x60] sm:$0xff]   ;;  %v8264_v51 = vld [vmem:[%s12059_s7 + $0x38] sm:$0xff]  }
 0x6a4   : > { %v5998_v10 = vadd.f32 %v7485_v42, %v5990_v25  ;;  %v7487_v33 = vadd.f32 %v5971_v27, %v5046_v5  ;;  %6259 = vmatprep.mubr.bf16.mxu1 %v6095_v8  ;;  %v6023_v44 = vsel %vm2522_vm11, %v6011_v58, %v6013_v39  ;;  %v11858_v12 = vsel %vm2539_vm12, %v6035_v32, %v6037_v1  ;;  %v8263_v42 = vld [vmem:[%s12059_s7 + $0x78] sm:$0xff]   ;;  %v8265_v8 = vld [vmem:[%s12059_s7 + $0x140] sm:$0xff]   ;;  %v8270_v27 = vld [vmem:[%s12059_s7 + $0x110] sm:$0xff]  }
 0x6a5   : > { %v6005_v17 = vmax.f32 %v5997_v47, 0.0  ;;  %v5999_v36 = vadd.f32 %v7486_v24, %v5986_v53  ;;  %6260 = vmatmul.mubr.bf16.vlgmr.msra.gmra.mrb[16].mxu1 %v6094_v50  ;;  %v8268_v47 = vld [vmem:[%s12059_s7 + $0x108] sm:$0xff]   ;;  %v8269_v24 = vld [vmem:[%s12059_s7 + $0x150] sm:$0xff]  }
 0x6a6   : > { %v6006_v34 = vmax.f32 %v5998_v10, 0.0  ;;  %v6000_v38 = vadd.f32 %v7487_v33, %v5990_v25  ;;  %7392 = vmatpush3.bf16.msra.mxu1 %v8250_v13  ;;  %v8254_v25 = vld [vmem:[%s12059_s7 + $0x10] sm:$0xff]   ;;  %v8266_v13 = vld [vmem:[%s12059_s7 + $0x100] sm:$0xff]  }
 0x6a7   : > { %v6014_v49 = vrot.slane %v6005_v17, 7  ;;  %v6038_v5 = vrot.slane %v6005_v17, 1  ;;  %v6007_v41 = vmax.f32 %v5999_v36, 0.0  ;;  %7393 = vmatprep.subr.bf16.mxu1 %v8251_v30  ;;  %v8272_v30 = vld [vmem:[%s12059_s7 + $0x118] sm:$0xff]   ;;  %v8273_v10 = vld [vmem:[%s12059_s7 + $0x160] sm:$0xff]   ;;  %v8278_v36 = vld [vmem:[%s12059_s7 + $0x130] sm:$0xff]  }
 0x6a8   : > { %v6015_v22 = vrot.slane %v6006_v34, 7  ;;  %v6039_v14 = vrot.slane %v6006_v34, 1  ;;  %v6008_v59 = vmax.f32 %v6000_v38, 0.0  ;;  %v8274_v33 = vld [vmem:[%s12059_s7 + $0x120] sm:$0xff]   ;;  %v8280_v38 = vld [vmem:[%s12059_s7 + $0x138] sm:$0xff]  }
 0x6a9   : > { %v11868_v45 = vsel %vm2539_vm12, %v6036_v46, %v6038_v5  ;;  %v6016_v7 = vrot.slane %v6007_v41, 7  ;;  %v6040_v4 = vrot.slane %v6007_v41, 1  ;;  %v6096_v31 = vpack.c.bf16 %v6007_v41, %v6005_v17  ;;  %v8277_v17 = vld [vmem:[%s12059_s7 + $0x170] sm:$0xff]  }
 0x6aa   : > { %v6017_v53 = vrot.slane %v6008_v59, 7  ;;  %v6041_v48 = vrot.slane %v6008_v59, 1  ;;  %7394 = vmatpush3.bf16.msra.mxu1 %v8252_v61  ;;  %v6097_v62 = vpack.c.bf16 %v6008_v59, %v6006_v34  ;;  %v6021_v15 = vsel %vm2522_vm11, %v6013_v39, %v6015_v22  ;;  %v8261_v39 = vld [vmem:[%s12059_s7 + $0x70] sm:$0xff]   ;;  %v8279_v34 = vld [vmem:[%s12059_s7 + $0x178] sm:$0xff]  }
 0x6ab   : > { %v6024_v3 = vsel %vm2522_vm11, %v6016_v7, %v6010_v52  ;;  %7395 = vmatprep.subr.bf16.mxu1 %v8253_v57  ;;  %v6018_v37 = vsel %vm2522_vm11, %v6014_v49, %v6016_v7  ;;  %v6020_v40 = vsel %vm2522_vm11, %v6012_v16, %v6014_v49  ;;  %v6045_v60 = vsel %vm2539_vm12, %v6037_v1, %v6039_v14  ;;  %v8262_v1 = vld [vmem:[%s12059_s7 + $0x30] sm:$0xff]  }
 0x6ac   : > { %v7285_v9 = vpack.c.bf16 %v11841_v18, %v6024_v3  ;;  %6267 = vmatprep.mubr.bf16.mxu1 %v6097_v62  ;;  %v6025_v11 = vsel %vm2522_vm11, %v6017_v53, %v6011_v58  ;;  %v6019_v26 = vsel %vm2522_vm11, %v6015_v22, %v6017_v53  ;;  %v6060_v43 = vpack.c.bf16 %v6018_v37, %v6020_v40  ;;  %v8267_v18 = vld [vmem:[%s12059_s7 + $0x148] sm:$0xff]   ;;  %v8281_v61 = vld [vmem:[%s12061_s9 + $0x10] sm:$0xff]  }
 0x6ad   : > { %6268 = vmatmul.mubr.bf16.gmra.mrb[20].mxu1 %v6096_v31  ;;  %v7282_v28 = vpack.c.bf16 %v6023_v44, %v6025_v11  ;;  %v6061_v52 = vpack.c.bf16 %v6019_v26, %v6021_v15  ;;  %v6422_v23 = vpack.c.bf16 %v6045_v60, %v11858_v12  ;;  %v6421_v63 = vpack.c.bf16 %v11868_v45, %v11847_v21  ;;  %v8275_v44 = vld [vmem:[%s12059_s7 + $0x168] sm:$0xff]  }
 0x6ae   : > { %7396 = vmatpush3.bf16.msra.mxu1 %v8254_v25  ;;  %v11899_v58 = vsel %vm2539_vm12, %v6039_v14, %v6041_v48  ;;  %v6049_v16 = vsel %vm2539_vm12, %v6041_v48, %v6035_v32  ;;  %v6042_v46 = vsel %vm2539_vm12, %v6038_v5, %v6040_v4  ;;  %v6048_v50 = vsel %vm2539_vm12, %v6040_v4, %v6034_v56  ;;  %v8258_v32 = vld [vmem:[%s12059_s7 + $0x20] sm:$0xff]   ;;  %v8260_v56 = vld [vmem:[%s12059_s7 + $0x28] sm:$0xff]   ;;  %v8282_v5 = vld [vmem:[%s12061_s9 + $0x18] sm:$0xff]  }
 0x6af   : > { %7283 = vmatprep.mubr.msk.bf16.mxu1 %vm11561_vm1, %v7282_v28  ;;  %7397 = vmatprep.subr.bf16.mxu1 %v8255_v19  ;;  %v7336_v54 = vpack.c.bf16 %v6049_v16, %v11899_v58  ;;  %v7339_v35 = vpack.c.bf16 %v6048_v50, %v6042_v46  ;;  %v8276_v12 = vld [vmem:[%s12059_s7 + $0x128] sm:$0xff]   ;;  %v8366_v49 = vmov 0.0   ;;  %v7341_v46 = vld [vmem:[%s12060_s8] ss:$0 sm:$0xff] }
 0x6b2   : > { %7398 = vmatpush3.bf16.msra.mxu1 %v8256_v29 }
 0x6b3   : > { %7399 = vmatprep.subr.bf16.mxu1 %v8257_v0 }
 0x6b6   : > { %7400 = vmatpush3.bf16.msra.mxu1 %v8258_v32 }
 0x6b7   : > { %7401 = vmatprep.subr.bf16.mxu1 %v8259_v20 }
 0x6ba   : > { %7402 = vmatpush3.bf16.msra.mxu1 %v8260_v56 }
 0x6bb   : > { %7403 = vmatprep.subr.bf16.mxu1 %v8261_v39 }
 0x6be   : > { %7404 = vmatpush3.bf16.msra.mxu1 %v8262_v1 }
 0x6bf   : > { %7405 = vmatprep.subr.bf16.mxu1 %v8263_v42 }
 0x6c2   : > { %7406 = vmatpush3.bf16.msra.mxu1 %v8264_v51 }
 0x6c3   : > { %7419 = vmatprep.subr.bf16.mxu1 %v8265_v8 }
 0x6c5   : > { %7286 = vmatmul.mubr.msk.bf16.vlgmr.msra.gmra.mrb[24].mxu1 %vm11561_vm1, %v7285_v9 }
 0x6c6   : > { %6412 = vmatprep.mubr.bf16.mxu1 %v6061_v52  ;;  %7420 = vmatpush3.bf16.msra.mxu1 %v8266_v13 }
 0x6c7   : > { %7421 = vmatprep.subr.bf16.mxu1 %v8267_v18 }
 0x6ca   : > { %7422 = vmatpush3.bf16.msra.mxu1 %v8268_v47 }
 0x6cb   : > { %7423 = vmatprep.subr.bf16.mxu1 %v8269_v24 }
 0x6cd   : > { %6413 = vmatmul.mubr.bf16.gmra.mrb[28].mxu1 %v6060_v43 }
 0x6ce   : > { %7424 = vmatpush3.bf16.msra.mxu1 %v8270_v27  ;;  %6586 = vmatprep.mubr.bf16.mxu1 %v6422_v23 }
 0x6cf   : > { %7425 = vmatprep.subr.bf16.mxu1 %v8271_v55 }
 0x6d2   : > { %7426 = vmatpush3.bf16.msra.mxu1 %v8272_v30  ;;  %v8283_v30 = vld [vmem:[%s12061_s9] sm:$0xff]  }
 0x6d3   : > { %7427 = vmatprep.subr.bf16.mxu1 %v8273_v10 }
 0x6d6   : > { %7428 = vmatpush3.bf16.msra.mxu1 %v8274_v33 }
 0x6d7   : > { %7429 = vmatprep.subr.bf16.mxu1 %v8275_v44 }
 0x6da   : > { %7430 = vmatpush3.bf16.msra.mxu1 %v8276_v12 }
 0x6db   : > { %7431 = vmatprep.subr.bf16.mxu1 %v8277_v17  ;;  %v8284_v17 = vld [vmem:[%s12061_s9 + $0x8] sm:$0xff]  }
 0x6de   : > { %7432 = vmatpush3.bf16.msra.mxu1 %v8278_v36 }
 0x6df   : > { %7433 = vmatprep.subr.bf16.mxu1 %v8279_v34 }
 0x6e2   : > { %7434 = vmatpush3.bf16.msra.mxu1 %v8280_v38  ;;  %v1344_v38 = vadd.s32 8, %v12767_v6  ;;  %v7359_v6 = vld [vmem:[%s12062_s10] ss:$0 sm:$0xff] }
 0x6e3   : > { %7456 = vmatprep.subr.bf16.mxu1 %v8366_v49 }
 0x6e4   : > { %vm6657_vm4 = vcmp.lt.s32.totalorder %v1344_v38, 15 }
 0x6e5   : > { %6587 = vmatmul.mubr.bf16.vlgmr.msra.gmra.mrb[32].mxu1 %v6421_v63 }
 0x6e6   : > { %7337 = vmatprep.mubr.msk.bf16.mxu1 %vm11735_vm2, %v7336_v54  ;;  %7457 = vmatpush3.bf16.msra.mxu1 %v8281_v61 }
 0x6e7   : > { %7458 = vmatprep.subr.bf16.mxu1 %v8366_v49 }
 0x6ea   : > { %7459 = vmatpush3.bf16.msra.mxu1 %v8282_v5  ;;  %v8285_v5 = vld [vmem:[%s12061_s9 + $0x20] sm:$0xff]  }
 0x6eb   : > { %7464 = vmatprep.subr.bf16.mxu1 %v8366_v49 }
 0x6ed   : > { %7340 = vmatmul.mubr.msk.bf16.gmra.mrb[36].mxu1 %vm11735_vm2, %v7339_v35 }
 0x6ee   : > { %7460 = vmatprep.mubr.msk.bf16.mxu1 %vm8367_vm3, %v8366_v49 }
 0x778   : > { %v7379_v21 = vpop.f32.mrb[16].mxu1 }
 0x779   : > { %v7380_v2 = vpop.f32.mrb[17].mxu1 }
 0x77a   : > { %v7381_v41 = vadd.f32 %v7380_v2, %v7379_v21  ;;  %v7382_v57 = vpop.f32.mrb[18].mxu1 }
 0x77b   : > { %v7383_v22 = vpop.f32.mrb[19].mxu1 }
 0x77c   : > { %v7384_v14 = vadd.f32 %v7383_v22, %v7382_v57  ;;  %v8286_v57 = vld [vmem:[%s12061_s9 + $0x28] sm:$0xff]  }
 0x780   : > { %v7385_v59 = vpop.f32.mrb[20].mxu1 }
 0x781   : > { %v7386_v45 = vpop.f32.mrb[21].mxu1 }
 0x782   : > { %v7387_v7 = vadd.f32 %v7386_v45, %v7385_v59  ;;  %v7388_v4 = vpop.f32.mrb[22].mxu1 }
 0x783   : > { %v7389_v31 = vpop.f32.mrb[23].mxu1 }
 0x784   : > { %v7390_v53 = vadd.f32 %v7389_v31, %v7388_v4 }
 0x798   : > { %v7407_v48 = vpop.f32.mrb[24].mxu1 }
 0x799   : > { %v7408_v62 = vpop.f32.mrb[25].mxu1 }
 0x79a   : > { %v7409_v25 = vadd.f32 %v7408_v62, %v7407_v48  ;;  %v7410_v15 = vpop.f32.mrb[26].mxu1 }
 0x79b   : > { %v7411_v3 = vpop.f32.mrb[27].mxu1 }
 0x79c   : > { %v6407_v19 = vadd.f32 %v7409_v25, %v7381_v41  ;;  %v7412_v37 = vadd.f32 %v7411_v3, %v7410_v15 }
 0x79e   : > { %v6410_v40 = vadd.f32 %v7412_v37, %v7384_v14 }
 0x7a0   : > { %v7413_v60 = vpop.f32.mrb[28].mxu1 }
 0x7a1   : > { %v7414_v9 = vpop.f32.mrb[29].mxu1 }
 0x7a2   : > { %v7415_v11 = vadd.f32 %v7414_v9, %v7413_v60  ;;  %v7416_v26 = vpop.f32.mrb[30].mxu1 }
 0x7a3   : > { %v7417_v43 = vpop.f32.mrb[31].mxu1 }
 0x7a4   : > { %v6415_v28 = vadd.f32 %v7415_v11, %v7387_v7  ;;  %v7418_v52 = vadd.f32 %v7417_v43, %v7416_v26 }
 0x7a6   : > { %v6418_v23 = vadd.f32 %v7418_v52, %v7390_v53 }
 0x7b8   : > { %v7435_v63 = vpop.f32.mrb[32].mxu1 }
 0x7b9   : > { %v7436_v29 = vpop.f32.mrb[33].mxu1 }
 0x7ba   : > { %v7437_v58 = vadd.f32 %v7436_v29, %v7435_v63  ;;  %v7438_v16 = vpop.f32.mrb[34].mxu1 }
 0x7bb   : > { %v7439_v50 = vpop.f32.mrb[35].mxu1 }
 0x7bc   : > { %v6603_v0 = vadd.f32 %v7437_v58, %v6407_v19  ;;  %v7440_v54 = vadd.f32 %v7439_v50, %v7438_v16 }
 0x7be   : > { %v6613_v35 = vadd.f32 %v7341_v46, %v6603_v0  ;;  %v6604_v32 = vadd.f32 %v7440_v54, %v6410_v40 }
 0x7c0   : > { %v7441_v20 = vpop.f32.mrb[36].mxu1  ;;  %6617 = vxpose.xlu1.b32.start [1/4] (short) (narrow) %v6613_v35, 16  ;;  %v6614_v39 = vadd.f32 %v7341_v46, %v6604_v32 }
 0x7c1   : > { %v7442_v56 = vpop.f32.mrb[37].mxu1 }
 0x7c2   : > { %v7443_v1 = vadd.f32 %v7442_v56, %v7441_v20  ;;  %v7444_v42 = vpop.f32.mrb[38].mxu1 }
 0x7c3   : > { %v7445_v51 = vpop.f32.mrb[39].mxu1 }
 0x7c4   : > { %v6605_v8 = vadd.f32 %v7443_v1, %v6415_v28  ;;  %v7446_v13 = vadd.f32 %v7445_v51, %v7444_v42  ;;  %6618 = vxpose.xlu1.b32.cont [2/4] (short) (narrow) %v6614_v39, 16 }
 0x7c6   : > { %v6615_v18 = vadd.f32 %v7341_v46, %v6605_v8  ;;  %v6606_v47 = vadd.f32 %v7446_v13, %v6418_v23 }
 0x7c8   : > { %6619 = vxpose.xlu1.b32.cont [3/4] (short) (narrow) %v6615_v18, 16  ;;  %v6616_v24 = vadd.f32 %v7341_v46, %v6606_v47 }
 0x7cc   : > { %6620 = vxpose.xlu1.b32.end [4/4] (short) (narrow) %v6616_v24, 16 }
 0x840   : > { %v6633_v27 = vpop.trf.xlu1 }
 0x841   : > { %v6650_v10 = vrot.slane %v6633_v27, 7  ;;  %v6658_v21 = vrot.slane %v6633_v27, 1 }
 0x844   : > { %v6634_v55 = vpop.trf.xlu1 }
 0x845   : > { %v6651_v33 = vrot.slane %v6634_v55, 7  ;;  %v6669_v44 = vpack.c.bf16 %v6634_v55, %v6633_v27  ;;  %v6659_v61 = vrot.slane %v6634_v55, 1 }
 0x847   : > { %v6653_v12 = vsel %vm2522_vm11, %v6651_v33, %v6650_v10  ;;  %7461 = vmatmul.mubr.msk.bf16.vlgmr.msra.gmra.mrb[40].mxu1 %vm675_vm0, %v6669_v44  ;;  %v6652_v36 = vsel %vm2522_vm11, %v6650_v10, %v6651_v33  ;;  %v6661_v41 = vsel %vm2539_vm12, %v6659_v61, %v6658_v21  ;;  %v6660_v22 = vsel %vm2539_vm12, %v6658_v21, %v6659_v61 }
 0x848   : > { %7465 = vmatpush3.bf16.msra.mxu1 %v8283_v30  ;;  %7468 = vmatprep.mubr.msk.bf16.mxu1 %vm8367_vm3, %v8366_v49  ;;  %v6654_v34 = vsel %vm1347_vm13, %v6653_v12, 0.0  ;;  %v6663_v14 = vsel %vm6657_vm4, %v6661_v41, 0.0 }
 0x849   : > { %7466 = vmatprep.subr.bf16.mxu1 %v8366_v49  ;;  %v6664_v2 = vpack.c.bf16 %v6652_v36, %v6654_v34  ;;  %v6787_v59 = vpack.c.bf16 %v6663_v14, %v6660_v22 }
 0x84c   : > { %7467 = vmatpush3.bf16.msra.mxu1 %v8284_v17 }
 0x84d   : > { %7472 = vmatprep.subr.bf16.mxu1 %v8366_v49 }
 0x84f   : > { %7469 = vmatmul.mubr.msk.bf16.vlgmr.msra.gmra.mrb[44].mxu1 %vm675_vm0, %v6664_v2 }
 0x850   : > { %7473 = vmatpush3.bf16.msra.mxu1 %v8285_v5  ;;  %7476 = vmatprep.mubr.msk.bf16.mxu1 %vm8367_vm3, %v8366_v49 }
 0x851   : > { %7474 = vmatprep.subr.bf16.mxu1 %v8366_v49 }
 0x854   : > { %7475 = vmatpush3.bf16.msra.mxu1 %v8286_v57 }
 0x857   : > { %7477 = vmatmul.mubr.msk.bf16.vlgmr.msra.gmra.mrb[48].mxu1 %vm675_vm0, %v6787_v59  ;;  %vm6859_vm0 = vcmask 121856  }
 0x91a   : > { %v6724_v45 = vpop.f32.mrb[40].mxu1 }
 0x91b   : > { %v7462_v7 = vpop.f32.mrb[41].mxu1 }
 0x91c   : > { %v6727_v4 = vpop.f32.mrb[42].mxu1 }
 0x91d   : > { %v7463_v31 = vpop.f32.mrb[43].mxu1 }
 0x922   : > { %v6780_v53 = vpop.f32.mrb[44].mxu1 }
 0x923   : > { %v6781_v48 = vadd.f32 %v6780_v53, %v6724_v45  ;;  %v7470_v62 = vpop.f32.mrb[45].mxu1 }
 0x924   : > { %v6783_v25 = vpop.f32.mrb[46].mxu1 }
 0x925   : > { %v6784_v15 = vadd.f32 %v6783_v25, %v6727_v4  ;;  %v7471_v3 = vpop.f32.mrb[47].mxu1 }
 0x92a   : > { %v6842_v49 = vpop.f32.mrb[48].mxu1 }
 0x92b   : > { %v6849_v19 = vadd.f32 %v6842_v49, %v6781_v48  ;;  %v7478_v37 = vpop.f32.mrb[49].mxu1 }
 0x92c   : > { %v6845_v40 = vpop.f32.mrb[50].mxu1 }
 0x92d   : > { %v6857_v60 = vadd.f32 %v7359_v6, %v6849_v19  ;;  %v6850_v9 = vadd.f32 %v6845_v40, %v6784_v15  ;;  %v7479_v11 = vpop.f32.mrb[51].mxu1 }
 0x92f   : > { %6860 = vst.msk [vmem:[%s410_s24] sm:$0xff] %vm6859_vm0, %v6857_v60  ;;  %v6858_v26 = vadd.f32 %v7359_v6, %v6850_v9 }
 0x931   : > { %6861 = vst.msk [vmem:[%s410_s24 + $0x8] sm:$0xff] %vm6859_vm0, %v6858_v26 }
 0x932 PF: > { %s23_s17 = sadd.s32 1, %s8358_s17  }
 0x933   : > { %p20_p5 = scmp.ge.s32.totalorder %s23_s17, 4  }
 0x935   :  { %22 = sbr.rel (!%p20_p5) target bundleno = 2 (0x2), region = 111 }
 0x93c   :  { %6883 = vsyncpa [#allocation3], 1 }
 0x93d   :  { %6885 = vsyncpa [#allocation3 + $0x1], 1 }
 0x93e   :  { %6886 = vsyncpa [#allocation5], 1 }

</bundles_post_ra>
